<compile_context>
chip_gen: v7x
topology: tpu7x:2x2x1
jax: 0.10.0
libtpu: 0.0.40
codegen_flags: <defaults>
</compile_context>

<pallas_src>
import functools

import jax
import jax.numpy as jnp
from jax.experimental import pallas as pl
from jax.experimental.pallas import tpu as pltpu


def _round_up(x, m):
    return (x + m - 1) // m * m


# ----------------------------------------------------------------------------
# Fused Pallas kernel: unpool(2,2) + conv3x3+ReLU + conv3x3+ReLU
# ----------------------------------------------------------------------------
def _fused_unpool_convx2_kernel(x_ref, i_ref, m_ref, w1_ref, b1_ref,
                                w2_ref, b2_ref, o_ref, *, W, WB, WH, TP):
    """One (batch, pooled-row-tile) step.

    x_ref : (1, H+4, WS, Cin_p)  pooled values, zero-padded (2 rows / 2+ cols / ch)
    i_ref : (1, H+4, WS, Cin_p)  cell-local pool indices (valid in {0,1,Wo,Wo+1})
    m_ref : (H+2, WH, 1)         f32 validity mask for conv1 outputs
    w1/w2 : (3,3,Cin_p,Cout_p) / (3,3,Cout_p,Cout_p)   bf16, HWIO
    b1/b2 : (1, Cout_p)          f32
    o_ref : (1, 2, 2, TP, W, Cout_p)  (row-parity, col-parity, pooled rows/cols)
    """
    Cout_p = o_ref.shape[-1]
    Wo = 2 * W
    a0 = pl.multiple_of(pl.program_id(1) * TP, TP)   # first pooled row of the tile

    # ---- MaxUnpool2d(2,2) as 4 parity sub-grids at pooled resolution -------
    # padded slice rows [a0, a0+TP+4)  <->  actual pooled rows [a0-2, a0+TP+2)
    xp = x_ref[0, pl.ds(a0, TP + 4), :, :]           # (TP+4, WS, Cin_p) f32
    ip = i_ref[0, pl.ds(a0, TP + 4), :, :]           # (TP+4, WS, Cin_p) int32
    S = {(pr, pc): jnp.where(ip == pr * Wo + pc, xp, 0.0)
         for pr in (0, 1) for pc in (0, 1)}

    w1 = w1_ref[...]
    w2 = w2_ref[...]
    b1 = b1_ref[...]
    b2 = b2_ref[...]

    def tap_getter(grids, rows, cols):
        """Cached, flattened (rows*cols, C) bf16 windows of the parity grids."""
        cache = {}

        def get(par, t0, u0):
            key = (par, t0, u0)
            if key not in cache:
                g = grids[par][t0:t0 + rows, u0:u0 + cols, :]
                cache[key] = g.reshape(rows * cols, g.shape[-1]).astype(jnp.bfloat16)
            return cache[key]

        return get

    # ---- conv1 (3x3, pad 1) + bias + ReLU, per output parity ---------------
    R1 = TP + 2                                       # h1 rows incl. conv2 halo
    get1 = tap_getter(S, R1, WH)
    m1 = m_ref[pl.ds(a0, R1), :, :]                   # (R1, WH, 1)
    H1 = {}
    for qr in (0, 1):
        for qc in (0, 1):
            acc = jnp.zeros((R1 * WH, Cout_p), jnp.float32)
            for di in range(3):
                rr = qr + di - 1
                for dj in range(3):
                    cc = qc + dj - 1
                    acc = acc + jnp.dot(
                        get1((rr & 1, cc & 1), 1 + (rr >> 1), 1 + (cc >> 1)),
                        w1[di, dj], preferred_element_type=jnp.float32)
            h = jnp.maximum(acc + b1, 0.0).reshape(R1, WH, Cout_p)
            H1[(qr, qc)] = h * m1    # zero h1 pixels that lie outside the image

    # ---- conv2 (3x3, pad 1) + bias + ReLU, per output parity ---------------
    get2 = tap_getter(H1, TP, WB)
    for pr in (0, 1):
        for pc in (0, 1):
            acc = jnp.zeros((TP * WB, Cout_p), jnp.float32)
            for di in range(3):
                rr = pr + di - 1
                for dj in range(3):
                    cc = pc + dj - 1
                    acc = acc + jnp.dot(
                        get2((rr & 1, cc & 1), 1 + (rr >> 1), 1 + (cc >> 1)),
                        w2[di, dj], preferred_element_type=jnp.float32)
            out = jnp.maximum(acc + b2, 0.0).reshape(TP, WB, Cout_p)
            o_ref[0, pr, pc] = out[:, :W, :].astype(o_ref.dtype)


# ----------------------------------------------------------------------------
# Wrapper: PyTorch-compatible NCHW API
# ----------------------------------------------------------------------------
def segnet_upx2_forward(x_nchw, indices_nchw, output_shape, params,
                        *, tile_pooled_rows=None):
    """SegNetUpx2 forward (is_deconv=False, is_bn=False, plain ReLU).

    x_nchw, indices_nchw: (N, in_ch, H, W); output_shape: (N, in_ch, 2H, 2W).
    params: w1 (3,3,in_ch,out_ch) HWIO, b1 (out_ch,), w2 (3,3,out_ch,out_ch),
            b2 (out_ch,)  -- all f32.  Returns (N, out_ch, 2H, 2W) f32.
    """
    N, Cin, H, W = x_nchw.shape
    Ho, Wo = int(output_shape[2]), int(output_shape[3])
    # TODO(synk): only the exact 2x MaxUnpool2d(2,2) output_shape is supported
    #             (no ceil_mode / odd output sizes).
    assert (Ho, Wo) == (2 * H, 2 * W), (output_shape, x_nchw.shape)
    Cout = params["w1"].shape[-1]

    # Width padding to multiples of 8 keeps the in-kernel (rows, width, C) <->
    # (rows*width, C) reshapes (8,128)-tile aligned; channels padded to 128 lanes.
    LANES = 128
    Cin_p, Cout_p = _round_up(Cin, LANES), _round_up(Cout, LANES)
    WB = _round_up(W, 8)          # conv2 / output compute width (pooled cols)
    WH = _round_up(WB + 2, 8)     # conv1 / h1 compute width     (pooled cols)
    WS = WH + 2                   # unpool source width          (pooled cols)

    if tile_pooled_rows is None:
        tile_pooled_rows = next(t for t in (8, 4, 2, 1) if H % t == 0)
    TP = tile_pooled_rows
    assert H % TP == 0, (H, TP)

    # --- cheap pooled-resolution glue (no full-resolution HBM intermediates) ---
    x = jnp.transpose(x_nchw, (0, 2, 3, 1)).astype(jnp.float32)         # NHWC
    ind = jnp.transpose(indices_nchw, (0, 2, 3, 1)).astype(jnp.int32)   # NHWC
    # cell-local indices: valid values become {0, 1, Wo, Wo+1}
    ph = jnp.arange(H, dtype=jnp.int32)[None, :, None, None]
    pw = jnp.arange(W, dtype=jnp.int32)[None, None, :, None]
    ind = ind - (2 * ph) * Wo - 2 * pw

    # zero-pad: 2 pooled rows top/bottom, 2 pooled cols left, WH-W right, channels.
    x = jnp.pad(x, ((0, 0), (2, 2), (2, WS - 2 - W), (0, Cin_p - Cin)))
    ind = jnp.pad(ind, ((0, 0), (2, 2), (2, WS - 2 - W), (0, Cin_p - Cin)),
                  constant_values=-1)

    # weights -> bf16 for the MXU; biases stay f32; zero-pad channels.
    w1 = jnp.pad(params["w1"], ((0, 0), (0, 0), (0, Cin_p - Cin),
                                (0, Cout_p - Cout))).astype(jnp.bfloat16)
    w2 = jnp.pad(params["w2"], ((0, 0), (0, 0), (0, Cout_p - Cout),
                                (0, Cout_p - Cout))).astype(jnp.bfloat16)
    b1 = jnp.pad(params["b1"], (0, Cout_p - Cout)).reshape(1, Cout_p).astype(jnp.float32)
    b2 = jnp.pad(params["b2"], (0, Cout_p - Cout)).reshape(1, Cout_p).astype(jnp.float32)

    # h1 validity mask: grid row k <-> pooled row k-1, grid col B <-> pooled col B-1;
    # zero wherever the h1 pixel lies outside the real image (conv2 zero padding).
    row_ok = (jnp.arange(H + 2) >= 1) & (jnp.arange(H + 2) <= H)
    col_ok = (jnp.arange(WH) >= 1) & (jnp.arange(WH) <= W)
    h1_mask = (row_ok[:, None] & col_ok[None, :]).astype(jnp.float32)[:, :, None]

    kernel = functools.partial(_fused_unpool_convx2_kernel,
                               W=W, WB=WB, WH=WH, TP=TP)
    out6 = pl.pallas_call(
        kernel,
        out_shape=jax.ShapeDtypeStruct((N, 2, 2, H, W, Cout_p), jnp.float32),
        grid=(N, H // TP),
        in_specs=[
            pl.BlockSpec((1, H + 4, WS, Cin_p), lambda n, r: (n, 0, 0, 0)),
            pl.BlockSpec((1, H + 4, WS, Cin_p), lambda n, r: (n, 0, 0, 0)),
            pl.BlockSpec((H + 2, WH, 1), lambda n, r: (0, 0, 0)),
            pl.BlockSpec((3, 3, Cin_p, Cout_p), lambda n, r: (0, 0, 0, 0)),
            pl.BlockSpec((1, Cout_p), lambda n, r: (0, 0)),
            pl.BlockSpec((3, 3, Cout_p, Cout_p), lambda n, r: (0, 0, 0, 0)),
            pl.BlockSpec((1, Cout_p), lambda n, r: (0, 0)),
        ],
        out_specs=pl.BlockSpec((1, 2, 2, TP, W, Cout_p),
                               lambda n, r: (n, 0, 0, r, 0, 0)),
        compiler_params=pltpu.CompilerParams(
            dimension_semantics=("parallel", "parallel"),
            vmem_limit_bytes=32 * 1024 * 1024),
    )(x, ind, h1_mask, w1, b1, w2, b2)

    # (N, pr, pc, H, W, C) -> NCHW.  The transpose is needed anyway for the
    # PyTorch API; it also interleaves the parities.  The reshape is layout-free.
    out = out6[..., :Cout]
    out = jnp.transpose(out, (0, 5, 3, 1, 4, 2))      # (N, Cout, H, 2, W, 2)
    return out.reshape(N, Cout, Ho, Wo)


# ----------------------------------------------------------------------------
# Pure-JAX reference (for the self-check)
# ----------------------------------------------------------------------------
def _reference_forward(x_nchw, indices_nchw, output_shape, params, *, matmul_dtype):
    N, C, H, W = x_nchw.shape
    Ho, Wo = output_shape[2], output_shape[3]
    flat = jnp.zeros((N, C, Ho * Wo), x_nchw.dtype)
    flat = flat.at[
        jnp.arange(N)[:, None, None],
        jnp.arange(C)[None, :, None],
        indices_nchw.reshape(N, C, H * W),
    ].set(x_nchw.reshape(N, C, H * W))
    up = jnp.transpose(flat.reshape(N, C, Ho, Wo), (0, 2, 3, 1))   # NHWC

    def conv(x, w, b):
        y = jax.lax.conv_general_dilated(
            x.astype(matmul_dtype), w.astype(matmul_dtype),
            window_strides=(1, 1), padding="SAME",
            dimension_numbers=("NHWC", "HWIO", "NHWC"),
            preferred_element_type=jnp.float32)
        return jnp.maximum(y + b[None, None, None, :], 0.0)

    h1 = conv(up, params["w1"], params["b1"])
    h2 = conv(h1, params["w2"], params["b2"])
    return jnp.transpose(h2, (0, 3, 1, 2))


# ----------------------------------------------------------------------------
if __name__ == "__main__":
    N, in_ch, out_ch = 2, 4, 8
    H = W = 8                       # pooled resolution -> unpool to 16x16
    Ho, Wo = 2 * H, 2 * W
    output_shape = (N, in_ch, Ho, Wo)

    key = jax.random.PRNGKey(0)
    kw1, kb1, kw2, kb2, kx, ki = jax.random.split(key, 6)

    # Conv params in HWIO layout (PyTorch OIHW weights would be transposed to this).
    params = {
        "w1": jax.random.normal(kw1, (3, 3, in_ch, out_ch), jnp.float32)
              / jnp.sqrt(9.0 * in_ch),
        "b1": 0.01 * jax.random.normal(kb1, (out_ch,), jnp.float32),
        "w2": jax.random.normal(kw2, (3, 3, out_ch, out_ch), jnp.float32)
              / jnp.sqrt(9.0 * out_ch),
        "b2": 0.01 * jax.random.normal(kb2, (out_ch,), jnp.float32),
    }

    x = jax.random.normal(kx, (N, in_ch, H, W), jnp.float32)
    # Valid MaxPool2d(2,2) indices: one flat Ho*Wo position inside each 2x2 cell.
    offs = jax.random.randint(ki, (N, in_ch, H, W, 2), 0, 2)
    hh = 2 * jnp.arange(H)[None, None, :, None] + offs[..., 0]
    ww = 2 * jnp.arange(W)[None, None, None, :] + offs[..., 1]
    indices = (hh * Wo + ww).astype(jnp.int32)

    fwd = jax.jit(functools.partial(segnet_upx2_forward,
                                    output_shape=output_shape,
                                    tile_pooled_rows=4))
    out = jax.block_until_ready(fwd(x, indices, params=params))
    assert out.shape == (N, out_ch, Ho, Wo), out.shape

    # Tight check vs a reference with matching numerics (bf16 operands, f32 accum),
    # loose sanity check vs the full-f32 reference.
    ref_bf16 = _reference_forward(x, indices, output_shape, params,
                                  matmul_dtype=jnp.bfloat16)
    ref_f32 = _reference_forward(x, indices, output_shape, params,
                                 matmul_dtype=jnp.float32)
    err_bf16 = float(jnp.max(jnp.abs(out - ref_bf16)))
    err_f32 = float(jnp.max(jnp.abs(out - ref_f32)))
    assert jnp.allclose(out, ref_bf16, atol=2e-3, rtol=2e-3), err_bf16
    assert jnp.allclose(out, ref_f32, atol=1e-1, rtol=1e-1), err_f32

    print("KERNEL_OK")
</pallas_src>

<mosaic_0001>
module attributes {stable_mosaic.version = 11 : i64} {
  func.func @_fused_unpool_convx2_kernel(%arg0: i32, %arg1: i32, %arg2: memref<1x12x18x128xf32, #tpu.memory_space<vmem>>, %arg3: memref<1x12x18x128xi32, #tpu.memory_space<vmem>>, %arg4: memref<10x16x1xf32, #tpu.memory_space<vmem>>, %arg5: memref<3x3x128x128xbf16, #tpu.memory_space<vmem>>, %arg6: memref<1x128xf32, #tpu.memory_space<vmem>>, %arg7: memref<3x3x128x128xbf16, #tpu.memory_space<vmem>>, %arg8: memref<1x128xf32, #tpu.memory_space<vmem>>, %arg9: memref<1x2x2x4x8x128xf32, #tpu.memory_space<vmem>>) attributes {dimension_semantics = [#tpu.dimension_semantics<parallel>, #tpu.dimension_semantics<parallel>], iteration_bounds = array<i64: 2, 2>, scalar_prefetch = 0 : i64, scratch_operands = 0 : i64, tpu.core_type = #tpu.core_type<tc>, window_params = [{transform_indices = @transform_0, window_bounds = array<i64: 1, 12, 18, 128>}, {transform_indices = @transform_1, window_bounds = array<i64: 1, 12, 18, 128>}, {pipeline_mode = #tpu.pipeline_mode<synchronous>, transform_indices = @transform_2, window_bounds = array<i64: 10, 16, 1>}, {pipeline_mode = #tpu.pipeline_mode<synchronous>, transform_indices = @transform_3, window_bounds = array<i64: 3, 3, 128, 128>}, {pipeline_mode = #tpu.pipeline_mode<synchronous>, transform_indices = @transform_4, window_bounds = array<i64: 1, 128>}, {pipeline_mode = #tpu.pipeline_mode<synchronous>, transform_indices = @transform_5, window_bounds = array<i64: 3, 3, 128, 128>}, {pipeline_mode = #tpu.pipeline_mode<synchronous>, transform_indices = @transform_6, window_bounds = array<i64: 1, 128>}, {transform_indices = @transform_7, window_bounds = array<i64: 1, 2, 2, 4, 8, 128>}]} {
    %c4_i32 = arith.constant 4 : i32
    %0 = arith.muli %arg1, %c4_i32 : i32
    %1 = tpu.assume_multiple %0, 4 : i32
    %c0 = arith.constant 0 : index
    %2 = arith.index_cast %1 : i32 to index
    %c0_0 = arith.constant 0 : index
    %c0_1 = arith.constant 0 : index
    %3 = vector.load %arg2[%c0, %2, %c0_0, %c0_1] : memref<1x12x18x128xf32, #tpu.memory_space<vmem>>, vector<1x8x18x128xf32>
    %4 = vector.shape_cast %3 : vector<1x8x18x128xf32> to vector<8x18x128xf32>
    %c0_2 = arith.constant 0 : index
    %5 = arith.index_cast %1 : i32 to index
    %c0_3 = arith.constant 0 : index
    %c0_4 = arith.constant 0 : index
    %6 = vector.load %arg3[%c0_2, %5, %c0_3, %c0_4] : memref<1x12x18x128xi32, #tpu.memory_space<vmem>>, vector<1x8x18x128xi32>
    %7 = vector.shape_cast %6 : vector<1x8x18x128xi32> to vector<8x18x128xi32>
    %c0_i32 = arith.constant 0 : i32
    %8 = vector.broadcast %c0_i32 : i32 to vector<8x18x128xi32>
    %9 = arith.cmpi eq, %7, %8 : vector<8x18x128xi32>
    %cst = arith.constant 0.000000e+00 : f32
    %10 = vector.broadcast %cst : f32 to vector<8x18x128xf32>
    %11 = arith.select %9, %4, %10 : vector<8x18x128xi1>, vector<8x18x128xf32>
    %c1_i32 = arith.constant 1 : i32
    %12 = vector.broadcast %c1_i32 : i32 to vector<8x18x128xi32>
    %13 = arith.cmpi eq, %7, %12 : vector<8x18x128xi32>
    %cst_5 = arith.constant 0.000000e+00 : f32
    %14 = vector.broadcast %cst_5 : f32 to vector<8x18x128xf32>
    %15 = arith.select %13, %4, %14 : vector<8x18x128xi1>, vector<8x18x128xf32>
    %c16_i32 = arith.constant 16 : i32
    %16 = vector.broadcast %c16_i32 : i32 to vector<8x18x128xi32>
    %17 = arith.cmpi eq, %7, %16 : vector<8x18x128xi32>
    %cst_6 = arith.constant 0.000000e+00 : f32
    %18 = vector.broadcast %cst_6 : f32 to vector<8x18x128xf32>
    %19 = arith.select %17, %4, %18 : vector<8x18x128xi1>, vector<8x18x128xf32>
    %c17_i32 = arith.constant 17 : i32
    %20 = vector.broadcast %c17_i32 : i32 to vector<8x18x128xi32>
    %21 = arith.cmpi eq, %7, %20 : vector<8x18x128xi32>
    %cst_7 = arith.constant 0.000000e+00 : f32
    %22 = vector.broadcast %cst_7 : f32 to vector<8x18x128xf32>
    %23 = arith.select %21, %4, %22 : vector<8x18x128xi1>, vector<8x18x128xf32>
    %c0_8 = arith.constant 0 : index
    %c0_9 = arith.constant 0 : index
    %c0_10 = arith.constant 0 : index
    %c0_11 = arith.constant 0 : index
    %24 = vector.load %arg5[%c0_8, %c0_9, %c0_10, %c0_11] : memref<3x3x128x128xbf16, #tpu.memory_space<vmem>>, vector<3x3x128x128xbf16>
    %c0_12 = arith.constant 0 : index
    %c0_13 = arith.constant 0 : index
    %c0_14 = arith.constant 0 : index
    %c0_15 = arith.constant 0 : index
    %25 = vector.load %arg7[%c0_12, %c0_13, %c0_14, %c0_15] : memref<3x3x128x128xbf16, #tpu.memory_space<vmem>>, vector<3x3x128x128xbf16>
    %c0_16 = arith.constant 0 : index
    %c0_17 = arith.constant 0 : index
    %26 = vector.load %arg6[%c0_16, %c0_17] : memref<1x128xf32, #tpu.memory_space<vmem>>, vector<1x128xf32>
    %c0_18 = arith.constant 0 : index
    %c0_19 = arith.constant 0 : index
    %27 = vector.load %arg8[%c0_18, %c0_19] : memref<1x128xf32, #tpu.memory_space<vmem>>, vector<1x128xf32>
    %28 = arith.index_cast %1 : i32 to index
    %c0_20 = arith.constant 0 : index
    %c0_21 = arith.constant 0 : index
    %29 = vector.load %arg4[%28, %c0_20, %c0_21] : memref<10x16x1xf32, #tpu.memory_space<vmem>>, vector<6x16x1xf32>
    %cst_22 = arith.constant 0.000000e+00 : f32
    %30 = vector.broadcast %cst_22 : f32 to vector<96x128xf32>
    %31 = vector.extract_strided_slice %23 {offsets = [0, 0, 0], sizes = [6, 16, 128], strides = [1, 1, 1]} : vector<8x18x128xf32> to vector<6x16x128xf32>
    %32 = vector.shape_cast %31 : vector<6x16x128xf32> to vector<96x128xf32>
    %33 = arith.truncf %32 : vector<96x128xf32> to vector<96x128xbf16>
    %34 = vector.extract_strided_slice %24 {offsets = [0, 0, 0, 0], sizes = [1, 1, 128, 128], strides = [1, 1, 1, 1]} : vector<3x3x128x128xbf16> to vector<1x1x128x128xbf16>
    %35 = vector.shape_cast %34 : vector<1x1x128x128xbf16> to vector<128x128xbf16>
    %cst_23 = arith.constant dense<0.000000e+00> : vector<96x128xf32>
    %36 = tpu.matmul %33, %35, %cst_23 {dimension_numbers = #tpu.dot_dimension_numbers<[1], [0], [0], [1], [0, 0, 1, 1], [], []>} : vector<96x128xbf16>, vector<128x128xbf16>, vector<96x128xf32> -> vector<96x128xf32>
    %37 = arith.addf %30, %36 : vector<96x128xf32>
    %38 = vector.extract_strided_slice %19 {offsets = [0, 1, 0], sizes = [6, 16, 128], strides = [1, 1, 1]} : vector<8x18x128xf32> to vector<6x16x128xf32>
    %39 = vector.shape_cast %38 : vector<6x16x128xf32> to vector<96x128xf32>
    %40 = arith.truncf %39 : vector<96x128xf32> to vector<96x128xbf16>
    %41 = vector.extract_strided_slice %24 {offsets = [0, 1, 0, 0], sizes = [1, 1, 128, 128], strides = [1, 1, 1, 1]} : vector<3x3x128x128xbf16> to vector<1x1x128x128xbf16>
    %42 = vector.shape_cast %41 : vector<1x1x128x128xbf16> to vector<128x128xbf16>
    %cst_24 = arith.constant dense<0.000000e+00> : vector<96x128xf32>
    %43 = tpu.matmul %40, %42, %cst_24 {dimension_numbers = #tpu.dot_dimension_numbers<[1], [0], [0], [1], [0, 0, 1, 1], [], []>} : vector<96x128xbf16>, vector<128x128xbf16>, vector<96x128xf32> -> vector<96x128xf32>
    %44 = arith.addf %37, %43 : vector<96x128xf32>
    %45 = vector.extract_strided_slice %23 {offsets = [0, 1, 0], sizes = [6, 16, 128], strides = [1, 1, 1]} : vector<8x18x128xf32> to vector<6x16x128xf32>
    %46 = vector.shape_cast %45 : vector<6x16x128xf32> to vector<96x128xf32>
    %47 = arith.truncf %46 : vector<96x128xf32> to vector<96x128xbf16>
    %48 = vector.extract_strided_slice %24 {offsets = [0, 2, 0, 0], sizes = [1, 1, 128, 128], strides = [1, 1, 1, 1]} : vector<3x3x128x128xbf16> to vector<1x1x128x128xbf16>
    %49 = vector.shape_cast %48 : vector<1x1x128x128xbf16> to vector<128x128xbf16>
    %cst_25 = arith.constant dense<0.000000e+00> : vector<96x128xf32>
    %50 = tpu.matmul %47, %49, %cst_25 {dimension_numbers = #tpu.dot_dimension_numbers<[1], [0], [0], [1], [0, 0, 1, 1], [], []>} : vector<96x128xbf16>, vector<128x128xbf16>, vector<96x128xf32> -> vector<96x128xf32>
    %51 = arith.addf %44, %50 : vector<96x128xf32>
    %52 = vector.extract_strided_slice %15 {offsets = [1, 0, 0], sizes = [6, 16, 128], strides = [1, 1, 1]} : vector<8x18x128xf32> to vector<6x16x128xf32>
    %53 = vector.shape_cast %52 : vector<6x16x128xf32> to vector<96x128xf32>
    %54 = arith.truncf %53 : vector<96x128xf32> to vector<96x128xbf16>
    %55 = vector.extract_strided_slice %24 {offsets = [1, 0, 0, 0], sizes = [1, 1, 128, 128], strides = [1, 1, 1, 1]} : vector<3x3x128x128xbf16> to vector<1x1x128x128xbf16>
    %56 = vector.shape_cast %55 : vector<1x1x128x128xbf16> to vector<128x128xbf16>
    %cst_26 = arith.constant dense<0.000000e+00> : vector<96x128xf32>
    %57 = tpu.matmul %54, %56, %cst_26 {dimension_numbers = #tpu.dot_dimension_numbers<[1], [0], [0], [1], [0, 0, 1, 1], [], []>} : vector<96x128xbf16>, vector<128x128xbf16>, vector<96x128xf32> -> vector<96x128xf32>
    %58 = arith.addf %51, %57 : vector<96x128xf32>
    %59 = vector.extract_strided_slice %11 {offsets = [1, 1, 0], sizes = [6, 16, 128], strides = [1, 1, 1]} : vector<8x18x128xf32> to vector<6x16x128xf32>
    %60 = vector.shape_cast %59 : vector<6x16x128xf32> to vector<96x128xf32>
    %61 = arith.truncf %60 : vector<96x128xf32> to vector<96x128xbf16>
    %62 = vector.extract_strided_slice %24 {offsets = [1, 1, 0, 0], sizes = [1, 1, 128, 128], strides = [1, 1, 1, 1]} : vector<3x3x128x128xbf16> to vector<1x1x128x128xbf16>
    %63 = vector.shape_cast %62 : vector<1x1x128x128xbf16> to vector<128x128xbf16>
    %cst_27 = arith.constant dense<0.000000e+00> : vector<96x128xf32>
    %64 = tpu.matmul %61, %63, %cst_27 {dimension_numbers = #tpu.dot_dimension_numbers<[1], [0], [0], [1], [0, 0, 1, 1], [], []>} : vector<96x128xbf16>, vector<128x128xbf16>, vector<96x128xf32> -> vector<96x128xf32>
    %65 = arith.addf %58, %64 : vector<96x128xf32>
    %66 = vector.extract_strided_slice %15 {offsets = [1, 1, 0], sizes = [6, 16, 128], strides = [1, 1, 1]} : vector<8x18x128xf32> to vector<6x16x128xf32>
    %67 = vector.shape_cast %66 : vector<6x16x128xf32> to vector<96x128xf32>
    %68 = arith.truncf %67 : vector<96x128xf32> to vector<96x128xbf16>
    %69 = vector.extract_strided_slice %24 {offsets = [1, 2, 0, 0], sizes = [1, 1, 128, 128], strides = [1, 1, 1, 1]} : vector<3x3x128x128xbf16> to vector<1x1x128x128xbf16>
    %70 = vector.shape_cast %69 : vector<1x1x128x128xbf16> to vector<128x128xbf16>
    %cst_28 = arith.constant dense<0.000000e+00> : vector<96x128xf32>
    %71 = tpu.matmul %68, %70, %cst_28 {dimension_numbers = #tpu.dot_dimension_numbers<[1], [0], [0], [1], [0, 0, 1, 1], [], []>} : vector<96x128xbf16>, vector<128x128xbf16>, vector<96x128xf32> -> vector<96x128xf32>
    %72 = arith.addf %65, %71 : vector<96x128xf32>
    %73 = vector.extract_strided_slice %23 {offsets = [1, 0, 0], sizes = [6, 16, 128], strides = [1, 1, 1]} : vector<8x18x128xf32> to vector<6x16x128xf32>
    %74 = vector.shape_cast %73 : vector<6x16x128xf32> to vector<96x128xf32>
    %75 = arith.truncf %74 : vector<96x128xf32> to vector<96x128xbf16>
    %76 = vector.extract_strided_slice %24 {offsets = [2, 0, 0, 0], sizes = [1, 1, 128, 128], strides = [1, 1, 1, 1]} : vector<3x3x128x128xbf16> to vector<1x1x128x128xbf16>
    %77 = vector.shape_cast %76 : vector<1x1x128x128xbf16> to vector<128x128xbf16>
    %cst_29 = arith.constant dense<0.000000e+00> : vector<96x128xf32>
    %78 = tpu.matmul %75, %77, %cst_29 {dimension_numbers = #tpu.dot_dimension_numbers<[1], [0], [0], [1], [0, 0, 1, 1], [], []>} : vector<96x128xbf16>, vector<128x128xbf16>, vector<96x128xf32> -> vector<96x128xf32>
    %79 = arith.addf %72, %78 : vector<96x128xf32>
    %80 = vector.extract_strided_slice %19 {offsets = [1, 1, 0], sizes = [6, 16, 128], strides = [1, 1, 1]} : vector<8x18x128xf32> to vector<6x16x128xf32>
    %81 = vector.shape_cast %80 : vector<6x16x128xf32> to vector<96x128xf32>
    %82 = arith.truncf %81 : vector<96x128xf32> to vector<96x128xbf16>
    %83 = vector.extract_strided_slice %24 {offsets = [2, 1, 0, 0], sizes = [1, 1, 128, 128], strides = [1, 1, 1, 1]} : vector<3x3x128x128xbf16> to vector<1x1x128x128xbf16>
    %84 = vector.shape_cast %83 : vector<1x1x128x128xbf16> to vector<128x128xbf16>
    %cst_30 = arith.constant dense<0.000000e+00> : vector<96x128xf32>
    %85 = tpu.matmul %82, %84, %cst_30 {dimension_numbers = #tpu.dot_dimension_numbers<[1], [0], [0], [1], [0, 0, 1, 1], [], []>} : vector<96x128xbf16>, vector<128x128xbf16>, vector<96x128xf32> -> vector<96x128xf32>
    %86 = arith.addf %79, %85 : vector<96x128xf32>
    %87 = vector.extract_strided_slice %23 {offsets = [1, 1, 0], sizes = [6, 16, 128], strides = [1, 1, 1]} : vector<8x18x128xf32> to vector<6x16x128xf32>
    %88 = vector.shape_cast %87 : vector<6x16x128xf32> to vector<96x128xf32>
    %89 = arith.truncf %88 : vector<96x128xf32> to vector<96x128xbf16>
    %90 = vector.extract_strided_slice %24 {offsets = [2, 2, 0, 0], sizes = [1, 1, 128, 128], strides = [1, 1, 1, 1]} : vector<3x3x128x128xbf16> to vector<1x1x128x128xbf16>
    %91 = vector.shape_cast %90 : vector<1x1x128x128xbf16> to vector<128x128xbf16>
    %cst_31 = arith.constant dense<0.000000e+00> : vector<96x128xf32>
    %92 = tpu.matmul %89, %91, %cst_31 {dimension_numbers = #tpu.dot_dimension_numbers<[1], [0], [0], [1], [0, 0, 1, 1], [], []>} : vector<96x128xbf16>, vector<128x128xbf16>, vector<96x128xf32> -> vector<96x128xf32>
    %93 = arith.addf %86, %92 : vector<96x128xf32>
    %94 = vector.broadcast %26 : vector<1x128xf32> to vector<96x128xf32>
    %95 = arith.addf %93, %94 : vector<96x128xf32>
    %cst_32 = arith.constant 0.000000e+00 : f32
    %96 = vector.broadcast %cst_32 : f32 to vector<96x128xf32>
    %97 = arith.maximumf %95, %96 : vector<96x128xf32>
    %98 = vector.shape_cast %97 : vector<96x128xf32> to vector<6x16x128xf32>
    %99 = vector.broadcast %29 : vector<6x16x1xf32> to vector<6x16x128xf32>
    %100 = arith.mulf %98, %99 : vector<6x16x128xf32>
    %cst_33 = arith.constant 0.000000e+00 : f32
    %101 = vector.broadcast %cst_33 : f32 to vector<96x128xf32>
    %102 = vector.extract_strided_slice %24 {offsets = [0, 0, 0, 0], sizes = [1, 1, 128, 128], strides = [1, 1, 1, 1]} : vector<3x3x128x128xbf16> to vector<1x1x128x128xbf16>
    %103 = vector.shape_cast %102 : vector<1x1x128x128xbf16> to vector<128x128xbf16>
    %cst_34 = arith.constant dense<0.000000e+00> : vector<96x128xf32>
    %104 = tpu.matmul %40, %103, %cst_34 {dimension_numbers = #tpu.dot_dimension_numbers<[1], [0], [0], [1], [0, 0, 1, 1], [], []>} : vector<96x128xbf16>, vector<128x128xbf16>, vector<96x128xf32> -> vector<96x128xf32>
    %105 = arith.addf %101, %104 : vector<96x128xf32>
    %106 = vector.extract_strided_slice %24 {offsets = [0, 1, 0, 0], sizes = [1, 1, 128, 128], strides = [1, 1, 1, 1]} : vector<3x3x128x128xbf16> to vector<1x1x128x128xbf16>
    %107 = vector.shape_cast %106 : vector<1x1x128x128xbf16> to vector<128x128xbf16>
    %cst_35 = arith.constant dense<0.000000e+00> : vector<96x128xf32>
    %108 = tpu.matmul %47, %107, %cst_35 {dimension_numbers = #tpu.dot_dimension_numbers<[1], [0], [0], [1], [0, 0, 1, 1], [], []>} : vector<96x128xbf16>, vector<128x128xbf16>, vector<96x128xf32> -> vector<96x128xf32>
    %109 = arith.addf %105, %108 : vector<96x128xf32>
    %110 = vector.extract_strided_slice %19 {offsets = [0, 2, 0], sizes = [6, 16, 128], strides = [1, 1, 1]} : vector<8x18x128xf32> to vector<6x16x128xf32>
    %111 = vector.shape_cast %110 : vector<6x16x128xf32> to vector<96x128xf32>
    %112 = arith.truncf %111 : vector<96x128xf32> to vector<96x128xbf16>
    %113 = vector.extract_strided_slice %24 {offsets = [0, 2, 0, 0], sizes = [1, 1, 128, 128], strides = [1, 1, 1, 1]} : vector<3x3x128x128xbf16> to vector<1x1x128x128xbf16>
    %114 = vector.shape_cast %113 : vector<1x1x128x128xbf16> to vector<128x128xbf16>
    %cst_36 = arith.constant dense<0.000000e+00> : vector<96x128xf32>
    %115 = tpu.matmul %112, %114, %cst_36 {dimension_numbers = #tpu.dot_dimension_numbers<[1], [0], [0], [1], [0, 0, 1, 1], [], []>} : vector<96x128xbf16>, vector<128x128xbf16>, vector<96x128xf32> -> vector<96x128xf32>
    %116 = arith.addf %109, %115 : vector<96x128xf32>
    %117 = vector.extract_strided_slice %24 {offsets = [1, 0, 0, 0], sizes = [1, 1, 128, 128], strides = [1, 1, 1, 1]} : vector<3x3x128x128xbf16> to vector<1x1x128x128xbf16>
    %118 = vector.shape_cast %117 : vector<1x1x128x128xbf16> to vector<128x128xbf16>
    %cst_37 = arith.constant dense<0.000000e+00> : vector<96x128xf32>
    %119 = tpu.matmul %61, %118, %cst_37 {dimension_numbers = #tpu.dot_dimension_numbers<[1], [0], [0], [1], [0, 0, 1, 1], [], []>} : vector<96x128xbf16>, vector<128x128xbf16>, vector<96x128xf32> -> vector<96x128xf32>
    %120 = arith.addf %116, %119 : vector<96x128xf32>
    %121 = vector.extract_strided_slice %24 {offsets = [1, 1, 0, 0], sizes = [1, 1, 128, 128], strides = [1, 1, 1, 1]} : vector<3x3x128x128xbf16> to vector<1x1x128x128xbf16>
    %122 = vector.shape_cast %121 : vector<1x1x128x128xbf16> to vector<128x128xbf16>
    %cst_38 = arith.constant dense<0.000000e+00> : vector<96x128xf32>
    %123 = tpu.matmul %68, %122, %cst_38 {dimension_numbers = #tpu.dot_dimension_numbers<[1], [0], [0], [1], [0, 0, 1, 1], [], []>} : vector<96x128xbf16>, vector<128x128xbf16>, vector<96x128xf32> -> vector<96x128xf32>
    %124 = arith.addf %120, %123 : vector<96x128xf32>
    %125 = vector.extract_strided_slice %11 {offsets = [1, 2, 0], sizes = [6, 16, 128], strides = [1, 1, 1]} : vector<8x18x128xf32> to vector<6x16x128xf32>
    %126 = vector.shape_cast %125 : vector<6x16x128xf32> to vector<96x128xf32>
    %127 = arith.truncf %126 : vector<96x128xf32> to vector<96x128xbf16>
    %128 = vector.extract_strided_slice %24 {offsets = [1, 2, 0, 0], sizes = [1, 1, 128, 128], strides = [1, 1, 1, 1]} : vector<3x3x128x128xbf16> to vector<1x1x128x128xbf16>
    %129 = vector.shape_cast %128 : vector<1x1x128x128xbf16> to vector<128x128xbf16>
    %cst_39 = arith.constant dense<0.000000e+00> : vector<96x128xf32>
    %130 = tpu.matmul %127, %129, %cst_39 {dimension_numbers = #tpu.dot_dimension_numbers<[1], [0], [0], [1], [0, 0, 1, 1], [], []>} : vector<96x128xbf16>, vector<128x128xbf16>, vector<96x128xf32> -> vector<96x128xf32>
    %131 = arith.addf %124, %130 : vector<96x128xf32>
    %132 = vector.extract_strided_slice %24 {offsets = [2, 0, 0, 0], sizes = [1, 1, 128, 128], strides = [1, 1, 1, 1]} : vector<3x3x128x128xbf16> to vector<1x1x128x128xbf16>
    %133 = vector.shape_cast %132 : vector<1x1x128x128xbf16> to vector<128x128xbf16>
    %cst_40 = arith.constant dense<0.000000e+00> : vector<96x128xf32>
    %134 = tpu.matmul %82, %133, %cst_40 {dimension_numbers = #tpu.dot_dimension_numbers<[1], [0], [0], [1], [0, 0, 1, 1], [], []>} : vector<96x128xbf16>, vector<128x128xbf16>, vector<96x128xf32> -> vector<96x128xf32>
    %135 = arith.addf %131, %134 : vector<96x128xf32>
    %136 = vector.extract_strided_slice %24 {offsets = [2, 1, 0, 0], sizes = [1, 1, 128, 128], strides = [1, 1, 1, 1]} : vector<3x3x128x128xbf16> to vector<1x1x128x128xbf16>
    %137 = vector.shape_cast %136 : vector<1x1x128x128xbf16> to vector<128x128xbf16>
    %cst_41 = arith.constant dense<0.000000e+00> : vector<96x128xf32>
    %138 = tpu.matmul %89, %137, %cst_41 {dimension_numbers = #tpu.dot_dimension_numbers<[1], [0], [0], [1], [0, 0, 1, 1], [], []>} : vector<96x128xbf16>, vector<128x128xbf16>, vector<96x128xf32> -> vector<96x128xf32>
    %139 = arith.addf %135, %138 : vector<96x128xf32>
    %140 = vector.extract_strided_slice %19 {offsets = [1, 2, 0], sizes = [6, 16, 128], strides = [1, 1, 1]} : vector<8x18x128xf32> to vector<6x16x128xf32>
    %141 = vector.shape_cast %140 : vector<6x16x128xf32> to vector<96x128xf32>
    %142 = arith.truncf %141 : vector<96x128xf32> to vector<96x128xbf16>
    %143 = vector.extract_strided_slice %24 {offsets = [2, 2, 0, 0], sizes = [1, 1, 128, 128], strides = [1, 1, 1, 1]} : vector<3x3x128x128xbf16> to vector<1x1x128x128xbf16>
    %144 = vector.shape_cast %143 : vector<1x1x128x128xbf16> to vector<128x128xbf16>
    %cst_42 = arith.constant dense<0.000000e+00> : vector<96x128xf32>
    %145 = tpu.matmul %142, %144, %cst_42 {dimension_numbers = #tpu.dot_dimension_numbers<[1], [0], [0], [1], [0, 0, 1, 1], [], []>} : vector<96x128xbf16>, vector<128x128xbf16>, vector<96x128xf32> -> vector<96x128xf32>
    %146 = arith.addf %139, %145 : vector<96x128xf32>
    %147 = vector.broadcast %26 : vector<1x128xf32> to vector<96x128xf32>
    %148 = arith.addf %146, %147 : vector<96x128xf32>
    %cst_43 = arith.constant 0.000000e+00 : f32
    %149 = vector.broadcast %cst_43 : f32 to vector<96x128xf32>
    %150 = arith.maximumf %148, %149 : vector<96x128xf32>
    %151 = vector.shape_cast %150 : vector<96x128xf32> to vector<6x16x128xf32>
    %152 = vector.broadcast %29 : vector<6x16x1xf32> to vector<6x16x128xf32>
    %153 = arith.mulf %151, %152 : vector<6x16x128xf32>
    %cst_44 = arith.constant 0.000000e+00 : f32
    %154 = vector.broadcast %cst_44 : f32 to vector<96x128xf32>
    %155 = vector.extract_strided_slice %24 {offsets = [0, 0, 0, 0], sizes = [1, 1, 128, 128], strides = [1, 1, 1, 1]} : vector<3x3x128x128xbf16> to vector<1x1x128x128xbf16>
    %156 = vector.shape_cast %155 : vector<1x1x128x128xbf16> to vector<128x128xbf16>
    %cst_45 = arith.constant dense<0.000000e+00> : vector<96x128xf32>
    %157 = tpu.matmul %54, %156, %cst_45 {dimension_numbers = #tpu.dot_dimension_numbers<[1], [0], [0], [1], [0, 0, 1, 1], [], []>} : vector<96x128xbf16>, vector<128x128xbf16>, vector<96x128xf32> -> vector<96x128xf32>
    %158 = arith.addf %154, %157 : vector<96x128xf32>
    %159 = vector.extract_strided_slice %24 {offsets = [0, 1, 0, 0], sizes = [1, 1, 128, 128], strides = [1, 1, 1, 1]} : vector<3x3x128x128xbf16> to vector<1x1x128x128xbf16>
    %160 = vector.shape_cast %159 : vector<1x1x128x128xbf16> to vector<128x128xbf16>
    %cst_46 = arith.constant dense<0.000000e+00> : vector<96x128xf32>
    %161 = tpu.matmul %61, %160, %cst_46 {dimension_numbers = #tpu.dot_dimension_numbers<[1], [0], [0], [1], [0, 0, 1, 1], [], []>} : vector<96x128xbf16>, vector<128x128xbf16>, vector<96x128xf32> -> vector<96x128xf32>
    %162 = arith.addf %158, %161 : vector<96x128xf32>
    %163 = vector.extract_strided_slice %24 {offsets = [0, 2, 0, 0], sizes = [1, 1, 128, 128], strides = [1, 1, 1, 1]} : vector<3x3x128x128xbf16> to vector<1x1x128x128xbf16>
    %164 = vector.shape_cast %163 : vector<1x1x128x128xbf16> to vector<128x128xbf16>
    %cst_47 = arith.constant dense<0.000000e+00> : vector<96x128xf32>
    %165 = tpu.matmul %68, %164, %cst_47 {dimension_numbers = #tpu.dot_dimension_numbers<[1], [0], [0], [1], [0, 0, 1, 1], [], []>} : vector<96x128xbf16>, vector<128x128xbf16>, vector<96x128xf32> -> vector<96x128xf32>
    %166 = arith.addf %162, %165 : vector<96x128xf32>
    %167 = vector.extract_strided_slice %24 {offsets = [1, 0, 0, 0], sizes = [1, 1, 128, 128], strides = [1, 1, 1, 1]} : vector<3x3x128x128xbf16> to vector<1x1x128x128xbf16>
    %168 = vector.shape_cast %167 : vector<1x1x128x128xbf16> to vector<128x128xbf16>
    %cst_48 = arith.constant dense<0.000000e+00> : vector<96x128xf32>
    %169 = tpu.matmul %75, %168, %cst_48 {dimension_numbers = #tpu.dot_dimension_numbers<[1], [0], [0], [1], [0, 0, 1, 1], [], []>} : vector<96x128xbf16>, vector<128x128xbf16>, vector<96x128xf32> -> vector<96x128xf32>
    %170 = arith.addf %166, %169 : vector<96x128xf32>
    %171 = vector.extract_strided_slice %24 {offsets = [1, 1, 0, 0], sizes = [1, 1, 128, 128], strides = [1, 1, 1, 1]} : vector<3x3x128x128xbf16> to vector<1x1x128x128xbf16>
    %172 = vector.shape_cast %171 : vector<1x1x128x128xbf16> to vector<128x128xbf16>
    %cst_49 = arith.constant dense<0.000000e+00> : vector<96x128xf32>
    %173 = tpu.matmul %82, %172, %cst_49 {dimension_numbers = #tpu.dot_dimension_numbers<[1], [0], [0], [1], [0, 0, 1, 1], [], []>} : vector<96x128xbf16>, vector<128x128xbf16>, vector<96x128xf32> -> vector<96x128xf32>
    %174 = arith.addf %170, %173 : vector<96x128xf32>
    %175 = vector.extract_strided_slice %24 {offsets = [1, 2, 0, 0], sizes = [1, 1, 128, 128], strides = [1, 1, 1, 1]} : vector<3x3x128x128xbf16> to vector<1x1x128x128xbf16>
    %176 = vector.shape_cast %175 : vector<1x1x128x128xbf16> to vector<128x128xbf16>
    %cst_50 = arith.constant dense<0.000000e+00> : vector<96x128xf32>
    %177 = tpu.matmul %89, %176, %cst_50 {dimension_numbers = #tpu.dot_dimension_numbers<[1], [0], [0], [1], [0, 0, 1, 1], [], []>} : vector<96x128xbf16>, vector<128x128xbf16>, vector<96x128xf32> -> vector<96x128xf32>
    %178 = arith.addf %174, %177 : vector<96x128xf32>
    %179 = vector.extract_strided_slice %15 {offsets = [2, 0, 0], sizes = [6, 16, 128], strides = [1, 1, 1]} : vector<8x18x128xf32> to vector<6x16x128xf32>
    %180 = vector.shape_cast %179 : vector<6x16x128xf32> to vector<96x128xf32>
    %181 = arith.truncf %180 : vector<96x128xf32> to vector<96x128xbf16>
    %182 = vector.extract_strided_slice %24 {offsets = [2, 0, 0, 0], sizes = [1, 1, 128, 128], strides = [1, 1, 1, 1]} : vector<3x3x128x128xbf16> to vector<1x1x128x128xbf16>
    %183 = vector.shape_cast %182 : vector<1x1x128x128xbf16> to vector<128x128xbf16>
    %cst_51 = arith.constant dense<0.000000e+00> : vector<96x128xf32>
    %184 = tpu.matmul %181, %183, %cst_51 {dimension_numbers = #tpu.dot_dimension_numbers<[1], [0], [0], [1], [0, 0, 1, 1], [], []>} : vector<96x128xbf16>, vector<128x128xbf16>, vector<96x128xf32> -> vector<96x128xf32>
    %185 = arith.addf %178, %184 : vector<96x128xf32>
    %186 = vector.extract_strided_slice %11 {offsets = [2, 1, 0], sizes = [6, 16, 128], strides = [1, 1, 1]} : vector<8x18x128xf32> to vector<6x16x128xf32>
    %187 = vector.shape_cast %186 : vector<6x16x128xf32> to vector<96x128xf32>
    %188 = arith.truncf %187 : vector<96x128xf32> to vector<96x128xbf16>
    %189 = vector.extract_strided_slice %24 {offsets = [2, 1, 0, 0], sizes = [1, 1, 128, 128], strides = [1, 1, 1, 1]} : vector<3x3x128x128xbf16> to vector<1x1x128x128xbf16>
    %190 = vector.shape_cast %189 : vector<1x1x128x128xbf16> to vector<128x128xbf16>
    %cst_52 = arith.constant dense<0.000000e+00> : vector<96x128xf32>
    %191 = tpu.matmul %188, %190, %cst_52 {dimension_numbers = #tpu.dot_dimension_numbers<[1], [0], [0], [1], [0, 0, 1, 1], [], []>} : vector<96x128xbf16>, vector<128x128xbf16>, vector<96x128xf32> -> vector<96x128xf32>
    %192 = arith.addf %185, %191 : vector<96x128xf32>
    %193 = vector.extract_strided_slice %15 {offsets = [2, 1, 0], sizes = [6, 16, 128], strides = [1, 1, 1]} : vector<8x18x128xf32> to vector<6x16x128xf32>
    %194 = vector.shape_cast %193 : vector<6x16x128xf32> to vector<96x128xf32>
    %195 = arith.truncf %194 : vector<96x128xf32> to vector<96x128xbf16>
    %196 = vector.extract_strided_slice %24 {offsets = [2, 2, 0, 0], sizes = [1, 1, 128, 128], strides = [1, 1, 1, 1]} : vector<3x3x128x128xbf16> to vector<1x1x128x128xbf16>
    %197 = vector.shape_cast %196 : vector<1x1x128x128xbf16> to vector<128x128xbf16>
    %cst_53 = arith.constant dense<0.000000e+00> : vector<96x128xf32>
    %198 = tpu.matmul %195, %197, %cst_53 {dimension_numbers = #tpu.dot_dimension_numbers<[1], [0], [0], [1], [0, 0, 1, 1], [], []>} : vector<96x128xbf16>, vector<128x128xbf16>, vector<96x128xf32> -> vector<96x128xf32>
    %199 = arith.addf %192, %198 : vector<96x128xf32>
    %200 = vector.broadcast %26 : vector<1x128xf32> to vector<96x128xf32>
    %201 = arith.addf %199, %200 : vector<96x128xf32>
    %cst_54 = arith.constant 0.000000e+00 : f32
    %202 = vector.broadcast %cst_54 : f32 to vector<96x128xf32>
    %203 = arith.maximumf %201, %202 : vector<96x128xf32>
    %204 = vector.shape_cast %203 : vector<96x128xf32> to vector<6x16x128xf32>
    %205 = vector.broadcast %29 : vector<6x16x1xf32> to vector<6x16x128xf32>
    %206 = arith.mulf %204, %205 : vector<6x16x128xf32>
    %cst_55 = arith.constant 0.000000e+00 : f32
    %207 = vector.broadcast %cst_55 : f32 to vector<96x128xf32>
    %208 = vector.extract_strided_slice %24 {offsets = [0, 0, 0, 0], sizes = [1, 1, 128, 128], strides = [1, 1, 1, 1]} : vector<3x3x128x128xbf16> to vector<1x1x128x128xbf16>
    %209 = vector.shape_cast %208 : vector<1x1x128x128xbf16> to vector<128x128xbf16>
    %cst_56 = arith.constant dense<0.000000e+00> : vector<96x128xf32>
    %210 = tpu.matmul %61, %209, %cst_56 {dimension_numbers = #tpu.dot_dimension_numbers<[1], [0], [0], [1], [0, 0, 1, 1], [], []>} : vector<96x128xbf16>, vector<128x128xbf16>, vector<96x128xf32> -> vector<96x128xf32>
    %211 = arith.addf %207, %210 : vector<96x128xf32>
    %212 = vector.extract_strided_slice %24 {offsets = [0, 1, 0, 0], sizes = [1, 1, 128, 128], strides = [1, 1, 1, 1]} : vector<3x3x128x128xbf16> to vector<1x1x128x128xbf16>
    %213 = vector.shape_cast %212 : vector<1x1x128x128xbf16> to vector<128x128xbf16>
    %cst_57 = arith.constant dense<0.000000e+00> : vector<96x128xf32>
    %214 = tpu.matmul %68, %213, %cst_57 {dimension_numbers = #tpu.dot_dimension_numbers<[1], [0], [0], [1], [0, 0, 1, 1], [], []>} : vector<96x128xbf16>, vector<128x128xbf16>, vector<96x128xf32> -> vector<96x128xf32>
    %215 = arith.addf %211, %214 : vector<96x128xf32>
    %216 = vector.extract_strided_slice %24 {offsets = [0, 2, 0, 0], sizes = [1, 1, 128, 128], strides = [1, 1, 1, 1]} : vector<3x3x128x128xbf16> to vector<1x1x128x128xbf16>
    %217 = vector.shape_cast %216 : vector<1x1x128x128xbf16> to vector<128x128xbf16>
    %cst_58 = arith.constant dense<0.000000e+00> : vector<96x128xf32>
    %218 = tpu.matmul %127, %217, %cst_58 {dimension_numbers = #tpu.dot_dimension_numbers<[1], [0], [0], [1], [0, 0, 1, 1], [], []>} : vector<96x128xbf16>, vector<128x128xbf16>, vector<96x128xf32> -> vector<96x128xf32>
    %219 = arith.addf %215, %218 : vector<96x128xf32>
    %220 = vector.extract_strided_slice %24 {offsets = [1, 0, 0, 0], sizes = [1, 1, 128, 128], strides = [1, 1, 1, 1]} : vector<3x3x128x128xbf16> to vector<1x1x128x128xbf16>
    %221 = vector.shape_cast %220 : vector<1x1x128x128xbf16> to vector<128x128xbf16>
    %cst_59 = arith.constant dense<0.000000e+00> : vector<96x128xf32>
    %222 = tpu.matmul %82, %221, %cst_59 {dimension_numbers = #tpu.dot_dimension_numbers<[1], [0], [0], [1], [0, 0, 1, 1], [], []>} : vector<96x128xbf16>, vector<128x128xbf16>, vector<96x128xf32> -> vector<96x128xf32>
    %223 = arith.addf %219, %222 : vector<96x128xf32>
    %224 = vector.extract_strided_slice %24 {offsets = [1, 1, 0, 0], sizes = [1, 1, 128, 128], strides = [1, 1, 1, 1]} : vector<3x3x128x128xbf16> to vector<1x1x128x128xbf16>
    %225 = vector.shape_cast %224 : vector<1x1x128x128xbf16> to vector<128x128xbf16>
    %cst_60 = arith.constant dense<0.000000e+00> : vector<96x128xf32>
    %226 = tpu.matmul %89, %225, %cst_60 {dimension_numbers = #tpu.dot_dimension_numbers<[1], [0], [0], [1], [0, 0, 1, 1], [], []>} : vector<96x128xbf16>, vector<128x128xbf16>, vector<96x128xf32> -> vector<96x128xf32>
    %227 = arith.addf %223, %226 : vector<96x128xf32>
    %228 = vector.extract_strided_slice %24 {offsets = [1, 2, 0, 0], sizes = [1, 1, 128, 128], strides = [1, 1, 1, 1]} : vector<3x3x128x128xbf16> to vector<1x1x128x128xbf16>
    %229 = vector.shape_cast %228 : vector<1x1x128x128xbf16> to vector<128x128xbf16>
    %cst_61 = arith.constant dense<0.000000e+00> : vector<96x128xf32>
    %230 = tpu.matmul %142, %229, %cst_61 {dimension_numbers = #tpu.dot_dimension_numbers<[1], [0], [0], [1], [0, 0, 1, 1], [], []>} : vector<96x128xbf16>, vector<128x128xbf16>, vector<96x128xf32> -> vector<96x128xf32>
    %231 = arith.addf %227, %230 : vector<96x128xf32>
    %232 = vector.extract_strided_slice %24 {offsets = [2, 0, 0, 0], sizes = [1, 1, 128, 128], strides = [1, 1, 1, 1]} : vector<3x3x128x128xbf16> to vector<1x1x128x128xbf16>
    %233 = vector.shape_cast %232 : vector<1x1x128x128xbf16> to vector<128x128xbf16>
    %cst_62 = arith.constant dense<0.000000e+00> : vector<96x128xf32>
    %234 = tpu.matmul %188, %233, %cst_62 {dimension_numbers = #tpu.dot_dimension_numbers<[1], [0], [0], [1], [0, 0, 1, 1], [], []>} : vector<96x128xbf16>, vector<128x128xbf16>, vector<96x128xf32> -> vector<96x128xf32>
    %235 = arith.addf %231, %234 : vector<96x128xf32>
    %236 = vector.extract_strided_slice %24 {offsets = [2, 1, 0, 0], sizes = [1, 1, 128, 128], strides = [1, 1, 1, 1]} : vector<3x3x128x128xbf16> to vector<1x1x128x128xbf16>
    %237 = vector.shape_cast %236 : vector<1x1x128x128xbf16> to vector<128x128xbf16>
    %cst_63 = arith.constant dense<0.000000e+00> : vector<96x128xf32>
    %238 = tpu.matmul %195, %237, %cst_63 {dimension_numbers = #tpu.dot_dimension_numbers<[1], [0], [0], [1], [0, 0, 1, 1], [], []>} : vector<96x128xbf16>, vector<128x128xbf16>, vector<96x128xf32> -> vector<96x128xf32>
    %239 = arith.addf %235, %238 : vector<96x128xf32>
    %240 = vector.extract_strided_slice %11 {offsets = [2, 2, 0], sizes = [6, 16, 128], strides = [1, 1, 1]} : vector<8x18x128xf32> to vector<6x16x128xf32>
    %241 = vector.shape_cast %240 : vector<6x16x128xf32> to vector<96x128xf32>
    %242 = arith.truncf %241 : vector<96x128xf32> to vector<96x128xbf16>
    %243 = vector.extract_strided_slice %24 {offsets = [2, 2, 0, 0], sizes = [1, 1, 128, 128], strides = [1, 1, 1, 1]} : vector<3x3x128x128xbf16> to vector<1x1x128x128xbf16>
    %244 = vector.shape_cast %243 : vector<1x1x128x128xbf16> to vector<128x128xbf16>
    %cst_64 = arith.constant dense<0.000000e+00> : vector<96x128xf32>
    %245 = tpu.matmul %242, %244, %cst_64 {dimension_numbers = #tpu.dot_dimension_numbers<[1], [0], [0], [1], [0, 0, 1, 1], [], []>} : vector<96x128xbf16>, vector<128x128xbf16>, vector<96x128xf32> -> vector<96x128xf32>
    %246 = arith.addf %239, %245 : vector<96x128xf32>
    %247 = vector.broadcast %26 : vector<1x128xf32> to vector<96x128xf32>
    %248 = arith.addf %246, %247 : vector<96x128xf32>
    %cst_65 = arith.constant 0.000000e+00 : f32
    %249 = vector.broadcast %cst_65 : f32 to vector<96x128xf32>
    %250 = arith.maximumf %248, %249 : vector<96x128xf32>
    %251 = vector.shape_cast %250 : vector<96x128xf32> to vector<6x16x128xf32>
    %252 = vector.broadcast %29 : vector<6x16x1xf32> to vector<6x16x128xf32>
    %253 = arith.mulf %251, %252 : vector<6x16x128xf32>
    %cst_66 = arith.constant 0.000000e+00 : f32
    %254 = vector.broadcast %cst_66 : f32 to vector<32x128xf32>
    %255 = vector.extract_strided_slice %253 {offsets = [0, 0, 0], sizes = [4, 8, 128], strides = [1, 1, 1]} : vector<6x16x128xf32> to vector<4x8x128xf32>
    %256 = vector.shape_cast %255 : vector<4x8x128xf32> to vector<32x128xf32>
    %257 = arith.truncf %256 : vector<32x128xf32> to vector<32x128xbf16>
    %258 = vector.extract_strided_slice %25 {offsets = [0, 0, 0, 0], sizes = [1, 1, 128, 128], strides = [1, 1, 1, 1]} : vector<3x3x128x128xbf16> to vector<1x1x128x128xbf16>
    %259 = vector.shape_cast %258 : vector<1x1x128x128xbf16> to vector<128x128xbf16>
    %cst_67 = arith.constant dense<0.000000e+00> : vector<32x128xf32>
    %260 = tpu.matmul %257, %259, %cst_67 {dimension_numbers = #tpu.dot_dimension_numbers<[1], [0], [0], [1], [0, 0, 1, 1], [], []>} : vector<32x128xbf16>, vector<128x128xbf16>, vector<32x128xf32> -> vector<32x128xf32>
    %261 = arith.addf %254, %260 : vector<32x128xf32>
    %262 = vector.extract_strided_slice %206 {offsets = [0, 1, 0], sizes = [4, 8, 128], strides = [1, 1, 1]} : vector<6x16x128xf32> to vector<4x8x128xf32>
    %263 = vector.shape_cast %262 : vector<4x8x128xf32> to vector<32x128xf32>
    %264 = arith.truncf %263 : vector<32x128xf32> to vector<32x128xbf16>
    %265 = vector.extract_strided_slice %25 {offsets = [0, 1, 0, 0], sizes = [1, 1, 128, 128], strides = [1, 1, 1, 1]} : vector<3x3x128x128xbf16> to vector<1x1x128x128xbf16>
    %266 = vector.shape_cast %265 : vector<1x1x128x128xbf16> to vector<128x128xbf16>
    %cst_68 = arith.constant dense<0.000000e+00> : vector<32x128xf32>
    %267 = tpu.matmul %264, %266, %cst_68 {dimension_numbers = #tpu.dot_dimension_numbers<[1], [0], [0], [1], [0, 0, 1, 1], [], []>} : vector<32x128xbf16>, vector<128x128xbf16>, vector<32x128xf32> -> vector<32x128xf32>
    %268 = arith.addf %261, %267 : vector<32x128xf32>
    %269 = vector.extract_strided_slice %253 {offsets = [0, 1, 0], sizes = [4, 8, 128], strides = [1, 1, 1]} : vector<6x16x128xf32> to vector<4x8x128xf32>
    %270 = vector.shape_cast %269 : vector<4x8x128xf32> to vector<32x128xf32>
    %271 = arith.truncf %270 : vector<32x128xf32> to vector<32x128xbf16>
    %272 = vector.extract_strided_slice %25 {offsets = [0, 2, 0, 0], sizes = [1, 1, 128, 128], strides = [1, 1, 1, 1]} : vector<3x3x128x128xbf16> to vector<1x1x128x128xbf16>
    %273 = vector.shape_cast %272 : vector<1x1x128x128xbf16> to vector<128x128xbf16>
    %cst_69 = arith.constant dense<0.000000e+00> : vector<32x128xf32>
    %274 = tpu.matmul %271, %273, %cst_69 {dimension_numbers = #tpu.dot_dimension_numbers<[1], [0], [0], [1], [0, 0, 1, 1], [], []>} : vector<32x128xbf16>, vector<128x128xbf16>, vector<32x128xf32> -> vector<32x128xf32>
    %275 = arith.addf %268, %274 : vector<32x128xf32>
    %276 = vector.extract_strided_slice %153 {offsets = [1, 0, 0], sizes = [4, 8, 128], strides = [1, 1, 1]} : vector<6x16x128xf32> to vector<4x8x128xf32>
    %277 = vector.shape_cast %276 : vector<4x8x128xf32> to vector<32x128xf32>
    %278 = arith.truncf %277 : vector<32x128xf32> to vector<32x128xbf16>
    %279 = vector.extract_strided_slice %25 {offsets = [1, 0, 0, 0], sizes = [1, 1, 128, 128], strides = [1, 1, 1, 1]} : vector<3x3x128x128xbf16> to vector<1x1x128x128xbf16>
    %280 = vector.shape_cast %279 : vector<1x1x128x128xbf16> to vector<128x128xbf16>
    %cst_70 = arith.constant dense<0.000000e+00> : vector<32x128xf32>
    %281 = tpu.matmul %278, %280, %cst_70 {dimension_numbers = #tpu.dot_dimension_numbers<[1], [0], [0], [1], [0, 0, 1, 1], [], []>} : vector<32x128xbf16>, vector<128x128xbf16>, vector<32x128xf32> -> vector<32x128xf32>
    %282 = arith.addf %275, %281 : vector<32x128xf32>
    %283 = vector.extract_strided_slice %100 {offsets = [1, 1, 0], sizes = [4, 8, 128], strides = [1, 1, 1]} : vector<6x16x128xf32> to vector<4x8x128xf32>
    %284 = vector.shape_cast %283 : vector<4x8x128xf32> to vector<32x128xf32>
    %285 = arith.truncf %284 : vector<32x128xf32> to vector<32x128xbf16>
    %286 = vector.extract_strided_slice %25 {offsets = [1, 1, 0, 0], sizes = [1, 1, 128, 128], strides = [1, 1, 1, 1]} : vector<3x3x128x128xbf16> to vector<1x1x128x128xbf16>
    %287 = vector.shape_cast %286 : vector<1x1x128x128xbf16> to vector<128x128xbf16>
    %cst_71 = arith.constant dense<0.000000e+00> : vector<32x128xf32>
    %288 = tpu.matmul %285, %287, %cst_71 {dimension_numbers = #tpu.dot_dimension_numbers<[1], [0], [0], [1], [0, 0, 1, 1], [], []>} : vector<32x128xbf16>, vector<128x128xbf16>, vector<32x128xf32> -> vector<32x128xf32>
    %289 = arith.addf %282, %288 : vector<32x128xf32>
    %290 = vector.extract_strided_slice %153 {offsets = [1, 1, 0], sizes = [4, 8, 128], strides = [1, 1, 1]} : vector<6x16x128xf32> to vector<4x8x128xf32>
    %291 = vector.shape_cast %290 : vector<4x8x128xf32> to vector<32x128xf32>
    %292 = arith.truncf %291 : vector<32x128xf32> to vector<32x128xbf16>
    %293 = vector.extract_strided_slice %25 {offsets = [1, 2, 0, 0], sizes = [1, 1, 128, 128], strides = [1, 1, 1, 1]} : vector<3x3x128x128xbf16> to vector<1x1x128x128xbf16>
    %294 = vector.shape_cast %293 : vector<1x1x128x128xbf16> to vector<128x128xbf16>
    %cst_72 = arith.constant dense<0.000000e+00> : vector<32x128xf32>
    %295 = tpu.matmul %292, %294, %cst_72 {dimension_numbers = #tpu.dot_dimension_numbers<[1], [0], [0], [1], [0, 0, 1, 1], [], []>} : vector<32x128xbf16>, vector<128x128xbf16>, vector<32x128xf32> -> vector<32x128xf32>
    %296 = arith.addf %289, %295 : vector<32x128xf32>
    %297 = vector.extract_strided_slice %253 {offsets = [1, 0, 0], sizes = [4, 8, 128], strides = [1, 1, 1]} : vector<6x16x128xf32> to vector<4x8x128xf32>
    %298 = vector.shape_cast %297 : vector<4x8x128xf32> to vector<32x128xf32>
    %299 = arith.truncf %298 : vector<32x128xf32> to vector<32x128xbf16>
    %300 = vector.extract_strided_slice %25 {offsets = [2, 0, 0, 0], sizes = [1, 1, 128, 128], strides = [1, 1, 1, 1]} : vector<3x3x128x128xbf16> to vector<1x1x128x128xbf16>
    %301 = vector.shape_cast %300 : vector<1x1x128x128xbf16> to vector<128x128xbf16>
    %cst_73 = arith.constant dense<0.000000e+00> : vector<32x128xf32>
    %302 = tpu.matmul %299, %301, %cst_73 {dimension_numbers = #tpu.dot_dimension_numbers<[1], [0], [0], [1], [0, 0, 1, 1], [], []>} : vector<32x128xbf16>, vector<128x128xbf16>, vector<32x128xf32> -> vector<32x128xf32>
    %303 = arith.addf %296, %302 : vector<32x128xf32>
    %304 = vector.extract_strided_slice %206 {offsets = [1, 1, 0], sizes = [4, 8, 128], strides = [1, 1, 1]} : vector<6x16x128xf32> to vector<4x8x128xf32>
    %305 = vector.shape_cast %304 : vector<4x8x128xf32> to vector<32x128xf32>
    %306 = arith.truncf %305 : vector<32x128xf32> to vector<32x128xbf16>
    %307 = vector.extract_strided_slice %25 {offsets = [2, 1, 0, 0], sizes = [1, 1, 128, 128], strides = [1, 1, 1, 1]} : vector<3x3x128x128xbf16> to vector<1x1x128x128xbf16>
    %308 = vector.shape_cast %307 : vector<1x1x128x128xbf16> to vector<128x128xbf16>
    %cst_74 = arith.constant dense<0.000000e+00> : vector<32x128xf32>
    %309 = tpu.matmul %306, %308, %cst_74 {dimension_numbers = #tpu.dot_dimension_numbers<[1], [0], [0], [1], [0, 0, 1, 1], [], []>} : vector<32x128xbf16>, vector<128x128xbf16>, vector<32x128xf32> -> vector<32x128xf32>
    %310 = arith.addf %303, %309 : vector<32x128xf32>
    %311 = vector.extract_strided_slice %253 {offsets = [1, 1, 0], sizes = [4, 8, 128], strides = [1, 1, 1]} : vector<6x16x128xf32> to vector<4x8x128xf32>
    %312 = vector.shape_cast %311 : vector<4x8x128xf32> to vector<32x128xf32>
    %313 = arith.truncf %312 : vector<32x128xf32> to vector<32x128xbf16>
    %314 = vector.extract_strided_slice %25 {offsets = [2, 2, 0, 0], sizes = [1, 1, 128, 128], strides = [1, 1, 1, 1]} : vector<3x3x128x128xbf16> to vector<1x1x128x128xbf16>
    %315 = vector.shape_cast %314 : vector<1x1x128x128xbf16> to vector<128x128xbf16>
    %cst_75 = arith.constant dense<0.000000e+00> : vector<32x128xf32>
    %316 = tpu.matmul %313, %315, %cst_75 {dimension_numbers = #tpu.dot_dimension_numbers<[1], [0], [0], [1], [0, 0, 1, 1], [], []>} : vector<32x128xbf16>, vector<128x128xbf16>, vector<32x128xf32> -> vector<32x128xf32>
    %317 = arith.addf %310, %316 : vector<32x128xf32>
    %318 = vector.broadcast %27 : vector<1x128xf32> to vector<32x128xf32>
    %319 = arith.addf %317, %318 : vector<32x128xf32>
    %cst_76 = arith.constant 0.000000e+00 : f32
    %320 = vector.broadcast %cst_76 : f32 to vector<32x128xf32>
    %321 = arith.maximumf %319, %320 : vector<32x128xf32>
    %322 = vector.shape_cast %321 : vector<32x128xf32> to vector<4x8x128xf32>
    %c0_77 = arith.constant 0 : index
    %c0_78 = arith.constant 0 : index
    %c0_79 = arith.constant 0 : index
    %c0_80 = arith.constant 0 : index
    %c0_81 = arith.constant 0 : index
    %c0_82 = arith.constant 0 : index
    %323 = vector.load %arg9[%c0_77, %c0_78, %c0_79, %c0_80, %c0_81, %c0_82] : memref<1x2x2x4x8x128xf32, #tpu.memory_space<vmem>>, vector<1x1x1x4x8x128xf32>
    %324 = vector.shape_cast %323 : vector<1x1x1x4x8x128xf32> to vector<4x8x128xf32>
    %325 = vector.shape_cast %322 : vector<4x8x128xf32> to vector<1x1x1x4x8x128xf32>
    tpu.vector_store %arg9[%c0_77, %c0_78, %c0_79, %c0_80, %c0_81, %c0_82], %325 {strides = array<i32>} : memref<1x2x2x4x8x128xf32, #tpu.memory_space<vmem>>, vector<1x1x1x4x8x128xf32>,
    %cst_83 = arith.constant 0.000000e+00 : f32
    %326 = vector.broadcast %cst_83 : f32 to vector<32x128xf32>
    %327 = vector.extract_strided_slice %25 {offsets = [0, 0, 0, 0], sizes = [1, 1, 128, 128], strides = [1, 1, 1, 1]} : vector<3x3x128x128xbf16> to vector<1x1x128x128xbf16>
    %328 = vector.shape_cast %327 : vector<1x1x128x128xbf16> to vector<128x128xbf16>
    %cst_84 = arith.constant dense<0.000000e+00> : vector<32x128xf32>
    %329 = tpu.matmul %264, %328, %cst_84 {dimension_numbers = #tpu.dot_dimension_numbers<[1], [0], [0], [1], [0, 0, 1, 1], [], []>} : vector<32x128xbf16>, vector<128x128xbf16>, vector<32x128xf32> -> vector<32x128xf32>
    %330 = arith.addf %326, %329 : vector<32x128xf32>
    %331 = vector.extract_strided_slice %25 {offsets = [0, 1, 0, 0], sizes = [1, 1, 128, 128], strides = [1, 1, 1, 1]} : vector<3x3x128x128xbf16> to vector<1x1x128x128xbf16>
    %332 = vector.shape_cast %331 : vector<1x1x128x128xbf16> to vector<128x128xbf16>
    %cst_85 = arith.constant dense<0.000000e+00> : vector<32x128xf32>
    %333 = tpu.matmul %271, %332, %cst_85 {dimension_numbers = #tpu.dot_dimension_numbers<[1], [0], [0], [1], [0, 0, 1, 1], [], []>} : vector<32x128xbf16>, vector<128x128xbf16>, vector<32x128xf32> -> vector<32x128xf32>
    %334 = arith.addf %330, %333 : vector<32x128xf32>
    %335 = vector.extract_strided_slice %206 {offsets = [0, 2, 0], sizes = [4, 8, 128], strides = [1, 1, 1]} : vector<6x16x128xf32> to vector<4x8x128xf32>
    %336 = vector.shape_cast %335 : vector<4x8x128xf32> to vector<32x128xf32>
    %337 = arith.truncf %336 : vector<32x128xf32> to vector<32x128xbf16>
    %338 = vector.extract_strided_slice %25 {offsets = [0, 2, 0, 0], sizes = [1, 1, 128, 128], strides = [1, 1, 1, 1]} : vector<3x3x128x128xbf16> to vector<1x1x128x128xbf16>
    %339 = vector.shape_cast %338 : vector<1x1x128x128xbf16> to vector<128x128xbf16>
    %cst_86 = arith.constant dense<0.000000e+00> : vector<32x128xf32>
    %340 = tpu.matmul %337, %339, %cst_86 {dimension_numbers = #tpu.dot_dimension_numbers<[1], [0], [0], [1], [0, 0, 1, 1], [], []>} : vector<32x128xbf16>, vector<128x128xbf16>, vector<32x128xf32> -> vector<32x128xf32>
    %341 = arith.addf %334, %340 : vector<32x128xf32>
    %342 = vector.extract_strided_slice %25 {offsets = [1, 0, 0, 0], sizes = [1, 1, 128, 128], strides = [1, 1, 1, 1]} : vector<3x3x128x128xbf16> to vector<1x1x128x128xbf16>
    %343 = vector.shape_cast %342 : vector<1x1x128x128xbf16> to vector<128x128xbf16>
    %cst_87 = arith.constant dense<0.000000e+00> : vector<32x128xf32>
    %344 = tpu.matmul %285, %343, %cst_87 {dimension_numbers = #tpu.dot_dimension_numbers<[1], [0], [0], [1], [0, 0, 1, 1], [], []>} : vector<32x128xbf16>, vector<128x128xbf16>, vector<32x128xf32> -> vector<32x128xf32>
    %345 = arith.addf %341, %344 : vector<32x128xf32>
    %346 = vector.extract_strided_slice %25 {offsets = [1, 1, 0, 0], sizes = [1, 1, 128, 128], strides = [1, 1, 1, 1]} : vector<3x3x128x128xbf16> to vector<1x1x128x128xbf16>
    %347 = vector.shape_cast %346 : vector<1x1x128x128xbf16> to vector<128x128xbf16>
    %cst_88 = arith.constant dense<0.000000e+00> : vector<32x128xf32>
    %348 = tpu.matmul %292, %347, %cst_88 {dimension_numbers = #tpu.dot_dimension_numbers<[1], [0], [0], [1], [0, 0, 1, 1], [], []>} : vector<32x128xbf16>, vector<128x128xbf16>, vector<32x128xf32> -> vector<32x128xf32>
    %349 = arith.addf %345, %348 : vector<32x128xf32>
    %350 = vector.extract_strided_slice %100 {offsets = [1, 2, 0], sizes = [4, 8, 128], strides = [1, 1, 1]} : vector<6x16x128xf32> to vector<4x8x128xf32>
    %351 = vector.shape_cast %350 : vector<4x8x128xf32> to vector<32x128xf32>
    %352 = arith.truncf %351 : vector<32x128xf32> to vector<32x128xbf16>
    %353 = vector.extract_strided_slice %25 {offsets = [1, 2, 0, 0], sizes = [1, 1, 128, 128], strides = [1, 1, 1, 1]} : vector<3x3x128x128xbf16> to vector<1x1x128x128xbf16>
    %354 = vector.shape_cast %353 : vector<1x1x128x128xbf16> to vector<128x128xbf16>
    %cst_89 = arith.constant dense<0.000000e+00> : vector<32x128xf32>
    %355 = tpu.matmul %352, %354, %cst_89 {dimension_numbers = #tpu.dot_dimension_numbers<[1], [0], [0], [1], [0, 0, 1, 1], [], []>} : vector<32x128xbf16>, vector<128x128xbf16>, vector<32x128xf32> -> vector<32x128xf32>
    %356 = arith.addf %349, %355 : vector<32x128xf32>
    %357 = vector.extract_strided_slice %25 {offsets = [2, 0, 0, 0], sizes = [1, 1, 128, 128], strides = [1, 1, 1, 1]} : vector<3x3x128x128xbf16> to vector<1x1x128x128xbf16>
    %358 = vector.shape_cast %357 : vector<1x1x128x128xbf16> to vector<128x128xbf16>
    %cst_90 = arith.constant dense<0.000000e+00> : vector<32x128xf32>
    %359 = tpu.matmul %306, %358, %cst_90 {dimension_numbers = #tpu.dot_dimension_numbers<[1], [0], [0], [1], [0, 0, 1, 1], [], []>} : vector<32x128xbf16>, vector<128x128xbf16>, vector<32x128xf32> -> vector<32x128xf32>
    %360 = arith.addf %356, %359 : vector<32x128xf32>
    %361 = vector.extract_strided_slice %25 {offsets = [2, 1, 0, 0], sizes = [1, 1, 128, 128], strides = [1, 1, 1, 1]} : vector<3x3x128x128xbf16> to vector<1x1x128x128xbf16>
    %362 = vector.shape_cast %361 : vector<1x1x128x128xbf16> to vector<128x128xbf16>
    %cst_91 = arith.constant dense<0.000000e+00> : vector<32x128xf32>
    %363 = tpu.matmul %313, %362, %cst_91 {dimension_numbers = #tpu.dot_dimension_numbers<[1], [0], [0], [1], [0, 0, 1, 1], [], []>} : vector<32x128xbf16>, vector<128x128xbf16>, vector<32x128xf32> -> vector<32x128xf32>
    %364 = arith.addf %360, %363 : vector<32x128xf32>
    %365 = vector.extract_strided_slice %206 {offsets = [1, 2, 0], sizes = [4, 8, 128], strides = [1, 1, 1]} : vector<6x16x128xf32> to vector<4x8x128xf32>
    %366 = vector.shape_cast %365 : vector<4x8x128xf32> to vector<32x128xf32>
    %367 = arith.truncf %366 : vector<32x128xf32> to vector<32x128xbf16>
    %368 = vector.extract_strided_slice %25 {offsets = [2, 2, 0, 0], sizes = [1, 1, 128, 128], strides = [1, 1, 1, 1]} : vector<3x3x128x128xbf16> to vector<1x1x128x128xbf16>
    %369 = vector.shape_cast %368 : vector<1x1x128x128xbf16> to vector<128x128xbf16>
    %cst_92 = arith.constant dense<0.000000e+00> : vector<32x128xf32>
    %370 = tpu.matmul %367, %369, %cst_92 {dimension_numbers = #tpu.dot_dimension_numbers<[1], [0], [0], [1], [0, 0, 1, 1], [], []>} : vector<32x128xbf16>, vector<128x128xbf16>, vector<32x128xf32> -> vector<32x128xf32>
    %371 = arith.addf %364, %370 : vector<32x128xf32>
    %372 = vector.broadcast %27 : vector<1x128xf32> to vector<32x128xf32>
    %373 = arith.addf %371, %372 : vector<32x128xf32>
    %cst_93 = arith.constant 0.000000e+00 : f32
    %374 = vector.broadcast %cst_93 : f32 to vector<32x128xf32>
    %375 = arith.maximumf %373, %374 : vector<32x128xf32>
    %376 = vector.shape_cast %375 : vector<32x128xf32> to vector<4x8x128xf32>
    %c0_94 = arith.constant 0 : index
    %c0_95 = arith.constant 0 : index
    %c1 = arith.constant 1 : index
    %c0_96 = arith.constant 0 : index
    %c0_97 = arith.constant 0 : index
    %c0_98 = arith.constant 0 : index
    %377 = vector.load %arg9[%c0_94, %c0_95, %c1, %c0_96, %c0_97, %c0_98] : memref<1x2x2x4x8x128xf32, #tpu.memory_space<vmem>>, vector<1x1x1x4x8x128xf32>
    %378 = vector.shape_cast %377 : vector<1x1x1x4x8x128xf32> to vector<4x8x128xf32>
    %379 = vector.shape_cast %376 : vector<4x8x128xf32> to vector<1x1x1x4x8x128xf32>
    tpu.vector_store %arg9[%c0_94, %c0_95, %c1, %c0_96, %c0_97, %c0_98], %379 {strides = array<i32>} : memref<1x2x2x4x8x128xf32, #tpu.memory_space<vmem>>, vector<1x1x1x4x8x128xf32>,
    %cst_99 = arith.constant 0.000000e+00 : f32
    %380 = vector.broadcast %cst_99 : f32 to vector<32x128xf32>
    %381 = vector.extract_strided_slice %25 {offsets = [0, 0, 0, 0], sizes = [1, 1, 128, 128], strides = [1, 1, 1, 1]} : vector<3x3x128x128xbf16> to vector<1x1x128x128xbf16>
    %382 = vector.shape_cast %381 : vector<1x1x128x128xbf16> to vector<128x128xbf16>
    %cst_100 = arith.constant dense<0.000000e+00> : vector<32x128xf32>
    %383 = tpu.matmul %278, %382, %cst_100 {dimension_numbers = #tpu.dot_dimension_numbers<[1], [0], [0], [1], [0, 0, 1, 1], [], []>} : vector<32x128xbf16>, vector<128x128xbf16>, vector<32x128xf32> -> vector<32x128xf32>
    %384 = arith.addf %380, %383 : vector<32x128xf32>
    %385 = vector.extract_strided_slice %25 {offsets = [0, 1, 0, 0], sizes = [1, 1, 128, 128], strides = [1, 1, 1, 1]} : vector<3x3x128x128xbf16> to vector<1x1x128x128xbf16>
    %386 = vector.shape_cast %385 : vector<1x1x128x128xbf16> to vector<128x128xbf16>
    %cst_101 = arith.constant dense<0.000000e+00> : vector<32x128xf32>
    %387 = tpu.matmul %285, %386, %cst_101 {dimension_numbers = #tpu.dot_dimension_numbers<[1], [0], [0], [1], [0, 0, 1, 1], [], []>} : vector<32x128xbf16>, vector<128x128xbf16>, vector<32x128xf32> -> vector<32x128xf32>
    %388 = arith.addf %384, %387 : vector<32x128xf32>
    %389 = vector.extract_strided_slice %25 {offsets = [0, 2, 0, 0], sizes = [1, 1, 128, 128], strides = [1, 1, 1, 1]} : vector<3x3x128x128xbf16> to vector<1x1x128x128xbf16>
    %390 = vector.shape_cast %389 : vector<1x1x128x128xbf16> to vector<128x128xbf16>
    %cst_102 = arith.constant dense<0.000000e+00> : vector<32x128xf32>
    %391 = tpu.matmul %292, %390, %cst_102 {dimension_numbers = #tpu.dot_dimension_numbers<[1], [0], [0], [1], [0, 0, 1, 1], [], []>} : vector<32x128xbf16>, vector<128x128xbf16>, vector<32x128xf32> -> vector<32x128xf32>
    %392 = arith.addf %388, %391 : vector<32x128xf32>
    %393 = vector.extract_strided_slice %25 {offsets = [1, 0, 0, 0], sizes = [1, 1, 128, 128], strides = [1, 1, 1, 1]} : vector<3x3x128x128xbf16> to vector<1x1x128x128xbf16>
    %394 = vector.shape_cast %393 : vector<1x1x128x128xbf16> to vector<128x128xbf16>
    %cst_103 = arith.constant dense<0.000000e+00> : vector<32x128xf32>
    %395 = tpu.matmul %299, %394, %cst_103 {dimension_numbers = #tpu.dot_dimension_numbers<[1], [0], [0], [1], [0, 0, 1, 1], [], []>} : vector<32x128xbf16>, vector<128x128xbf16>, vector<32x128xf32> -> vector<32x128xf32>
    %396 = arith.addf %392, %395 : vector<32x128xf32>
    %397 = vector.extract_strided_slice %25 {offsets = [1, 1, 0, 0], sizes = [1, 1, 128, 128], strides = [1, 1, 1, 1]} : vector<3x3x128x128xbf16> to vector<1x1x128x128xbf16>
    %398 = vector.shape_cast %397 : vector<1x1x128x128xbf16> to vector<128x128xbf16>
    %cst_104 = arith.constant dense<0.000000e+00> : vector<32x128xf32>
    %399 = tpu.matmul %306, %398, %cst_104 {dimension_numbers = #tpu.dot_dimension_numbers<[1], [0], [0], [1], [0, 0, 1, 1], [], []>} : vector<32x128xbf16>, vector<128x128xbf16>, vector<32x128xf32> -> vector<32x128xf32>
    %400 = arith.addf %396, %399 : vector<32x128xf32>
    %401 = vector.extract_strided_slice %25 {offsets = [1, 2, 0, 0], sizes = [1, 1, 128, 128], strides = [1, 1, 1, 1]} : vector<3x3x128x128xbf16> to vector<1x1x128x128xbf16>
    %402 = vector.shape_cast %401 : vector<1x1x128x128xbf16> to vector<128x128xbf16>
    %cst_105 = arith.constant dense<0.000000e+00> : vector<32x128xf32>
    %403 = tpu.matmul %313, %402, %cst_105 {dimension_numbers = #tpu.dot_dimension_numbers<[1], [0], [0], [1], [0, 0, 1, 1], [], []>} : vector<32x128xbf16>, vector<128x128xbf16>, vector<32x128xf32> -> vector<32x128xf32>
    %404 = arith.addf %400, %403 : vector<32x128xf32>
    %405 = vector.extract_strided_slice %153 {offsets = [2, 0, 0], sizes = [4, 8, 128], strides = [1, 1, 1]} : vector<6x16x128xf32> to vector<4x8x128xf32>
    %406 = vector.shape_cast %405 : vector<4x8x128xf32> to vector<32x128xf32>
    %407 = arith.truncf %406 : vector<32x128xf32> to vector<32x128xbf16>
    %408 = vector.extract_strided_slice %25 {offsets = [2, 0, 0, 0], sizes = [1, 1, 128, 128], strides = [1, 1, 1, 1]} : vector<3x3x128x128xbf16> to vector<1x1x128x128xbf16>
    %409 = vector.shape_cast %408 : vector<1x1x128x128xbf16> to vector<128x128xbf16>
    %cst_106 = arith.constant dense<0.000000e+00> : vector<32x128xf32>
    %410 = tpu.matmul %407, %409, %cst_106 {dimension_numbers = #tpu.dot_dimension_numbers<[1], [0], [0], [1], [0, 0, 1, 1], [], []>} : vector<32x128xbf16>, vector<128x128xbf16>, vector<32x128xf32> -> vector<32x128xf32>
    %411 = arith.addf %404, %410 : vector<32x128xf32>
    %412 = vector.extract_strided_slice %100 {offsets = [2, 1, 0], sizes = [4, 8, 128], strides = [1, 1, 1]} : vector<6x16x128xf32> to vector<4x8x128xf32>
    %413 = vector.shape_cast %412 : vector<4x8x128xf32> to vector<32x128xf32>
    %414 = arith.truncf %413 : vector<32x128xf32> to vector<32x128xbf16>
    %415 = vector.extract_strided_slice %25 {offsets = [2, 1, 0, 0], sizes = [1, 1, 128, 128], strides = [1, 1, 1, 1]} : vector<3x3x128x128xbf16> to vector<1x1x128x128xbf16>
    %416 = vector.shape_cast %415 : vector<1x1x128x128xbf16> to vector<128x128xbf16>
    %cst_107 = arith.constant dense<0.000000e+00> : vector<32x128xf32>
    %417 = tpu.matmul %414, %416, %cst_107 {dimension_numbers = #tpu.dot_dimension_numbers<[1], [0], [0], [1], [0, 0, 1, 1], [], []>} : vector<32x128xbf16>, vector<128x128xbf16>, vector<32x128xf32> -> vector<32x128xf32>
    %418 = arith.addf %411, %417 : vector<32x128xf32>
    %419 = vector.extract_strided_slice %153 {offsets = [2, 1, 0], sizes = [4, 8, 128], strides = [1, 1, 1]} : vector<6x16x128xf32> to vector<4x8x128xf32>
    %420 = vector.shape_cast %419 : vector<4x8x128xf32> to vector<32x128xf32>
    %421 = arith.truncf %420 : vector<32x128xf32> to vector<32x128xbf16>
    %422 = vector.extract_strided_slice %25 {offsets = [2, 2, 0, 0], sizes = [1, 1, 128, 128], strides = [1, 1, 1, 1]} : vector<3x3x128x128xbf16> to vector<1x1x128x128xbf16>
    %423 = vector.shape_cast %422 : vector<1x1x128x128xbf16> to vector<128x128xbf16>
    %cst_108 = arith.constant dense<0.000000e+00> : vector<32x128xf32>
    %424 = tpu.matmul %421, %423, %cst_108 {dimension_numbers = #tpu.dot_dimension_numbers<[1], [0], [0], [1], [0, 0, 1, 1], [], []>} : vector<32x128xbf16>, vector<128x128xbf16>, vector<32x128xf32> -> vector<32x128xf32>
    %425 = arith.addf %418, %424 : vector<32x128xf32>
    %426 = vector.broadcast %27 : vector<1x128xf32> to vector<32x128xf32>
    %427 = arith.addf %425, %426 : vector<32x128xf32>
    %cst_109 = arith.constant 0.000000e+00 : f32
    %428 = vector.broadcast %cst_109 : f32 to vector<32x128xf32>
    %429 = arith.maximumf %427, %428 : vector<32x128xf32>
    %430 = vector.shape_cast %429 : vector<32x128xf32> to vector<4x8x128xf32>
    %c0_110 = arith.constant 0 : index
    %c1_111 = arith.constant 1 : index
    %c0_112 = arith.constant 0 : index
    %c0_113 = arith.constant 0 : index
    %c0_114 = arith.constant 0 : index
    %c0_115 = arith.constant 0 : index
    %431 = vector.load %arg9[%c0_110, %c1_111, %c0_112, %c0_113, %c0_114, %c0_115] : memref<1x2x2x4x8x128xf32, #tpu.memory_space<vmem>>, vector<1x1x1x4x8x128xf32>
    %432 = vector.shape_cast %431 : vector<1x1x1x4x8x128xf32> to vector<4x8x128xf32>
    %433 = vector.shape_cast %430 : vector<4x8x128xf32> to vector<1x1x1x4x8x128xf32>
    tpu.vector_store %arg9[%c0_110, %c1_111, %c0_112, %c0_113, %c0_114, %c0_115], %433 {strides = array<i32>} : memref<1x2x2x4x8x128xf32, #tpu.memory_space<vmem>>, vector<1x1x1x4x8x128xf32>,
    %cst_116 = arith.constant 0.000000e+00 : f32
    %434 = vector.broadcast %cst_116 : f32 to vector<32x128xf32>
    %435 = vector.extract_strided_slice %25 {offsets = [0, 0, 0, 0], sizes = [1, 1, 128, 128], strides = [1, 1, 1, 1]} : vector<3x3x128x128xbf16> to vector<1x1x128x128xbf16>
    %436 = vector.shape_cast %435 : vector<1x1x128x128xbf16> to vector<128x128xbf16>
    %cst_117 = arith.constant dense<0.000000e+00> : vector<32x128xf32>
    %437 = tpu.matmul %285, %436, %cst_117 {dimension_numbers = #tpu.dot_dimension_numbers<[1], [0], [0], [1], [0, 0, 1, 1], [], []>} : vector<32x128xbf16>, vector<128x128xbf16>, vector<32x128xf32> -> vector<32x128xf32>
    %438 = arith.addf %434, %437 : vector<32x128xf32>
    %439 = vector.extract_strided_slice %25 {offsets = [0, 1, 0, 0], sizes = [1, 1, 128, 128], strides = [1, 1, 1, 1]} : vector<3x3x128x128xbf16> to vector<1x1x128x128xbf16>
    %440 = vector.shape_cast %439 : vector<1x1x128x128xbf16> to vector<128x128xbf16>
    %cst_118 = arith.constant dense<0.000000e+00> : vector<32x128xf32>
    %441 = tpu.matmul %292, %440, %cst_118 {dimension_numbers = #tpu.dot_dimension_numbers<[1], [0], [0], [1], [0, 0, 1, 1], [], []>} : vector<32x128xbf16>, vector<128x128xbf16>, vector<32x128xf32> -> vector<32x128xf32>
    %442 = arith.addf %438, %441 : vector<32x128xf32>
    %443 = vector.extract_strided_slice %25 {offsets = [0, 2, 0, 0], sizes = [1, 1, 128, 128], strides = [1, 1, 1, 1]} : vector<3x3x128x128xbf16> to vector<1x1x128x128xbf16>
    %444 = vector.shape_cast %443 : vector<1x1x128x128xbf16> to vector<128x128xbf16>
    %cst_119 = arith.constant dense<0.000000e+00> : vector<32x128xf32>
    %445 = tpu.matmul %352, %444, %cst_119 {dimension_numbers = #tpu.dot_dimension_numbers<[1], [0], [0], [1], [0, 0, 1, 1], [], []>} : vector<32x128xbf16>, vector<128x128xbf16>, vector<32x128xf32> -> vector<32x128xf32>
    %446 = arith.addf %442, %445 : vector<32x128xf32>
    %447 = vector.extract_strided_slice %25 {offsets = [1, 0, 0, 0], sizes = [1, 1, 128, 128], strides = [1, 1, 1, 1]} : vector<3x3x128x128xbf16> to vector<1x1x128x128xbf16>
    %448 = vector.shape_cast %447 : vector<1x1x128x128xbf16> to vector<128x128xbf16>
    %cst_120 = arith.constant dense<0.000000e+00> : vector<32x128xf32>
    %449 = tpu.matmul %306, %448, %cst_120 {dimension_numbers = #tpu.dot_dimension_numbers<[1], [0], [0], [1], [0, 0, 1, 1], [], []>} : vector<32x128xbf16>, vector<128x128xbf16>, vector<32x128xf32> -> vector<32x128xf32>
    %450 = arith.addf %446, %449 : vector<32x128xf32>
    %451 = vector.extract_strided_slice %25 {offsets = [1, 1, 0, 0], sizes = [1, 1, 128, 128], strides = [1, 1, 1, 1]} : vector<3x3x128x128xbf16> to vector<1x1x128x128xbf16>
    %452 = vector.shape_cast %451 : vector<1x1x128x128xbf16> to vector<128x128xbf16>
    %cst_121 = arith.constant dense<0.000000e+00> : vector<32x128xf32>
    %453 = tpu.matmul %313, %452, %cst_121 {dimension_numbers = #tpu.dot_dimension_numbers<[1], [0], [0], [1], [0, 0, 1, 1], [], []>} : vector<32x128xbf16>, vector<128x128xbf16>, vector<32x128xf32> -> vector<32x128xf32>
    %454 = arith.addf %450, %453 : vector<32x128xf32>
    %455 = vector.extract_strided_slice %25 {offsets = [1, 2, 0, 0], sizes = [1, 1, 128, 128], strides = [1, 1, 1, 1]} : vector<3x3x128x128xbf16> to vector<1x1x128x128xbf16>
    %456 = vector.shape_cast %455 : vector<1x1x128x128xbf16> to vector<128x128xbf16>
    %cst_122 = arith.constant dense<0.000000e+00> : vector<32x128xf32>
    %457 = tpu.matmul %367, %456, %cst_122 {dimension_numbers = #tpu.dot_dimension_numbers<[1], [0], [0], [1], [0, 0, 1, 1], [], []>} : vector<32x128xbf16>, vector<128x128xbf16>, vector<32x128xf32> -> vector<32x128xf32>
    %458 = arith.addf %454, %457 : vector<32x128xf32>
    %459 = vector.extract_strided_slice %25 {offsets = [2, 0, 0, 0], sizes = [1, 1, 128, 128], strides = [1, 1, 1, 1]} : vector<3x3x128x128xbf16> to vector<1x1x128x128xbf16>
    %460 = vector.shape_cast %459 : vector<1x1x128x128xbf16> to vector<128x128xbf16>
    %cst_123 = arith.constant dense<0.000000e+00> : vector<32x128xf32>
    %461 = tpu.matmul %414, %460, %cst_123 {dimension_numbers = #tpu.dot_dimension_numbers<[1], [0], [0], [1], [0, 0, 1, 1], [], []>} : vector<32x128xbf16>, vector<128x128xbf16>, vector<32x128xf32> -> vector<32x128xf32>
    %462 = arith.addf %458, %461 : vector<32x128xf32>
    %463 = vector.extract_strided_slice %25 {offsets = [2, 1, 0, 0], sizes = [1, 1, 128, 128], strides = [1, 1, 1, 1]} : vector<3x3x128x128xbf16> to vector<1x1x128x128xbf16>
    %464 = vector.shape_cast %463 : vector<1x1x128x128xbf16> to vector<128x128xbf16>
    %cst_124 = arith.constant dense<0.000000e+00> : vector<32x128xf32>
    %465 = tpu.matmul %421, %464, %cst_124 {dimension_numbers = #tpu.dot_dimension_numbers<[1], [0], [0], [1], [0, 0, 1, 1], [], []>} : vector<32x128xbf16>, vector<128x128xbf16>, vector<32x128xf32> -> vector<32x128xf32>
    %466 = arith.addf %462, %465 : vector<32x128xf32>
    %467 = vector.extract_strided_slice %100 {offsets = [2, 2, 0], sizes = [4, 8, 128], strides = [1, 1, 1]} : vector<6x16x128xf32> to vector<4x8x128xf32>
    %468 = vector.shape_cast %467 : vector<4x8x128xf32> to vector<32x128xf32>
    %469 = arith.truncf %468 : vector<32x128xf32> to vector<32x128xbf16>
    %470 = vector.extract_strided_slice %25 {offsets = [2, 2, 0, 0], sizes = [1, 1, 128, 128], strides = [1, 1, 1, 1]} : vector<3x3x128x128xbf16> to vector<1x1x128x128xbf16>
    %471 = vector.shape_cast %470 : vector<1x1x128x128xbf16> to vector<128x128xbf16>
    %cst_125 = arith.constant dense<0.000000e+00> : vector<32x128xf32>
    %472 = tpu.matmul %469, %471, %cst_125 {dimension_numbers = #tpu.dot_dimension_numbers<[1], [0], [0], [1], [0, 0, 1, 1], [], []>} : vector<32x128xbf16>, vector<128x128xbf16>, vector<32x128xf32> -> vector<32x128xf32>
    %473 = arith.addf %466, %472 : vector<32x128xf32>
    %474 = vector.broadcast %27 : vector<1x128xf32> to vector<32x128xf32>
    %475 = arith.addf %473, %474 : vector<32x128xf32>
    %cst_126 = arith.constant 0.000000e+00 : f32
    %476 = vector.broadcast %cst_126 : f32 to vector<32x128xf32>
    %477 = arith.maximumf %475, %476 : vector<32x128xf32>
    %478 = vector.shape_cast %477 : vector<32x128xf32> to vector<4x8x128xf32>
    %c0_127 = arith.constant 0 : index
    %c1_128 = arith.constant 1 : index
    %c1_129 = arith.constant 1 : index
    %c0_130 = arith.constant 0 : index
    %c0_131 = arith.constant 0 : index
    %c0_132 = arith.constant 0 : index
    %479 = vector.load %arg9[%c0_127, %c1_128, %c1_129, %c0_130, %c0_131, %c0_132] : memref<1x2x2x4x8x128xf32, #tpu.memory_space<vmem>>, vector<1x1x1x4x8x128xf32>
    %480 = vector.shape_cast %479 : vector<1x1x1x4x8x128xf32> to vector<4x8x128xf32>
    %481 = vector.shape_cast %478 : vector<4x8x128xf32> to vector<1x1x1x4x8x128xf32>
    tpu.vector_store %arg9[%c0_127, %c1_128, %c1_129, %c0_130, %c0_131, %c0_132], %481 {strides = array<i32>} : memref<1x2x2x4x8x128xf32, #tpu.memory_space<vmem>>, vector<1x1x1x4x8x128xf32>,
    return
  }
  func.func @transform_0(%arg0: i32, %arg1: i32) -> (i32, i32, i32, i32) {
    %c0_i32 = arith.constant 0 : i32
    %c0_i32_0 = arith.constant 0 : i32
    %c0_i32_1 = arith.constant 0 : i32
    %c0_i32_2 = arith.constant 0 : i32
    return %arg0, %c0_i32, %c0_i32_0, %c0_i32_1 : i32, i32, i32, i32
  }
  func.func @transform_1(%arg0: i32, %arg1: i32) -> (i32, i32, i32, i32) {
    %c0_i32 = arith.constant 0 : i32
    %c0_i32_0 = arith.constant 0 : i32
    %c0_i32_1 = arith.constant 0 : i32
    %c0_i32_2 = arith.constant 0 : i32
    return %arg0, %c0_i32, %c0_i32_0, %c0_i32_1 : i32, i32, i32, i32
  }
  func.func @transform_2(%arg0: i32, %arg1: i32) -> (i32, i32, i32) {
    %c0_i32 = arith.constant 0 : i32
    %c0_i32_0 = arith.constant 0 : i32
    %c0_i32_1 = arith.constant 0 : i32
    %c0_i32_2 = arith.constant 0 : i32
    return %c0_i32, %c0_i32_0, %c0_i32_1 : i32, i32, i32
  }
  func.func @transform_3(%arg0: i32, %arg1: i32) -> (i32, i32, i32, i32) {
    %c0_i32 = arith.constant 0 : i32
    %c0_i32_0 = arith.constant 0 : i32
    %c0_i32_1 = arith.constant 0 : i32
    %c0_i32_2 = arith.constant 0 : i32
    %c0_i32_3 = arith.constant 0 : i32
    return %c0_i32, %c0_i32_0, %c0_i32_1, %c0_i32_2 : i32, i32, i32, i32
  }
  func.func @transform_4(%arg0: i32, %arg1: i32) -> (i32, i32) {
    %c0_i32 = arith.constant 0 : i32
    %c0_i32_0 = arith.constant 0 : i32
    %c0_i32_1 = arith.constant 0 : i32
    return %c0_i32, %c0_i32_0 : i32, i32
  }
  func.func @transform_5(%arg0: i32, %arg1: i32) -> (i32, i32, i32, i32) {
    %c0_i32 = arith.constant 0 : i32
    %c0_i32_0 = arith.constant 0 : i32
    %c0_i32_1 = arith.constant 0 : i32
    %c0_i32_2 = arith.constant 0 : i32
    %c0_i32_3 = arith.constant 0 : i32
    return %c0_i32, %c0_i32_0, %c0_i32_1, %c0_i32_2 : i32, i32, i32, i32
  }
  func.func @transform_6(%arg0: i32, %arg1: i32) -> (i32, i32) {
    %c0_i32 = arith.constant 0 : i32
    %c0_i32_0 = arith.constant 0 : i32
    %c0_i32_1 = arith.constant 0 : i32
    return %c0_i32, %c0_i32_0 : i32, i32
  }
  func.func @transform_7(%arg0: i32, %arg1: i32) -> (i32, i32, i32, i32, i32, i32) {
    %c0_i32 = arith.constant 0 : i32
    %c0_i32_0 = arith.constant 0 : i32
    %c0_i32_1 = arith.constant 0 : i32
    %c0_i32_2 = arith.constant 0 : i32
    %c0_i32_3 = arith.constant 0 : i32
    return %arg0, %c0_i32, %c0_i32_0, %arg1, %c0_i32_1, %c0_i32_2 : i32, i32, i32, i32, i32, i32
  }
}

</mosaic_0001>

<bundles_post_ra>
// kernel: segnet_upx2_forward.1
= control target key start
LH: loop header
LB: loop body
LE: loop exit
PB: predicated region body
PF: predicated region fallthrough
CT: control target
= control target key end

     0   :  { %s11400_s24 = smov 0   ;;  %s11402_s25 = smov 0   ;;  %s14555_s0 = inlined_call_operand.vmem [shape: f32[2,12,18,128], index: 0, kind: input, shape index: {}]   ;;  %s14556_s1 = inlined_call_operand.vmem [shape: s32[2,12,18,128], index: 1, kind: input, shape index: {}]   ;;  %s14557_s2 = inlined_call_operand.vmem [shape: f32[10,16,1], index: 2, kind: input, shape index: {}]   ;;  %s14558_s3 = inlined_call_operand.vmem [shape: bf16[3,3,128,128], index: 3, kind: input, shape index: {}]   ;;  %s14559_s4 = inlined_call_operand.vmem [shape: f32[1,128], index: 4, kind: input, shape index: {}]   ;;  %s14560_s5 = inlined_call_operand.vmem [shape: bf16[3,3,128,128], index: 5, kind: input, shape index: {}]   ;;  %s14561_s6 = inlined_call_operand.vmem [shape: f32[1,128], index: 6, kind: input, shape index: {}]   ;;  %s14562_s7 = inlined_call_operand.vmem [shape: f32[2,2,2,8,8,128], index: 7, kind: output, shape index: {}]  }
   0x1   :  { %s11404_s26 = smov 0   ;;  %s11406_s27 = smov 0  }
   0x2   :  { %s11408_s28 = smov 0   ;;  %s11410_s29 = smov 0  }
   0x3   :  { %s11412_s30 = smov 0  }
   0x4 LB: > { %s26_s8 = sadd.s32 1, %s11349_s28  ;;  %s29_s9 = sadd.s32 1, %s11353_s29  ;;  %s11357_s30 = sphi %s11412_s30, %s17_s30   ;;  %s11353_s29 = sphi %s11410_s29, %s14961_s29   ;;  %s11349_s28 = sphi %s11408_s28, %s14960_s28   ;;  %s11345_s27 = sphi %s11406_s27, %s14959_s27   ;;  %s11341_s26 = sphi %s11404_s26, %s14958_s26   ;;  %s11337_s25 = sphi %s11402_s25, %s14957_s25   ;;  %s11333_s24 = sphi %s11400_s24, %s14956_s24  }
   0x5   : > { %p27_p0 = scmp.ge.s32.totalorder %s26_s8, 2  ;;  %s7755_s10 = sadd.s32 4294967295, %s11357_s30  }
   0x6   : > { %p205_p1 = scmp.ne.s32.totalorder %s11337_s25, %s11333_s24  ;;  %p206_p2 = scmp.eq.s32.totalorder %s7755_s10, 3 }
   0x7   : > { %s14963_s8 = smov (%p27_p0, %s26_s8), 0  ;;  %s14965_s9 = smov (!%p27_p0, %s29_s9), %s11353_s29 }
   0x8   : > { %14693 = sst [smem:[#allocation3_spill]] %s14963_s8  ;;  %s191_s11 = ssub.s32 %s11349_s28, %s14963_s8 }
   0x9   : > { %p31_p3 = scmp.ge.s32.totalorder %s14965_s9, 2  ;;  %p7759_p4 = scmp.ge.s32.totalorder %s11357_s30, 1 }
   0xa   : > { %p11446_p5 = por %p206_p2, %p205_p1  ;;  %p261_p6 = scmp.lt.s32.totalorder %s11357_s30, 5 }
   0xb   : > { %s14967_s9 = smov (%p31_p3, %s14965_s9), 0  ;;  %s195_s15 = sadd.s32 1, %s11337_s25 }
   0xc   : > { %14695 = sst [smem:[#allocation4_spill]] %s14967_s9  ;;  %p262_p7 = pnand %p7759_p4, %p261_p6 }
   0xd   : > { %s190_s13 = ssub.s32 %s11353_s29, %s14967_s9 }
   0xe   : > { %s192_s14 = sor.u32 %s191_s11, %s190_s13  ;;  %265 = sbr.rel (%p262_p7) target bundleno = 1608 (0x648), region = 48 }
   0xf   : > { %p193_p8 = scmp.eq.s32.totalorder %s192_s14, 0 }
  0x11   : > { %s11457_s16 = scalar_select %p193_p8, %s11337_s25, %s195_s15  }
  0x15   : > { %v11075_v0 = vld [vmem:[%s14558_s3 + $0x40] sm:$0xff]   ;;  %p297_p9 = scmp.lt.s32.totalorder %s11345_s27, 1  ;;  %v11076_v1 = vld [vmem:[%s14558_s3 + $0x48] sm:$0xff]   ;;  %s7764_s22 = smul.u32 96, %s11341_s26  ;;  %v11077_v2 = vld [vmem:[%s14558_s3 + $0x50] sm:$0xff]   ;;  %vm14602_vm0 = vcmask 1046528  }
  0x16   : > { %8903 = vmatprep.subr.bf16.mxu0 %v11075_v0  ;;  %9155 = vmatprep.subr.bf16.mxu1 %v11075_v0  ;;  %v11078_v3 = vld [vmem:[%s14558_s3 + $0x58] sm:$0xff]   ;;  %v11079_v10 = vld [vmem:[%s14558_s3 + $0x60] sm:$0xff]   ;;  %v11080_v30 = vld [vmem:[%s14558_s3 + $0x68] sm:$0xff]   ;;  %s8038_s17 = sshll.u32 %s11341_s26, 6  ;;  %s8034_s23 = sshll.u32 (%p11446_p5), %s11345_s27, 5 }
  0x17   : > { %s298_s21 = scalar_select %p297_p9, %s11345_s27, 1  ;;  %8904 = vmatpush3.bf16.msra.mxu0 %v11075_v0  ;;  %9156 = vmatpush3.bf16.msra.mxu1 %v11075_v0  ;;  %v11081_v39 = vld [vmem:[%s14558_s3 + $0x70] sm:$0xff]   ;;  %v11082_v61 = vld [vmem:[%s14558_s3 + $0x78] sm:$0xff]  }
  0x18   : > { %8905 = vmatprep.subr.bf16.mxu0 %v11076_v1  ;;  %9157 = vmatprep.subr.bf16.mxu1 %v11076_v1 }
  0x19   : > { %s11015_s11 = smul.u32 288, %s298_s21 }
  0x1b   : > { %s301_s15 = scalar_lea.vmem %s14555_s0, %s11015_s11  ;;  %s306_s19 = scalar_lea.vmem %s14556_s1, %s11015_s11  ;;  %8906 = vmatpush3.bf16.msra.mxu0 %v11076_v1  ;;  %9158 = vmatpush3.bf16.msra.mxu1 %v11076_v1 }
  0x1c   : > { %s11480_s8 = scalar_lea.vmem %s301_s15, %s7764_s22  ;;  %s11482_s21 = scalar_lea.vmem %s306_s19, %s7764_s22  ;;  %8907 = vmatprep.subr.bf16.mxu0 %v11077_v2  ;;  %9159 = vmatprep.subr.bf16.mxu1 %v11077_v2 }
  0x1d   : > { %v11485_v4 = vld [vmem:[%s11480_s8] sm:$0xff]  ;;  %v11488_v5 = vld [vmem:[%s11480_s8 + $0x8] sm:$0xff]  ;;  %v314_v6 = vld [vmem:[%s11480_s8 + $0x10] sm:$0x3]  ;;  %s12552_s22 = scalar_lea.vmem %s14557_s2, %s8038_s17  ;;  %s294_s19 = sand.u32 1, %s11333_s24  }
  0x1e   : > { %v11492_v7 = vld [vmem:[%s11482_s21] sm:$0xff]  ;;  %v11495_v8 = vld [vmem:[%s11482_s21 + $0x8] sm:$0xff]  ;;  %v339_v9 = vld [vmem:[%s11482_s21 + $0x10] sm:$0x3]  ;;  %s7760_s9 = sshll.u32 %s294_s19, 7 }
  0x1f   : > { %vm445_vm1 = vcmp.eq.s32.totalorder %v11492_v7, 16  ;;  %vm446_vm2 = vcmp.eq.s32.totalorder %v11495_v8, 16  ;;  %vm447_vm3 = vcmp.eq.s32.totalorder %v339_v9, 16  ;;  %vm487_vm4 = vcmp.eq.s32.totalorder %v11492_v7, 17  ;;  %8908 = vmatpush3.bf16.msra.mxu0 %v11077_v2  ;;  %9160 = vmatpush3.bf16.msra.mxu1 %v11077_v2  ;;  %v11518_v18 = vld [vmem:[%s11480_s8 + $0x18] sm:$0xff]  ;;  %v11521_v19 = vld [vmem:[%s11480_s8 + $0x20] sm:$0xff] }
  0x20   : > { %v11505_v11 = vsel %vm445_vm1, %v11485_v4, 0.0  ;;  %v11508_v12 = vsel %vm446_vm2, %v11488_v5, 0.0  ;;  %v11510_v13 = vsel %vm447_vm3, %v314_v6, 0.0  ;;  %vm488_vm5 = vcmp.eq.s32.totalorder %v11495_v8, 17  ;;  %8909 = vmatprep.subr.bf16.mxu0 %v11078_v3  ;;  %9161 = vmatprep.subr.bf16.mxu1 %v11078_v3  ;;  %v11524_v20 = vld [vmem:[%s11482_s21 + $0x18] sm:$0xff]  ;;  %v11534_v24 = vld [vmem:[%s11482_s21 + $0x20] sm:$0xff] }
  0x21   : > { %v858_v14 = vrot.slane %v11505_v11, 1  ;;  %v859_v15 = vrot.slane %v11508_v12, 1  ;;  %v861_v16 = vrot.slane %v11510_v13, 1  ;;  %vm489_vm6 = vcmp.eq.s32.totalorder %v339_v9, 17  ;;  %v11531_v23 = vld [vmem:[%s11480_s8 + $0x28] sm:$0x3] }
  0x22   : > { %v508_v22 = vsel %vm487_vm4, %v11485_v4, 0.0  ;;  %v11537_v25 = vld [vmem:[%s11482_s21 + $0x28] sm:$0x3]  ;;  %v509_v28 = vsel %vm488_vm5, %v11488_v5, 0.0  ;;  %v510_v29 = vsel %vm489_vm6, %v314_v6, 0.0  ;;  %vm448_vm7 = vcmp.eq.s32.totalorder %v11524_v20, 16 }
  0x23   : > { %v860_v26 = vsel %vm14602_vm0, %v858_v14, %v859_v15  ;;  %v862_v27 = vsel %vm14602_vm0, %v859_v15, %v861_v16  ;;  %8910 = vmatpush3.bf16.msra.mxu0 %v11078_v3  ;;  %9162 = vmatpush3.bf16.msra.mxu1 %v11078_v3  ;;  %v1178_v32 = vrot.slane %v508_v22, 1  ;;  %v1179_v33 = vrot.slane %v509_v28, 1  ;;  %v11584_v50 = vld [vmem:[%s11480_s8 + $0x30] sm:$0xff]  ;;  %v11589_v54 = vld [vmem:[%s11480_s8 + $0x38] sm:$0xff]  ;;  %v11592_v55 = vld [vmem:[%s11480_s8 + $0x40] sm:$0x3] }
  0x24   : > { %v11547_v31 = vpack.c.bf16 %v862_v27, %v860_v26  ;;  %v1181_v34 = vrot.slane %v510_v29, 1  ;;  %8911 = vmatprep.subr.bf16.mxu0 %v11079_v10  ;;  %9163 = vmatprep.subr.bf16.mxu1 %v11079_v10  ;;  %vm449_vm8 = vcmp.eq.s32.totalorder %v11534_v24, 16  ;;  %vm450_vm9 = vcmp.eq.s32.totalorder %v11537_v25, 16  ;;  %v11595_v56 = vld [vmem:[%s11482_s21 + $0x30] sm:$0xff]  ;;  %v11601_v59 = vld [vmem:[%s11482_s21 + $0x38] sm:$0xff]  ;;  %v11616_v0 = vld [vmem:[%s11482_s21 + $0x48] sm:$0xff] }
  0x25   : > { %vm490_vm10 = vcmp.eq.s32.totalorder %v11524_v20, 17  ;;  %v1180_v35 = vsel %vm14602_vm0, %v1178_v32, %v1179_v33  ;;  %v11557_v37 = vsel %vm448_vm7, %v11518_v18, 0.0  ;;  %v11560_v38 = vsel %vm449_vm8, %v11521_v19, 0.0  ;;  %v11604_v60 = vld [vmem:[%s11482_s21 + $0x40] sm:$0x3]  ;;  %v11630_v9 = vld [vmem:[%s11480_s8 + $0x48] sm:$0xff] }
  0x26   : > { %8919 = vmatprep.mubr.bf16.mxu0 %v11547_v31  ;;  %v1182_v36 = vsel %vm14602_vm0, %v1179_v33, %v1181_v34  ;;  %v11568_v41 = vsel %vm450_vm9, %v11531_v23, 0.0  ;;  %v863_v42 = vrot.slane %v11557_v37, 1  ;;  %v864_v43 = vrot.slane %v11560_v38, 1  ;;  %v11636_v14 = vld [vmem:[%s11482_s21 + $0x50] sm:$0xff]  ;;  %v11639_v15 = vld [vmem:[%s11482_s21 + $0x58] sm:$0x3] }
  0x27   : > { %v11565_v40 = vpack.c.bf16 %v1182_v36, %v1180_v35  ;;  %8912 = vmatpush3.bf16.msra.mxu0 %v11079_v10  ;;  %9164 = vmatpush3.bf16.msra.mxu1 %v11079_v10  ;;  %v866_v44 = vrot.slane %v11568_v41, 1  ;;  %vm491_vm11 = vcmp.eq.s32.totalorder %v11534_v24, 17  ;;  %vm492_vm12 = vcmp.eq.s32.totalorder %v11537_v25, 17  ;;  %v11633_v10 = vld [vmem:[%s11480_s8 + $0x50] sm:$0xff]  ;;  %14699 = vst [vmem:[#allocation8_spill] sm:$0xff] %v11639_v15  ;;  %v11083_v35 = vld [vmem:[%s14558_s3] sm:$0xff]  }
  0x28   : > { %v511_v45 = vsel %vm490_vm10, %v11518_v18, 0.0  ;;  %8913 = vmatprep.subr.bf16.mxu0 %v11080_v30  ;;  %9165 = vmatprep.subr.bf16.mxu1 %v11080_v30  ;;  %v865_v46 = vsel %vm14602_vm0, %v863_v42, %v864_v43  ;;  %v512_v47 = vsel %vm491_vm11, %v11521_v19, 0.0  ;;  %v513_v48 = vsel %vm492_vm12, %v11531_v23, 0.0  ;;  %v11657_v34 = vld [vmem:[%s11480_s8 + $0x58] sm:$0x3]  ;;  %v11762_v17 = vld [vmem:[%s11482_s21 + $0x80] sm:$0xff] }
  0x29   : > { %14696 = vst [vmem:[#allocation5_spill] sm:$0xff] %v11565_v40  ;;  %v1183_v49 = vrot.slane %v511_v45, 1  ;;  %9171 = vmatprep.mubr.bf16.mxu1 %v11565_v40  ;;  %v867_v51 = vsel %vm14602_vm0, %v864_v43, %v866_v44  ;;  %v1184_v52 = vrot.slane %v512_v47, 1  ;;  %v1186_v53 = vrot.slane %v513_v48, 1  ;;  %14700 = vst [vmem:[#allocation9_spill] sm:$0xff] %v11657_v34  ;;  %v11676_v45 = vld [vmem:[%s11482_s21 + $0x60] sm:$0xff] }
  0x2a   : > { %v11598_v58 = vpack.c.bf16 %v867_v51, %v865_v46  ;;  %vm451_vm13 = vcmp.eq.s32.totalorder %v11595_v56, 16  ;;  %vm493_vm14 = vcmp.eq.s32.totalorder %v11595_v56, 17  ;;  %vm452_vm15 = vcmp.eq.s32.totalorder %v11601_v59, 16  ;;  %14702 = vst [vmem:[#allocation11_spill] sm:$0xff] %v11676_v45  ;;  %v11084_v46 = vld [vmem:[%s14558_s3 + $0x8] sm:$0xff]   ;;  %14711 = vst [vmem:[#allocation20_spill] sm:$0xff] %v11762_v17 }
  0x2b   : > { %8914 = vmatpush3.bf16.msra.mxu0 %v11080_v30  ;;  %9166 = vmatpush3.bf16.msra.mxu1 %v11080_v30  ;;  %v1185_v62 = vsel %vm14602_vm0, %v1183_v49, %v1184_v52  ;;  %v1187_v63 = vsel %vm14602_vm0, %v1184_v52, %v1186_v53  ;;  %vm453_vm1 = vcmp.eq.s32.totalorder %v11604_v60, 16  ;;  %v11621_v2 = vsel %vm451_vm13, %v11584_v50, 0.0  ;;  %v11752_v57 = vld [vmem:[%s11482_s21 + $0x88] sm:$0x3]  ;;  %s14398_s24 = scalar_lea.vmem [#allocation2], %s7760_s9 }
  0x2c   : > { %14697 = vst [vmem:[#allocation6_spill] sm:$0xff] %v11598_v58  ;;  %8915 = vmatprep.subr.bf16.mxu0 %v11081_v39  ;;  %9167 = vmatprep.subr.bf16.mxu1 %v11081_v39  ;;  %v11618_v1 = vpack.c.bf16 %v1187_v63, %v1185_v62  ;;  %v11624_v3 = vsel %vm452_vm15, %v11589_v54, 0.0  ;;  %v11627_v6 = vsel %vm453_vm1, %v11592_v55, 0.0  ;;  %v868_v16 = vrot.slane %v11621_v2, 1  ;;  %v11693_v63 = vld [vmem:[%s11480_s8 + $0x60] sm:$0xff]  ;;  %14709 = vst [vmem:[#allocation18_spill] sm:$0xff] %v11752_v57 }
  0x2d   : > { %v869_v22 = vrot.slane %v11624_v3, 1  ;;  %v871_v26 = vrot.slane %v11627_v6, 1  ;;  %vm494_vm2 = vcmp.eq.s32.totalorder %v11601_v59, 17  ;;  %vm495_vm3 = vcmp.eq.s32.totalorder %v11604_v60, 17 }
  0x2e   : > { %14698 = vst [vmem:[#allocation7_spill] sm:$0xff] %v11618_v1  ;;  %v514_v27 = vsel %vm493_vm14, %v11584_v50, 0.0  ;;  %v515_v28 = vsel %vm494_vm2, %v11589_v54, 0.0  ;;  %vm454_vm6 = vcmp.eq.s32.totalorder %v11616_v0, 16  ;;  %v516_v32 = vsel %vm495_vm3, %v11592_v55, 0.0 }
  0x2f   : > { %8916 = vmatpush3.bf16.msra.mxu0 %v11081_v39  ;;  %9168 = vmatpush3.bf16.msra.mxu1 %v11081_v39  ;;  %v870_v29 = vsel %vm14602_vm0, %v868_v16, %v869_v22  ;;  %v872_v30 = vsel %vm14602_vm0, %v869_v22, %v871_v26  ;;  %v1188_v33 = vrot.slane %v514_v27, 1  ;;  %v1189_v42 = vrot.slane %v515_v28, 1  ;;  %v11696_v16 = vld [vmem:[%s11480_s8 + $0x68] sm:$0xff]  ;;  %v11709_v27 = vld [vmem:[%s11482_s21 + $0x70] sm:$0x3] }
  0x30   : > { %8917 = vmatprep.subr.bf16.mxu0 %v11082_v61  ;;  %9169 = vmatprep.subr.bf16.mxu1 %v11082_v61  ;;  %v11662_v36 = vpack.c.bf16 %v872_v30, %v870_v29  ;;  %v1191_v39 = vrot.slane %v516_v32, 1  ;;  %vm455_vm7 = vcmp.eq.s32.totalorder %v11636_v14, 16  ;;  %vm456_vm8 = vcmp.eq.s32.totalorder %v11639_v15, 16  ;;  %v11699_v22 = vld [vmem:[%s11482_s21 + $0x68] sm:$0xff]  ;;  %14705 = vst [vmem:[#allocation14_spill] sm:$0xff] %v11709_v27 }
  0x31   : > { %v11669_v43 = vsel %vm454_vm6, %v11630_v9, 0.0  ;;  %v11672_v44 = vsel %vm455_vm7, %v11633_v10, 0.0  ;;  %vm496_vm9 = vcmp.eq.s32.totalorder %v11616_v0, 17  ;;  %v1190_v47 = vsel %vm14602_vm0, %v1188_v33, %v1189_v42  ;;  %14704 = vst [vmem:[#allocation13_spill] sm:$0xff] %v11699_v22  ;;  %v11716_v33 = vld [vmem:[%s11480_s8 + $0x70] sm:$0x3] }
  0x32   : > { %14701 = vst [vmem:[#allocation10_spill] sm:$0xff] %v11662_v36  ;;  %v1192_v48 = vsel %vm14602_vm0, %v1189_v42, %v1191_v39  ;;  %v11684_v49 = vsel %vm456_vm8, %v11657_v34, 0.0  ;;  %v873_v51 = vrot.slane %v11669_v43, 1  ;;  %v874_v53 = vrot.slane %v11672_v44, 1  ;;  %14706 = vst [vmem:[#allocation15_spill] sm:$0xff] %v11716_v33  ;;  %v11085_v42 = vld [vmem:[%s14558_s3 + $0x10] sm:$0xff]  }
  0x33   : > { %8918 = vmatpush3.bf16.msra.mxu0 %v11082_v61  ;;  %9170 = vmatpush3.bf16.msra.mxu1 %v11082_v61  ;;  %v11687_v52 = vpack.c.bf16 %v1192_v48, %v1190_v47  ;;  %v876_v62 = vrot.slane %v11684_v49, 1  ;;  %vm497_vm12 = vcmp.eq.s32.totalorder %v11636_v14, 17  ;;  %vm498_vm13 = vcmp.eq.s32.totalorder %v11639_v15, 17 }
  0x34   : > { %8931 = vmatprep.subr.bf16.mxu0 %v11083_v35  ;;  %9183 = vmatprep.subr.bf16.mxu1 %v11083_v35  ;;  %v517_v61 = vsel %vm496_vm9, %v11630_v9, 0.0  ;;  %v518_v26 = vsel %vm497_vm12, %v11633_v10, 0.0  ;;  %vm457_vm15 = vcmp.eq.s32.totalorder %v11676_v45, 16  ;;  %v875_v28 = vsel %vm14602_vm0, %v873_v51, %v874_v53  ;;  %v11727_v51 = vld [vmem:[%s11482_s21 + $0x78] sm:$0xff] }
  0x35   : > { %14703 = vst [vmem:[#allocation12_spill] sm:$0xff] %v11687_v52  ;;  %v877_v29 = vsel %vm14602_vm0, %v874_v53, %v876_v62  ;;  %v519_v30 = vsel %vm498_vm13, %v11657_v34, 0.0  ;;  %v1193_v32 = vrot.slane %v517_v61, 1  ;;  %v1194_v47 = vrot.slane %v518_v26, 1  ;;  %14708 = vst [vmem:[#allocation17_spill] sm:$0xff] %v11727_v51 }
  0x36   : > { %8920 = vmatmul.mubr.bf16.vlgmr.msra.gmra.mrb[0].mxu0 %v11598_v58  ;;  %9172 = vmatmul.mubr.bf16.vlgmr.msra.gmra.mrb[0].mxu1 %v11618_v1  ;;  %v11723_v39 = vpack.c.bf16 %v877_v29, %v875_v28  ;;  %v1196_v48 = vrot.slane %v519_v30, 1  ;;  %vm458_vm1 = vcmp.eq.s32.totalorder %v11699_v22, 16  ;;  %vm459_vm3 = vcmp.eq.s32.totalorder %v11709_v27, 16  ;;  %v11746_v29 = vld [vmem:[%s11480_s8 + $0x78] sm:$0xff]  ;;  %v11749_v30 = vld [vmem:[%s11480_s8 + $0x80] sm:$0xff] }
  0x37   : > { %8932 = vmatpush3.bf16.msra.mxu0 %v11083_v35  ;;  %9184 = vmatpush3.bf16.msra.mxu1 %v11083_v35  ;;  %v11733_v53 = vsel %vm457_vm15, %v11693_v63, 0.0  ;;  %v11736_v62 = vsel %vm458_vm1, %v11696_v16, 0.0  ;;  %vm499_vm6 = vcmp.eq.s32.totalorder %v11676_v45, 17  ;;  %v1195_v61 = vsel %vm14602_vm0, %v1193_v32, %v1194_v47 }
  0x38   : > { %14707 = vst [vmem:[#allocation16_spill] sm:$0xff] %v11723_v39  ;;  %8933 = vmatprep.subr.bf16.mxu0 %v11084_v46  ;;  %9185 = vmatprep.subr.bf16.mxu1 %v11084_v46  ;;  %v1197_v26 = vsel %vm14602_vm0, %v1194_v47, %v1196_v48  ;;  %v11742_v35 = vsel %vm459_vm3, %v11716_v33, 0.0  ;;  %v878_v28 = vrot.slane %v11733_v53, 1  ;;  %vm14594_vm7 = vcmask 1045504  }
  0x39   : > { %8923 = vmatprep.mubr.bf16.mxu0 %v11662_v36  ;;  %9175 = vmatprep.mubr.bf16.mxu1 %v11687_v52  ;;  %v11756_v32 = vpack.c.bf16 %v1197_v26, %v1195_v61  ;;  %v879_v47 = vrot.slane %v11736_v62, 1  ;;  %v881_v48 = vrot.slane %v11742_v35, 1  ;;  %vm500_vm8 = vcmp.eq.s32.totalorder %v11699_v22, 17  ;;  %v11086_v22 = vld [vmem:[%s14558_s3 + $0x18] sm:$0xff]  }
  0x3a   : > { %vm501_vm13 = vcmp.eq.s32.totalorder %v11709_v27, 17  ;;  %v520_v21 = vsel %vm499_vm6, %v11693_v63, 0.0  ;;  %v521_v52 = vsel %vm500_vm8, %v11696_v16, 0.0  ;;  %vm460_vm15 = vcmp.eq.s32.totalorder %v11727_v51, 16  ;;  %v11776_v27 = vld [vmem:[%s11480_s8 + $0x88] sm:$0x3] }
  0x3b   : > { %14710 = vst [vmem:[#allocation19_spill] sm:$0xff] %v11756_v32  ;;  %8934 = vmatpush3.bf16.msra.mxu0 %v11084_v46  ;;  %9186 = vmatpush3.bf16.msra.mxu1 %v11084_v46  ;;  %v880_v61 = vsel %vm14602_vm0, %v878_v28, %v879_v47  ;;  %v882_v26 = vsel %vm14602_vm0, %v879_v47, %v881_v48  ;;  %v522_v1 = vsel %vm501_vm13, %v11716_v33, 0.0  ;;  %v1198_v40 = vrot.slane %v520_v21, 1 }
  0x3c   : > { %8935 = vmatprep.subr.bf16.mxu0 %v11085_v42  ;;  %9187 = vmatprep.subr.bf16.mxu1 %v11085_v42  ;;  %v11781_v45 = vpack.c.bf16 %v882_v26, %v880_v61  ;;  %v1199_v34 = vrot.slane %v521_v52, 1  ;;  %v1201_v15 = vrot.slane %v522_v1, 1  ;;  %vm461_vm1 = vcmp.eq.s32.totalorder %v11762_v17, 16 }
  0x3d   : > { %vm462_vm3 = vcmp.eq.s32.totalorder %v11752_v57, 16  ;;  %v11788_v21 = vsel %vm460_vm15, %v11746_v29, 0.0  ;;  %v11791_v46 = vsel %vm461_vm1, %v11749_v30, 0.0  ;;  %vm502_vm13 = vcmp.eq.s32.totalorder %v11727_v51, 17 }
  0x3e   : > { %14712 = vst [vmem:[#allocation21_spill] sm:$0xff] %v11781_v45  ;;  %8924 = vmatmul.mubr.bf16.gmra.mrb[4].mxu0 %v11723_v39  ;;  %9176 = vmatmul.mubr.bf16.gmra.mrb[4].mxu1 %v11756_v32  ;;  %v1200_v1 = vsel %vm14602_vm0, %v1198_v40, %v1199_v34  ;;  %v1202_v52 = vsel %vm14602_vm0, %v1199_v34, %v1201_v15  ;;  %v11799_v28 = vsel %vm462_vm3, %v11776_v27, 0.0  ;;  %v883_v47 = vrot.slane %v11788_v21, 1  ;;  %v11087_v40 = vld [vmem:[%s14558_s3 + $0x20] sm:$0xff]   ;;  %vm11852_vm3 = vmpackc.low %vm488_vm5, %vm487_vm4 }
  0x3f   : > { %8936 = vmatpush3.bf16.msra.mxu0 %v11085_v42  ;;  %9188 = vmatpush3.bf16.msra.mxu1 %v11085_v42  ;;  %v11802_v48 = vpack.c.bf16 %v1202_v52, %v1200_v1  ;;  %v884_v61 = vrot.slane %v11791_v46, 1  ;;  %v886_v26 = vrot.slane %v11799_v28, 1  ;;  %vm14595_vm15 = vcmp.eq.s32.totalorder %v11762_v17, 17 }
  0x40   : > { %8937 = vmatprep.subr.bf16.mxu0 %v11086_v22  ;;  %9189 = vmatprep.subr.bf16.mxu1 %v11086_v22  ;;  %vm504_vm1 = vcmp.eq.s32.totalorder %v11752_v57, 17  ;;  %v523_v15 = vsel %vm502_vm13, %v11746_v29, 0.0  ;;  %v524_v34 = vsel %vm14595_vm15, %v11749_v30, 0.0  ;;  %v14714_v17 = vrot.slane %v11508_v12, 2  ;;  %vm11952_vm15 = vmpackc.low %vm491_vm11, %vm490_vm10 }
  0x41   : > { %8927 = vmatprep.mubr.bf16.mxu0 %v11781_v45  ;;  %9179 = vmatprep.mubr.bf16.mxu1 %v11802_v48  ;;  %v885_v42 = vsel %vm14602_vm0, %v883_v47, %v884_v61  ;;  %v887_v1 = vsel %vm14602_vm0, %v884_v61, %v886_v26  ;;  %v525_v52 = vsel %vm504_vm1, %v11776_v27, 0.0  ;;  %v1203_v32 = vrot.slane %v523_v15, 1 }
  0x42   : > { %v11822_v57 = vpack.c.bf16 %v887_v1, %v885_v42  ;;  %v1204_v33 = vrot.slane %v524_v34, 1  ;;  %v1206_v51 = vrot.slane %v525_v52, 1  ;;  %v14715_v39 = vrot.slane %v11505_v11, 2 }
  0x43   : > { %8938 = vmatpush3.bf16.msra.mxu0 %v11086_v22  ;;  %9190 = vmatpush3.bf16.msra.mxu1 %v11086_v22  ;;  %v14716_v47 = vrot.slane %v11510_v13, 2  ;;  %v14717_v61 = vmov %v14714_v17  ;;  %v11088_v22 = vld [vmem:[%s14558_s3 + $0x28] sm:$0xff]   ;;  %v2606_v13 = vrot.slane %v11557_v37, 2  ;;  %v2611_v8 = vrot.slane %v11621_v2, 2 }
  0x44   : > { %14713 = vst [vmem:[#allocation22_spill] sm:$0xff] %v11822_v57  ;;  %v11829_v45 = vsel %vm14594_vm7, %v14715_v39, %v14714_v17  ;;  %8939 = vmatprep.subr.bf16.mxu0 %v11087_v40  ;;  %9191 = vmatprep.subr.bf16.mxu1 %v11087_v40  ;;  %v1205_v15 = vsel %vm14602_vm0, %v1203_v32, %v1204_v33  ;;  %v2616_v34 = vrot.slane %v11669_v43, 2  ;;  %v2617_v42 = vrot.slane %v11672_v44, 2  ;;  %v14749_v17 = vld [vmem:[#allocation17_spill] sm:$0xff] }
  0x45   : > { %v11836_v26 = vsel %vm14594_vm7, %v14717_v61, %v14716_v47  ;;  %v1207_v11 = vsel %vm14602_vm0, %v1204_v33, %v1206_v51  ;;  %v7783_v32 = vpack.c.bf16 %v11488_v5, %v11485_v4  ;;  %v2607_v33 = vrot.slane %v11560_v38, 2  ;;  %v11089_v4 = vld [vmem:[%s14558_s3 + $0x30] sm:$0xff]   ;;  %v11090_v61 = vld [vmem:[%s14558_s3 + $0x38] sm:$0xff]  }
  0x46   : > { %v11846_v39 = vpack.c.bf16 %v1207_v11, %v1205_v15  ;;  %v2609_v51 = vrot.slane %v11568_v41, 2  ;;  %8928 = vmatmul.mubr.bf16.gmra.mrb[8].mxu0 %v11822_v57  ;;  %v2612_v38 = vrot.slane %v11624_v3, 2  ;;  %v2614_v41 = vrot.slane %v11627_v6, 2 }
  0x47   : > { %8940 = vmatpush3.bf16.msra.mxu0 %v11087_v40  ;;  %9192 = vmatpush3.bf16.msra.mxu1 %v11087_v40  ;;  %v2608_v37 = vsel %vm14594_vm7, %v2606_v13, %v2607_v33  ;;  %v11876_v2 = vpack.c.bf16 %v11521_v19, %v11518_v18  ;;  %v11880_v40 = vpack.c.bf16 %v11589_v54, %v11584_v50  ;;  %v2619_v52 = vrot.slane %v11684_v49, 2 }
  0x48   : > { %v2610_v7 = vsel %vm14594_vm7, %v2607_v33, %v2609_v51  ;;  %8941 = vmatprep.subr.bf16.mxu0 %v11088_v22  ;;  %9193 = vmatprep.subr.bf16.mxu1 %v11088_v22  ;;  %v11887_v3 = vpack.c.bf16 %v11633_v10, %v11630_v9  ;;  %v2613_v6 = vsel %vm14594_vm7, %v2611_v8, %v2612_v38  ;;  %v2621_v44 = vrot.slane %v11733_v53, 2 }
  0x49   : > { %v11867_v5 = vpack.c.bf16 %v2610_v7, %v2608_v37  ;;  %9180 = vmatmul.mubr.bf16.gmra.mrb[8].mxu1 %v11846_v39  ;;  %8947 = vmatprep.mubr.msk.bf16.mxu0 %vm11852_vm3, %v7783_v32  ;;  %v2615_v1 = vsel %vm14594_vm7, %v2612_v38, %v2614_v41  ;;  %v2618_v43 = vsel %vm14594_vm7, %v2616_v34, %v2617_v42  ;;  %v2624_v49 = vrot.slane %v11742_v35, 2  ;;  %v11091_v37 = vld [vmem:[%s14558_s3 + $0x80] sm:$0xff]  }
  0x4a   : > { %9199 = vmatprep.mubr.bf16.mxu1 %v11547_v31  ;;  %v11892_v47 = vpack.c.bf16 %v2615_v1, %v2613_v6  ;;  %v2622_v31 = vrot.slane %v11736_v62, 2  ;;  %v2620_v15 = vsel %vm14594_vm7, %v2617_v42, %v2619_v52  ;;  %v2627_v11 = vrot.slane %v11791_v46, 2 }
  0x4b   : > { %14720 = vst [vmem:[#allocation23_spill] sm:$0xff] %v11867_v5  ;;  %8942 = vmatpush3.bf16.msra.mxu0 %v11088_v22  ;;  %9194 = vmatpush3.bf16.msra.mxu1 %v11088_v22  ;;  %v2626_v22 = vrot.slane %v11788_v21, 2  ;;  %v11904_v13 = vpack.c.bf16 %v2620_v15, %v2618_v43  ;;  %v2629_v62 = vrot.slane %v11799_v28, 2  ;;  %vm403_vm4 = vcmp.eq.s32.totalorder %v11524_v20, 1 }
  0x4c   : > { %8943 = vmatprep.subr.bf16.mxu0 %v11089_v4  ;;  %9195 = vmatprep.subr.bf16.mxu1 %v11089_v4  ;;  %v2623_v53 = vsel %vm14594_vm7, %v2621_v44, %v2622_v31  ;;  %v2625_v12 = vsel %vm14594_vm7, %v2622_v31, %v2624_v49  ;;  %vm404_vm5 = vcmp.eq.s32.totalorder %v11534_v24, 1  ;;  %v11913_v35 = vsel %vm403_vm4, %v11518_v18, 0.0 }
  0x4d   : > { %v2628_v32 = vsel %vm14594_vm7, %v2626_v22, %v2627_v11  ;;  %v11917_v21 = vpack.c.bf16 %v11696_v16, %v11693_v63  ;;  %v11919_v46 = vpack.c.bf16 %v2625_v12, %v2623_v53  ;;  %v2630_v28 = vsel %vm14594_vm7, %v2627_v11, %v2629_v62  ;;  %vm11925_vm1 = vmpackc.low %vm404_vm5, %vm403_vm4 }
  0x4e   : > { %v11923_v33 = vsel %vm404_vm5, %v11521_v19, 0.0  ;;  %v11934_v7 = vpack.c.bf16 %v11749_v30, %v11746_v29  ;;  %v11936_v8 = vpack.c.bf16 %v2630_v28, %v2628_v32  ;;  %vm361_vm3 = vcmp.eq.s32.totalorder %v11524_v20, 0 }
  0x4f   : > { %8944 = vmatpush3.bf16.msra.mxu0 %v11089_v4  ;;  %9196 = vmatpush3.bf16.msra.mxu1 %v11089_v4  ;;  %vm362_vm7 = vcmp.eq.s32.totalorder %v11534_v24, 0  ;;  %vm363_vm4 = vcmp.eq.s32.totalorder %v11537_v25, 0  ;;  %v11942_v4 = vsel %vm361_vm3, %v11518_v18, 0.0  ;;  %vm406_vm5 = vcmp.eq.s32.totalorder %v11595_v56, 1 }
  0x50   : > { %8945 = vmatprep.subr.bf16.mxu0 %v11090_v61  ;;  %9197 = vmatprep.subr.bf16.mxu1 %v11090_v61  ;;  %v11945_v38 = vsel %vm362_vm7, %v11521_v19, 0.0  ;;  %v14723_v41 = vmov 0  ;;  %v11957_v34 = vsel %vm363_vm4, %v11531_v23, 0.0  ;;  %v1524_v25 = vrot.slane %v11942_v4, 1  ;;  %v11092_v23 = vld [vmem:[%s14558_s3 + $0x88] sm:$0xff]  }
  0x51   : > { %v14724_v41 = vsel %vm11952_vm15, 4294967295, %v14723_v41  ;;  %v1525_v18 = vrot.slane %v11945_v38, 1  ;;  %vm407_vm7 = vcmp.eq.s32.totalorder %v11601_v59, 1  ;;  %v1527_v19 = vrot.slane %v11957_v34, 1 }
  0x52   : > { %14725 = vst [vmem:[#allocation24_spill] sm:$0xff] %v14724_v41  ;;  %vm408_vm3 = vcmp.eq.s32.totalorder %v11604_v60, 1  ;;  %v427_v20 = vsel %vm406_vm5, %v11584_v50, 0.0  ;;  %v428_v24 = vsel %vm407_vm7, %v11589_v54, 0.0  ;;  %vm11966_vm10 = vmpackc.low %vm407_vm7, %vm406_vm5  ;;  %vm364_vm11 = vcmp.eq.s32.totalorder %v11595_v56, 0 }
  0x53   : > { %8946 = vmatpush3.bf16.msra.mxu0 %v11090_v61  ;;  %9198 = vmatpush3.bf16.msra.mxu1 %v11090_v61  ;;  %v1526_v6 = vsel %vm14602_vm0, %v1524_v25, %v1525_v18  ;;  %v429_v1 = vsel %vm408_vm3, %v11592_v55, 0.0  ;;  %v1732_v52 = vrot.slane %v427_v20, 1  ;;  %v1733_v43 = vrot.slane %v428_v24, 1  ;;  %vm11986_vm5 = vmpackc.low %vm494_vm2, %vm493_vm14  ;;  %v14732_v25 = vld [vmem:[#allocation9_spill] sm:$0xff]  ;;  %v11094_v20 = vld [vmem:[%s14558_s3 + $0x98] sm:$0xff]  }
  0x54   : > { %8959 = vmatprep.subr.bf16.mxu0 %v11091_v37  ;;  %9211 = vmatprep.subr.bf16.mxu1 %v11091_v37  ;;  %v1528_v44 = vsel %vm14602_vm0, %v1525_v18, %v1527_v19  ;;  %v1735_v31 = vrot.slane %v429_v1, 1  ;;  %vm365_vm4 = vcmp.eq.s32.totalorder %v11601_v59, 0  ;;  %v14728_v61 = vmov 0 }
  0x55   : > { %v14729_v61 = vsel %vm11986_vm5, 4294967295, %v14728_v61  ;;  %v11990_v15 = vpack.c.bf16 %v1528_v44, %v1526_v6  ;;  %v1734_v49 = vsel %vm14602_vm0, %v1732_v52, %v1733_v43  ;;  %vm366_vm7 = vcmp.eq.s32.totalorder %v11604_v60, 0  ;;  %v11093_v60 = vld [vmem:[%s14558_s3 + $0x90] sm:$0xff]  }
  0x56   : > { %8948 = vmatmul.mubr.msk.bf16.vlgmr.msra.gmra.mrb[12].mxu0 %vm11952_vm15, %v11876_v2  ;;  %9200 = vmatmul.mubr.bf16.vlgmr.msra.gmra.mrb[12].mxu1 %v11598_v58  ;;  %14730 = vst [vmem:[#allocation25_spill] sm:$0xff] %v14729_v61  ;;  %v11995_v22 = vsel %vm364_vm11, %v11584_v50, 0.0  ;;  %v1736_v11 = vsel %vm14602_vm0, %v1733_v43, %v1735_v31  ;;  %v11999_v56 = vsel %vm365_vm4, %v11589_v54, 0.0  ;;  %v12002_v59 = vsel %vm366_vm7, %v11592_v55, 0.0  ;;  %v14731_v54 = vld [vmem:[#allocation8_spill] sm:$0xff]  ;;  %vm12036_vm7 = vmpackc.low %vm497_vm12, %vm496_vm9  ;;  %v14738_v44 = vld [vmem:[#allocation11_spill] sm:$0xff] }
  0x57   : > { %8960 = vmatpush3.bf16.msra.mxu0 %v11091_v37  ;;  %9212 = vmatpush3.bf16.msra.mxu1 %v11091_v37  ;;  %v1529_v53 = vrot.slane %v11995_v22, 1  ;;  %v12008_v50 = vpack.c.bf16 %v1736_v11, %v1734_v49  ;;  %v1530_v62 = vrot.slane %v11999_v56, 1  ;;  %v1532_v12 = vrot.slane %v12002_v59, 1  ;;  %vm12069_vm12 = vmpackc.low %vm500_vm8, %vm499_vm6 }
  0x58   : > { %8961 = vmatprep.subr.bf16.mxu0 %v11092_v23  ;;  %9213 = vmatprep.subr.bf16.mxu1 %v11092_v23  ;;  %vm409_vm14 = vcmp.eq.s32.totalorder %v11616_v0, 1  ;;  %vm410_vm2 = vcmp.eq.s32.totalorder %v11636_v14, 1  ;;  %vm411_vm3 = vcmp.eq.s32.totalorder %v14731_v54, 1  ;;  %vm367_vm11 = vcmp.eq.s32.totalorder %v11616_v0, 0  ;;  %v11095_v0 = vld [vmem:[%s14558_s3 + $0xa0] sm:$0xff]  }
  0x59   : > { %8951 = vmatprep.mubr.msk.bf16.mxu0 %vm11986_vm5, %v11880_v40  ;;  %9203 = vmatprep.mubr.bf16.mxu1 %v11662_v36  ;;  %v430_v55 = vsel %vm409_vm14, %v11630_v9, 0.0  ;;  %v1531_v32 = vsel %vm14602_vm0, %v1529_v53, %v1530_v62  ;;  %v1533_v28 = vsel %vm14602_vm0, %v1530_v62, %v1532_v12  ;;  %v431_v37 = vsel %vm410_vm2, %v11633_v10, 0.0  ;;  %vm12025_vm4 = vmpackc.low %vm410_vm2, %vm409_vm14 }
  0x5a   : > { %v432_v18 = vsel %vm411_vm3, %v14732_v25, 0.0  ;;  %v14735_v24 = vmov 0  ;;  %v12040_v6 = vpack.c.bf16 %v1533_v28, %v1531_v32  ;;  %v1737_v1 = vrot.slane %v430_v55, 1  ;;  %v14744_v32 = vld [vmem:[#allocation14_spill] sm:$0xff] }
  0x5b   : > { %8962 = vmatpush3.bf16.msra.mxu0 %v11092_v23  ;;  %9214 = vmatpush3.bf16.msra.mxu1 %v11092_v23  ;;  %v14736_v24 = vsel %vm12036_vm7, 4294967295, %v14735_v24  ;;  %v1738_v52 = vrot.slane %v431_v37, 1  ;;  %v1740_v43 = vrot.slane %v432_v18, 1  ;;  %vm368_vm14 = vcmp.eq.s32.totalorder %v11636_v14, 0  ;;  %v14740_v14 = vld [vmem:[#allocation13_spill] sm:$0xff] }
  0x5c   : > { %14737 = vst [vmem:[#allocation8_spill] sm:$0xff] %v14736_v24  ;;  %8963 = vmatprep.subr.bf16.mxu0 %v11093_v60  ;;  %9215 = vmatprep.subr.bf16.mxu1 %v11093_v60  ;;  %vm369_vm2 = vcmp.eq.s32.totalorder %v14731_v54, 0  ;;  %v12047_v23 = vsel %vm367_vm11, %v11630_v9, 0.0  ;;  %vm412_vm9 = vcmp.eq.s32.totalorder %v14738_v44, 1  ;;  %v12053_v11 = vsel %vm368_vm14, %v11633_v10, 0.0  ;;  %v14739_v9 = vld [vmem:[#allocation16_spill] sm:$0xff] }
  0x5d   : > { %v1739_v31 = vsel %vm14602_vm0, %v1737_v1, %v1738_v52  ;;  %v1741_v49 = vsel %vm14602_vm0, %v1738_v52, %v1740_v43  ;;  %v12056_v53 = vsel %vm369_vm2, %v14732_v25, 0.0  ;;  %v14741_v10 = vmov 0  ;;  %v14745_v1 = vld [vmem:[#allocation15_spill] sm:$0xff]  ;;  %v14748_v43 = vld [vmem:[#allocation21_spill] sm:$0xff]  ;;  %v11220_v24 = vld [vmem:[%s11480_s8 + $0x28] sm:$0x3] }
  0x5e   : > { %8952 = vmatmul.mubr.msk.bf16.gmra.mrb[4].mxu0 %vm12036_vm7, %v11887_v3  ;;  %9204 = vmatmul.mubr.bf16.gmra.mrb[4].mxu1 %v14739_v9  ;;  %v14742_v10 = vsel %vm12069_vm12, 4294967295, %v14741_v10  ;;  %v12073_v62 = vpack.c.bf16 %v1741_v49, %v1739_v31  ;;  %v1534_v12 = vrot.slane %v12047_v23, 1  ;;  %v1535_v54 = vrot.slane %v12053_v11, 1 }
  0x5f   : > { %14743 = vst [vmem:[#allocation9_spill] sm:$0xff] %v14742_v10  ;;  %v1537_v55 = vrot.slane %v12056_v53, 1  ;;  %8964 = vmatpush3.bf16.msra.mxu0 %v11093_v60  ;;  %9216 = vmatpush3.bf16.msra.mxu1 %v11093_v60  ;;  %vm413_vm3 = vcmp.eq.s32.totalorder %v14740_v14, 1  ;;  %vm414_vm11 = vcmp.eq.s32.totalorder %v14744_v32, 1  ;;  %v433_v28 = vsel %vm412_vm9, %v11693_v63, 0.0 }
  0x60   : > { %vm370_vm6 = vcmp.eq.s32.totalorder %v14738_v44, 0  ;;  %8965 = vmatprep.subr.bf16.mxu0 %v11094_v20  ;;  %9217 = vmatprep.subr.bf16.mxu1 %v11094_v20  ;;  %v1536_v37 = vsel %vm14602_vm0, %v1534_v12, %v1535_v54  ;;  %v434_v18 = vsel %vm413_vm3, %v11696_v16, 0.0  ;;  %v435_v60 = vsel %vm414_vm11, %v14745_v1, 0.0  ;;  %vm12090_vm8 = vmpackc.low %vm413_vm3, %vm412_vm9 }
  0x61   : > { %v1538_v25 = vsel %vm14602_vm0, %v1535_v54, %v1537_v55  ;;  %8955 = vmatprep.mubr.msk.bf16.mxu0 %vm12069_vm12, %v11917_v21  ;;  %9207 = vmatprep.mubr.bf16.mxu1 %v14748_v43  ;;  %v1742_v49 = vrot.slane %v433_v28, 1  ;;  %v1743_v12 = vrot.slane %v434_v18, 1  ;;  %v1745_v54 = vrot.slane %v435_v60, 1 }
  0x62   : > { %v12098_v31 = vpack.c.bf16 %v1538_v25, %v1536_v37  ;;  %vm371_vm14 = vcmp.eq.s32.totalorder %v14740_v14, 0  ;;  %vm372_vm2 = vcmp.eq.s32.totalorder %v14744_v32, 0  ;;  %v12105_v55 = vsel %vm370_vm6, %v11693_v63, 0.0  ;;  %v14750_v37 = vld [vmem:[#allocation20_spill] sm:$0xff] }
  0x63   : > { %vm415_vm9 = vcmp.eq.s32.totalorder %v14749_v17, 1  ;;  %8966 = vmatpush3.bf16.msra.mxu0 %v11094_v20  ;;  %9218 = vmatpush3.bf16.msra.mxu1 %v11094_v20  ;;  %vm14751_vm3 = vcmp.eq.s32.totalorder %v14750_v37, 17  ;;  %v14752_v28 = vmov 0  ;;  %v1744_v14 = vsel %vm14602_vm0, %v1742_v49, %v1743_v12  ;;  %v11096_v20 = vld [vmem:[%s14558_s3 + $0xa8] sm:$0xff]  }
  0x64   : > { %vm12112_vm11 = vmpackc.low %vm14751_vm3, %vm502_vm13  ;;  %v1746_v32 = vsel %vm14602_vm0, %v1743_v12, %v1745_v54  ;;  %v12119_v44 = vsel %vm371_vm14, %v11696_v16, 0.0  ;;  %v12122_v63 = vsel %vm372_vm2, %v14745_v1, 0.0  ;;  %8967 = vmatprep.subr.bf16.mxu0 %v11095_v0  ;;  %9219 = vmatprep.subr.bf16.mxu1 %v11095_v0  ;;  %v1539_v18 = vrot.slane %v12105_v55, 1  ;;  %v14756_v16 = vld [vmem:[#allocation18_spill] sm:$0xff] }
  0x65   : > { %v14753_v28 = vsel %vm12112_vm11, 4294967295, %v14752_v28  ;;  %v12127_v25 = vpack.c.bf16 %v1746_v32, %v1744_v14  ;;  %v1540_v60 = vrot.slane %v12119_v44, 1  ;;  %v1542_v49 = vrot.slane %v12122_v63, 1 }
  0x66   : > { %14754 = vst [vmem:[#allocation11_spill] sm:$0xff] %v14753_v28  ;;  %vm416_vm13 = vcmp.eq.s32.totalorder %v14750_v37, 1  ;;  %vm417_vm6 = vcmp.eq.s32.totalorder %v14756_v16, 1  ;;  %v436_v1 = vsel %vm415_vm9, %v11746_v29, 0.0  ;;  %vm373_vm14 = vcmp.eq.s32.totalorder %v14749_v17, 0  ;;  %8956 = vmatmul.mubr.msk.bf16.gmra.mrb[8].mxu0 %vm12112_vm11, %v11934_v7  ;;  %9208 = vmatmul.mubr.bf16.gmra.mrb[8].mxu1 %v11822_v57 }
  0x67   : > { %14755 = vst [vmem:[#allocation13_spill] sm:$0xff] %v12127_v25  ;;  %v1541_v12 = vsel %vm14602_vm0, %v1539_v18, %v1540_v60  ;;  %v1543_v54 = vsel %vm14602_vm0, %v1540_v60, %v1542_v49  ;;  %v437_v14 = vsel %vm416_vm13, %v11749_v30, 0.0  ;;  %v438_v32 = vsel %vm417_vm6, %v11776_v27, 0.0  ;;  %vm12148_vm2 = vmpackc.low %vm416_vm13, %vm415_vm9  ;;  %8968 = vmatpush3.bf16.msra.mxu0 %v11095_v0  ;;  %9220 = vmatpush3.bf16.msra.mxu1 %v11095_v0  ;;  %v11097_v18 = vld [vmem:[%s14558_s3 + $0xb0] sm:$0xff]   ;;  %v14759_v60 = vld [vmem:[#allocation5_spill] sm:$0xff] }
  0x68   : > { %v12152_v28 = vpack.c.bf16 %v1543_v54, %v1541_v12  ;;  %v1747_v10 = vrot.slane %v436_v1, 1  ;;  %v1748_v57 = vrot.slane %v437_v14, 1  ;;  %v1750_v9 = vrot.slane %v438_v32, 1  ;;  %8969 = vmatprep.subr.bf16.mxu0 %v11096_v20  ;;  %9221 = vmatprep.subr.bf16.mxu1 %v11096_v20  ;;  %v12191_v54 = vld [vmem:[%s11482_s21 + $0x98] sm:$0xff]  ;;  %v12197_v32 = vld [vmem:[%s11480_s8 + $0x90] sm:$0xff] }
  0x69   : > { %vm374_vm3 = vcmp.eq.s32.totalorder %v14750_v37, 0  ;;  %vm375_vm9 = vcmp.eq.s32.totalorder %v14756_v16, 0  ;;  %v12162_v0 = vsel %vm373_vm14, %v11746_v29, 0.0  ;;  %8975 = vmatprep.mubr.bf16.mxu0 %v14759_v60  ;;  %v14760_v49 = vpack.c.bf16 %v11836_v26, %v11829_v45  ;;  %v12200_v60 = vld [vmem:[%s11482_s21 + $0xa0] sm:$0x3] }
  0x6a   : > { %v1749_v1 = vsel %vm14602_vm0, %v1747_v10, %v1748_v57  ;;  %v1751_v12 = vsel %vm14602_vm0, %v1748_v57, %v1750_v9  ;;  %v12171_v37 = vsel %vm374_vm3, %v11749_v30, 0.0  ;;  %v12174_v16 = vsel %vm375_vm9, %v11776_v27, 0.0  ;;  %v11098_v57 = vld [vmem:[%s14558_s3 + $0xb8] sm:$0xff]   ;;  %v12185_v30 = vld [vmem:[%s11482_s21 + $0x90] sm:$0xff] }
  0x6b   : > { %9227 = vmatprep.mubr.bf16.mxu1 %v14760_v49  ;;  %v12176_v17 = vpack.c.bf16 %v1751_v12, %v1749_v1  ;;  %v1544_v29 = vrot.slane %v12162_v0, 1  ;;  %v1545_v45 = vrot.slane %v12171_v37, 1  ;;  %v1547_v26 = vrot.slane %v12174_v16, 1  ;;  %8970 = vmatpush3.bf16.msra.mxu0 %v11096_v20  ;;  %v12203_v49 = vld [vmem:[%s11480_s8 + $0x98] sm:$0xff]  ;;  %v11099_v1 = vld [vmem:[%s14558_s3 + $0xc0] sm:$0xff]  }
  0x6c   : > { %9222 = vmatpush3.bf16.msra.mxu1 %v11096_v20  ;;  %8971 = vmatprep.subr.bf16.mxu0 %v11097_v18  ;;  %v1727_v27 = vrot.slane %v11913_v35, 1  ;;  %v1728_v14 = vrot.slane %v11923_v33, 1  ;;  %vm376_vm13 = vcmp.eq.s32.totalorder %v12185_v30, 0  ;;  %vm463_vm6 = vcmp.eq.s32.totalorder %v12185_v30, 16  ;;  %v12219_v12 = vld [vmem:[%s11480_s8 + $0xa0] sm:$0x3] }
  0x6d   : > { %14761 = vst [vmem:[#allocation14_spill] sm:$0xff] %v12176_v17  ;;  %9223 = vmatprep.subr.bf16.mxu1 %v11097_v18  ;;  %v1546_v9 = vsel %vm14602_vm0, %v1544_v29, %v1545_v45  ;;  %v1548_v10 = vsel %vm14602_vm0, %v1545_v45, %v1547_v26  ;;  %vm464_vm14 = vcmp.eq.s32.totalorder %v12191_v54, 16  ;;  %vm377_vm3 = vcmp.eq.s32.totalorder %v12191_v54, 0  ;;  %v11219_v29 = vld [vmem:[%s11482_s21 + $0x28] sm:$0x3]  ;;  %v14765_v17 = vld [vmem:[#allocation7_spill] sm:$0xff] }
  0x6e   : > { %v12194_v20 = vpack.c.bf16 %v1548_v10, %v1546_v9  ;;  %v12210_v35 = vsel %vm463_vm6, %v12197_v32, 0.0  ;;  %v12213_v33 = vsel %vm464_vm14, %v12203_v49, 0.0  ;;  %vm378_vm9 = vcmp.eq.s32.totalorder %v12200_v60, 0  ;;  %v11100_v9 = vld [vmem:[%s14558_s3 + $0xc8] sm:$0xff]  }
  0x6f   : > { %8972 = vmatpush3.bf16.msra.mxu0 %v11097_v18  ;;  %vm405_vm0 = vcmp.eq.s32.totalorder %v11219_v29, 1  ;;  %vm14762_vm6 = vcmask 1046528   ;;  %v2916_v26 = vrot.slane %v11942_v4, 2  ;;  %v12232_v10 = vsel %vm377_vm3, %v12203_v49, 0.0 }
  0x70   : > { %9224 = vmatpush3.bf16.msra.mxu1 %v11097_v18  ;;  %8973 = vmatprep.subr.bf16.mxu0 %v11098_v57  ;;  %v12223_v18 = vsel %vm376_vm13, %v12197_v32, 0.0  ;;  %v1729_v45 = vsel %vm14762_vm6, %v1727_v27, %v1728_v14  ;;  %v426_v36 = vsel %vm405_vm0, %v11220_v24, 0.0  ;;  %v2917_v58 = vrot.slane %v11945_v38, 2  ;;  %vm14763_vm13 = vmmov %vm14762_vm6 }
  0x71   : > { %9225 = vmatprep.subr.bf16.mxu1 %v11098_v57  ;;  %v1730_v61 = vrot.slane %v426_v36, 1  ;;  %v12239_v4 = vsel %vm378_vm9, %v12219_v12, 0.0  ;;  %v2919_v27 = vrot.slane %v11957_v34, 2  ;;  %v2921_v29 = vrot.slane %v11995_v22, 2 }
  0x72   : > { %v2922_v41 = vrot.slane %v11999_v56, 2  ;;  %vm14764_vm0 = vcmask 1045504   ;;  %v2924_v36 = vrot.slane %v12002_v59, 2  ;;  %v2926_v38 = vrot.slane %v12047_v23, 2 }
  0x73   : > { %8974 = vmatpush3.bf16.msra.mxu0 %v11098_v57  ;;  %v1731_v24 = vsel %vm14763_vm13, %v1728_v14, %v1730_v61  ;;  %vm14766_vm14 = vmmov %vm14764_vm0  ;;  %v2927_v56 = vrot.slane %v12053_v11, 2  ;;  %v11101_v61 = vld [vmem:[%s14558_s3 + $0xd0] sm:$0xff]   ;;  %v2929_v14 = vrot.slane %v12056_v53, 2  ;;  %v2936_v53 = vrot.slane %v12162_v0, 2 }
  0x74   : > { %9226 = vmatpush3.bf16.msra.mxu1 %v11098_v57  ;;  %8987 = vmatprep.subr.bf16.mxu0 %v11099_v1  ;;  %v2918_v57 = vsel %vm14764_vm0, %v2916_v26, %v2917_v58  ;;  %v12250_v25 = vpack.c.bf16 %v1731_v24, %v1729_v45  ;;  %v2920_v34 = vsel %vm14766_vm14, %v2917_v58, %v2919_v27  ;;  %vm14767_vm3 = vmmov %vm14764_vm0  ;;  %v2931_v45 = vrot.slane %v12105_v55, 2  ;;  %v14770_v27 = vld [vmem:[#allocation12_spill] sm:$0xff] }
  0x75   : > { %9239 = vmatprep.subr.bf16.mxu1 %v11099_v1  ;;  %v2923_v22 = vsel %vm14767_vm3, %v2921_v29, %v2922_v41  ;;  %v12258_v59 = vpack.c.bf16 %v2920_v34, %v2918_v57  ;;  %vm14768_vm9 = vmmov %vm14764_vm0  ;;  %v2934_v26 = vrot.slane %v12122_v63, 2  ;;  %v2937_v55 = vrot.slane %v12171_v37, 2 }
  0x76   : > { %8976 = vmatmul.mubr.bf16.vlgmr.msra.gmra.mrb[16].mxu0 %v14765_v17  ;;  %v2925_v23 = vsel %vm14768_vm9, %v2922_v41, %v2924_v36  ;;  %vm14769_vm6 = vmmov %vm14764_vm0  ;;  %v2939_v29 = vrot.slane %v12174_v16, 2  ;;  %v2941_v63 = vrot.slane %v12223_v18, 2  ;;  %v2942_v37 = vrot.slane %v12232_v10, 2  ;;  %v11102_v16 = vld [vmem:[%s14558_s3 + $0xd8] sm:$0xff]  }
  0x77   : > { %9228 = vmatmul.mubr.bf16.vlgmr.msra.gmra.mrb[16].mxu1 %v11867_v5  ;;  %8988 = vmatpush3.bf16.msra.mxu0 %v11099_v1  ;;  %v12263_v58 = vpack.c.bf16 %v2925_v23, %v2923_v22  ;;  %v2928_v11 = vsel %vm14769_vm6, %v2926_v38, %v2927_v56  ;;  %vm14771_vm13 = vmmov %vm14764_vm0  ;;  %v2944_v22 = vrot.slane %v12239_v4, 2 }
  0x78   : > { %9240 = vmatpush3.bf16.msra.mxu1 %v11099_v1  ;;  %8989 = vmatprep.subr.bf16.mxu0 %v11100_v9  ;;  %v2932_v1 = vrot.slane %v12119_v44, 2  ;;  %v2930_v41 = vsel %vm14771_vm13, %v2927_v56, %v2929_v14  ;;  %vm14772_vm14 = vmmov %vm14764_vm0  ;;  %v14776_v56 = vld [vmem:[#allocation19_spill] sm:$0xff]  ;;  %v11103_v14 = vld [vmem:[%s14558_s3 + $0xe0] sm:$0xff]  }
  0x79   : > { %9241 = vmatprep.subr.bf16.mxu1 %v11100_v9  ;;  %8979 = vmatprep.mubr.bf16.mxu0 %v14770_v27  ;;  %v12274_v24 = vpack.c.bf16 %v2930_v41, %v2928_v11  ;;  %vm14773_vm3 = vmmov %vm14764_vm0  ;;  %v11104_v11 = vld [vmem:[%s14558_s3 + $0xe8] sm:$0xff]   ;;  %v2054_v41 = vrot.slane %v12213_v33, 1 }
  0x7a   : > { %9231 = vmatprep.mubr.bf16.mxu1 %v11892_v47  ;;  %v2933_v57 = vsel %vm14764_vm0, %v2931_v45, %v2932_v1  ;;  %v2935_v44 = vsel %vm14772_vm14, %v2932_v1, %v2934_v26  ;;  %v2938_v38 = vsel %vm14773_vm3, %v2936_v53, %v2937_v55  ;;  %vm14774_vm9 = vmmov %vm14764_vm0  ;;  %v2053_v26 = vrot.slane %v12210_v35, 1 }
  0x7b   : > { %8990 = vmatpush3.bf16.msra.mxu0 %v11100_v9  ;;  %v12279_v36 = vpack.c.bf16 %v2935_v44, %v2933_v57  ;;  %v2940_v0 = vsel %vm14774_vm9, %v2937_v55, %v2939_v29  ;;  %vm14775_vm6 = vmmov %vm14764_vm0  ;;  %vm14778_vm14 = vcmask 1046528   ;;  %v11106_v57 = vld [vmem:[%s14558_s3 + $0xf8] sm:$0xff]   ;;  %vm505_vm9 = vcmp.eq.s32.totalorder %v12185_v30, 17 }
  0x7c   : > { %9242 = vmatpush3.bf16.msra.mxu1 %v11100_v9  ;;  %8991 = vmatprep.subr.bf16.mxu0 %v11101_v61  ;;  %v12287_v34 = vpack.c.bf16 %v2940_v0, %v2938_v38  ;;  %v2943_v9 = vsel %vm14775_vm6, %v2941_v63, %v2942_v37  ;;  %vm14777_vm13 = vmmov %vm14764_vm0  ;;  %vm465_vm0 = vcmp.eq.s32.totalorder %v12200_v60, 16  ;;  %v2055_v55 = vsel %vm14778_vm14, %v2053_v26, %v2054_v41 }
  0x7d   : > { %9243 = vmatprep.subr.bf16.mxu1 %v11101_v61  ;;  %v2945_v23 = vsel %vm14777_vm13, %v2942_v37, %v2944_v22  ;;  %v12311_v1 = vsel %vm465_vm0, %v12219_v12, 0.0  ;;  %vm14779_vm3 = vmmov %vm14778_vm14  ;;  %vm506_vm6 = vcmp.eq.s32.totalorder %v12191_v54, 17  ;;  %v12330_v63 = vsel %vm505_vm9, %v12197_v32, 0.0  ;;  %v11107_v37 = vld [vmem:[%s14558_s3 + $0x100] sm:$0xff]   ;;  %v11109_v22 = vld [vmem:[%s14558_s3 + $0x110] sm:$0xff]  }
  0x7e   : > { %8980 = vmatmul.mubr.bf16.gmra.mrb[4].mxu0 %v14776_v56  ;;  %v12297_v45 = vpack.c.bf16 %v2945_v23, %v2943_v9  ;;  %v2056_v53 = vrot.slane %v12311_v1, 1  ;;  %v12333_v38 = vsel %vm506_vm6, %v12203_v49, 0.0  ;;  %vm12335_vm13 = vmpackc.low %vm506_vm6, %vm505_vm9  ;;  %v14781_v0 = vmov 0  ;;  %v11110_v23 = vld [vmem:[%s14558_s3 + $0x118] sm:$0xff]  }
  0x7f   : > { %9232 = vmatmul.mubr.bf16.gmra.mrb[4].mxu1 %v11904_v13  ;;  %8992 = vmatpush3.bf16.msra.mxu0 %v11101_v61  ;;  %v14782_v0 = vsel %vm12335_vm13, 4294967295, %v14781_v0  ;;  %v1549_v9 = vrot.slane %v12223_v18, 1  ;;  %v11111_v18 = vld [vmem:[%s14558_s3 + $0x120] sm:$0xff]   ;;  %vm14616_vm0 = vcmp.eq.s32.totalorder %v12185_v30, 1  ;;  %vm14615_vm14 = vcmp.eq.s32.totalorder %v12191_v54, 1  ;;  %vm14784_vm9 = vmmov %vm14779_vm3 }
  0x80   : > { %9244 = vmatpush3.bf16.msra.mxu1 %v11101_v61  ;;  %8993 = vmatprep.subr.bf16.mxu0 %v11102_v16  ;;  %v11105_v61 = vld [vmem:[%s14558_s3 + $0xf0] sm:$0xff]   ;;  %v2057_v29 = vsel %vm14779_vm3, %v2054_v41, %v2056_v53  ;;  %14783 = vst [vmem:[#allocation17_spill] sm:$0xff] %v14782_v0  ;;  %v12382_v26 = vpack.c.bf16 %v12203_v49, %v12197_v32  ;;  %vm12390_vm6 = vmpackc.low %vm14615_vm14, %vm14616_vm0  ;;  %v14785_v53 = vmov 0  ;;  %vm420_vm0 = vcmp.eq.s32.totalorder %v12200_v60, 1 }
  0x81   : > { %9245 = vmatprep.subr.bf16.mxu1 %v11102_v16  ;;  %8983 = vmatprep.mubr.bf16.mxu0 %v11802_v48  ;;  %v12327_v44 = vpack.c.bf16 %v2057_v29, %v2055_v55  ;;  %v14786_v53 = vsel %vm12390_vm6, 4294967295, %v14785_v53  ;;  %v2201_v55 = vrot.slane %v12330_v63, 1  ;;  %v2202_v29 = vrot.slane %v12333_v38, 1  ;;  %vm14787_vm14 = vmmov %vm14784_vm9  ;;  %v823_v0 = vld [vmem:[%s12552_s22 + $0x10] sm:$0xff] }
  0x82   : > { %9235 = vmatprep.mubr.bf16.mxu1 %v11919_v46 }
  0x83   : > { %8994 = vmatpush3.bf16.msra.mxu0 %v11102_v16  ;;  %14780 = vst [vmem:[#allocation15_spill] sm:$0xff] %v12327_v44  ;;  %v2203_v38 = vsel %vm14784_vm9, %v2201_v55, %v2202_v29  ;;  %v11119_v55 = vld [vmem:[%s14558_s3 + $0x160] sm:$0xff]  }
  0x84   : > { %9246 = vmatpush3.bf16.msra.mxu1 %v11102_v16  ;;  %8995 = vmatprep.subr.bf16.mxu0 %v11103_v14  ;;  %v11108_v16 = vld [vmem:[%s14558_s3 + $0x108] sm:$0xff]  }
  0x85   : > { %9247 = vmatprep.subr.bf16.mxu1 %v11103_v14 }
  0x86   : > { %8984 = vmatmul.mubr.bf16.gmra.mrb[8].mxu0 %v11846_v39 }
  0x87   : > { %9236 = vmatmul.mubr.bf16.gmra.mrb[8].mxu1 %v11936_v8  ;;  %8996 = vmatpush3.bf16.msra.mxu0 %v11103_v14 }
  0x88   : > { %9248 = vmatpush3.bf16.msra.mxu1 %v11103_v14  ;;  %8997 = vmatprep.subr.bf16.mxu0 %v11104_v11  ;;  %v1550_v14 = vrot.slane %v12232_v10, 1 }
  0x89   : > { %9249 = vmatprep.subr.bf16.mxu1 %v11104_v11  ;;  %9003 = vmatprep.mubr.msk.bf16.mxu0 %vm11925_vm1, %v11876_v2 }
  0x8a   : > { %9255 = vmatprep.mubr.bf16.mxu1 %v11990_v15  ;;  %v1551_v10 = vsel %vm14779_vm3, %v1549_v9, %v1550_v14  ;;  %vm507_vm3 = vcmp.eq.s32.totalorder %v12200_v60, 17 }
  0x8b   : > { %8998 = vmatpush3.bf16.msra.mxu0 %v11104_v11  ;;  %v528_v63 = vsel %vm507_vm3, %v12219_v12, 0.0  ;;  %vm14788_vm3 = vcmp.eq.s32.totalorder %v12185_v30, 1  ;;  %v11116_v30 = vld [vmem:[%s14558_s3 + $0x148] sm:$0xff]  }
  0x8c   : > { %9250 = vmatpush3.bf16.msra.mxu1 %v11104_v11  ;;  %8999 = vmatprep.subr.bf16.mxu0 %v11105_v61  ;;  %v1552_v11 = vrot.slane %v12239_v4, 1  ;;  %v439_v9 = vsel %vm14788_vm3, %v12197_v32, 0.0 }
  0x8d   : > { %9251 = vmatprep.subr.bf16.mxu1 %v11105_v61  ;;  %v1752_v32 = vrot.slane %v439_v9, 1  ;;  %v11120_v9 = vld [vmem:[%s14558_s3 + $0x168] sm:$0xff]  }
  0x8e   : > { %v1553_v4 = vsel %vm14784_vm9, %v1550_v14, %v1552_v11  ;;  %v11115_v14 = vld [vmem:[%s14558_s3 + $0x140] sm:$0xff]  }
  0x8f   : > { %9000 = vmatpush3.bf16.msra.mxu0 %v11105_v61  ;;  %v12384_v41 = vpack.c.bf16 %v1553_v4, %v1551_v10  ;;  %v14790_v10 = vld [vmem:[#allocation13_spill] sm:$0xff] }
  0x90   : > { %9252 = vmatpush3.bf16.msra.mxu1 %v11105_v61  ;;  %9001 = vmatprep.subr.bf16.mxu0 %v11106_v57  ;;  %v11112_v61 = vld [vmem:[%s14558_s3 + $0x128] sm:$0xff]  }
  0x91   : > { %9253 = vmatprep.subr.bf16.mxu1 %v11106_v57 }
  0x93   : > { %9002 = vmatpush3.bf16.msra.mxu0 %v11106_v57 }
  0x94   : > { %9254 = vmatpush3.bf16.msra.mxu1 %v11106_v57  ;;  %9015 = vmatprep.subr.bf16.mxu0 %v11107_v37  ;;  %v11113_v57 = vld [vmem:[%s14558_s3 + $0x130] sm:$0xff]  }
  0x95   : > { %9267 = vmatprep.subr.bf16.mxu1 %v11107_v37 }
  0x96   : > { %9004 = vmatmul.mubr.msk.bf16.vlgmr.msra.gmra.mrb[20].mxu0 %vm11966_vm10, %v11880_v40 }
  0x97   : > { %9256 = vmatmul.mubr.bf16.vlgmr.msra.gmra.mrb[20].mxu1 %v12040_v6  ;;  %9016 = vmatpush3.bf16.msra.mxu0 %v11107_v37 }
  0x98   : > { %9268 = vmatpush3.bf16.msra.mxu1 %v11107_v37  ;;  %9017 = vmatprep.subr.bf16.mxu0 %v11108_v16  ;;  %v2204_v37 = vrot.slane %v528_v63, 1  ;;  %v3232_v63 = vrot.slane %v12213_v33, 2  ;;  %v11122_v33 = vld [vmem:[%s14558_s3 + $0x178] sm:$0xff]  }
  0x99   : > { %9269 = vmatprep.subr.bf16.mxu1 %v11108_v16  ;;  %9007 = vmatprep.mubr.msk.bf16.mxu0 %vm12025_vm4, %v11887_v3 }
  0x9a   : > { %9259 = vmatprep.mubr.bf16.mxu1 %v12098_v31 }
  0x9b   : > { %9018 = vmatpush3.bf16.msra.mxu0 %v11108_v16 }
  0x9c   : > { %9270 = vmatpush3.bf16.msra.mxu1 %v11108_v16  ;;  %9019 = vmatprep.subr.bf16.mxu0 %v11109_v22  ;;  %v11114_v16 = vld [vmem:[%s14558_s3 + $0x138] sm:$0xff]  }
  0x9d   : > { %9271 = vmatprep.subr.bf16.mxu1 %v11109_v22 }
  0x9e   : > { %9008 = vmatmul.mubr.msk.bf16.gmra.mrb[4].mxu0 %vm12090_vm8, %v11917_v21 }
  0x9f   : > { %9260 = vmatmul.mubr.bf16.gmra.mrb[4].mxu1 %v12152_v28  ;;  %9020 = vmatpush3.bf16.msra.mxu0 %v11109_v22 }
  0xa0   : > { %9272 = vmatpush3.bf16.msra.mxu1 %v11109_v22  ;;  %9021 = vmatprep.subr.bf16.mxu0 %v11110_v23  ;;  %v2205_v22 = vsel %vm14787_vm14, %v2202_v29, %v2204_v37  ;;  %v14793_v29 = vld [vmem:[#allocation14_spill] sm:$0xff]  ;;  %v3234_v37 = vrot.slane %v12311_v1, 2  ;;  %v11123_v1 = vld [vmem:[%s14558_s3 + $0x180] sm:$0xff]  }
  0xa1   : > { %9273 = vmatprep.subr.bf16.mxu1 %v11110_v23  ;;  %9011 = vmatprep.mubr.msk.bf16.mxu0 %vm12148_vm2, %v11934_v7 }
  0xa2   : > { %9263 = vmatprep.mubr.bf16.mxu1 %v12194_v20 }
  0xa3   : > { %9022 = vmatpush3.bf16.msra.mxu0 %v11110_v23 }
  0xa4   : > { %9274 = vmatpush3.bf16.msra.mxu1 %v11110_v23  ;;  %9023 = vmatprep.subr.bf16.mxu0 %v11111_v18  ;;  %v12416_v23 = vpack.c.bf16 %v2205_v22, %v2203_v38 }
  0xa5   : > { %9275 = vmatprep.subr.bf16.mxu1 %v11111_v18 }
  0xa6   : > { %9012 = vmatmul.mubr.msk.bf16.gmra.mrb[8].mxu0 %vm12390_vm6, %v12382_v26  ;;  %vm14789_vm6 = vcmp.eq.s32.totalorder %v12191_v54, 1  ;;  %v11117_v54 = vld [vmem:[%s14558_s3 + $0x150] sm:$0xff]  }
  0xa7   : > { %9264 = vmatmul.mubr.bf16.gmra.mrb[8].mxu1 %v12384_v41  ;;  %9024 = vmatpush3.bf16.msra.mxu0 %v11111_v18  ;;  %v440_v11 = vsel %vm14789_vm6, %v12203_v49, 0.0  ;;  %vm14794_vm6 = vcmask 1045504  }
  0xa8   : > { %9276 = vmatpush3.bf16.msra.mxu1 %v11111_v18  ;;  %9025 = vmatprep.subr.bf16.mxu0 %v11112_v61  ;;  %v441_v18 = vsel %vm420_vm0, %v12219_v12, 0.0  ;;  %v1753_v60 = vrot.slane %v440_v11, 1  ;;  %v11118_v12 = vld [vmem:[%s14558_s3 + $0x158] sm:$0xff]   ;;  %vm14791_vm0 = vmmov %vm14784_vm9  ;;  %v11124_v11 = vld [vmem:[%s14558_s3 + $0x188] sm:$0xff]  }
  0xa9   : > { %9277 = vmatprep.subr.bf16.mxu1 %v11112_v61  ;;  %9031 = vmatprep.mubr.bf16.mxu0 %v11990_v15  ;;  %v1755_v49 = vrot.slane %v441_v18, 1  ;;  %vm14792_vm14 = vmmov %vm14791_vm0  ;;  %v11125_v18 = vld [vmem:[%s14558_s3 + $0x190] sm:$0xff]  }
  0xaa   : > { %9283 = vmatprep.mubr.bf16.mxu1 %v12250_v25  ;;  %v1754_v4 = vsel %vm14791_vm0, %v1752_v32, %v1753_v60  ;;  %vm14795_vm9 = vmmov %vm14794_vm6  ;;  %v11128_v32 = vld [vmem:[%s14558_s3 + $0x1a8] sm:$0xff]  }
  0xab   : > { %9026 = vmatpush3.bf16.msra.mxu0 %v11112_v61  ;;  %v3235_v22 = vsel %vm14795_vm9, %v3232_v63, %v3234_v37  ;;  %v11133_v37 = vld [vmem:[%s14558_s3 + $0x1d0] sm:$0xff]   ;;  %vm14840_vm9 = vmmov %vm14791_vm0 }
  0xac   : > { %9278 = vmatpush3.bf16.msra.mxu1 %v11112_v61  ;;  %9027 = vmatprep.subr.bf16.mxu0 %v11113_v57  ;;  %v1756_v61 = vsel %vm14792_vm14, %v1753_v60, %v1755_v49  ;;  %v11129_v60 = vld [vmem:[%s14558_s3 + $0x1b0] sm:$0xff]   ;;  %vm14837_vm14 = vmmov %vm14791_vm0 }
  0xad   : > { %9279 = vmatprep.subr.bf16.mxu1 %v11113_v57 }
  0xaf   : > { %9028 = vmatpush3.bf16.msra.mxu0 %v11113_v57 }
  0xb0   : > { %9280 = vmatpush3.bf16.msra.mxu1 %v11113_v57  ;;  %9029 = vmatprep.subr.bf16.mxu0 %v11114_v16  ;;  %v3231_v57 = vrot.slane %v12210_v35, 2  ;;  %v11121_v35 = vld [vmem:[%s14558_s3 + $0x170] sm:$0xff]  }
  0xb1   : > { %9281 = vmatprep.subr.bf16.mxu1 %v11114_v16 }
  0xb2   : > { %v3233_v38 = vsel %vm14794_vm6, %v3231_v57, %v3232_v63  ;;  %v14799_v63 = vld [vmem:[#allocation10_spill] sm:$0xff]  ;;  %v11255_v57 = vld [vmem:[%s14558_s3 + $0x110] sm:$0xff]  }
  0xb3   : > { %9030 = vmatpush3.bf16.msra.mxu0 %v11114_v16 }
  0xb4   : > { %9282 = vmatpush3.bf16.msra.mxu1 %v11114_v16  ;;  %9043 = vmatprep.subr.bf16.mxu0 %v11115_v14  ;;  %v12450_v16 = vpack.c.bf16 %v1756_v61, %v1754_v4  ;;  %v11130_v4 = vld [vmem:[%s14558_s3 + $0x1b8] sm:$0xff]   ;;  %v11131_v61 = vld [vmem:[%s14558_s3 + $0x1c0] sm:$0xff]  }
  0xb5   : > { %9295 = vmatprep.subr.bf16.mxu1 %v11115_v14 }
  0xb6   : > { %9032 = vmatmul.mubr.bf16.vlgmr.msra.gmra.mrb[24].mxu0 %v12040_v6 }
  0xb7   : > { %9284 = vmatmul.mubr.bf16.vlgmr.msra.gmra.mrb[24].mxu1 %v12008_v50  ;;  %9044 = vmatpush3.bf16.msra.mxu0 %v11115_v14 }
  0xb8   : > { %9296 = vmatpush3.bf16.msra.mxu1 %v11115_v14  ;;  %9045 = vmatprep.subr.bf16.mxu0 %v11116_v30  ;;  %v12457_v14 = vpack.c.bf16 %v3235_v22, %v3233_v38  ;;  %v14801_v22 = vld [vmem:[#allocation16_spill] sm:$0xff] }
  0xb9   : > { %9297 = vmatprep.subr.bf16.mxu1 %v11116_v30  ;;  %9035 = vmatprep.mubr.bf16.mxu0 %v12098_v31  ;;  %v11256_v38 = vld [vmem:[%s14558_s3 + $0x118] sm:$0xff]  }
  0xba   : > { %9287 = vmatprep.mubr.bf16.mxu1 %v12073_v62 }
  0xbb   : > { %9046 = vmatpush3.bf16.msra.mxu0 %v11116_v30 }
  0xbc   : > { %9298 = vmatpush3.bf16.msra.mxu1 %v11116_v30  ;;  %9047 = vmatprep.subr.bf16.mxu0 %v11117_v54  ;;  %v11126_v30 = vld [vmem:[%s14558_s3 + $0x198] sm:$0xff]  }
  0xbd   : > { %9299 = vmatprep.subr.bf16.mxu1 %v11117_v54 }
  0xbe   : > { %9036 = vmatmul.mubr.bf16.gmra.mrb[4].mxu0 %v12152_v28 }
  0xbf   : > { %9288 = vmatmul.mubr.bf16.gmra.mrb[4].mxu1 %v14790_v10  ;;  %9048 = vmatpush3.bf16.msra.mxu0 %v11117_v54 }
  0xc0   : > { %9300 = vmatpush3.bf16.msra.mxu1 %v11117_v54  ;;  %9049 = vmatprep.subr.bf16.mxu0 %v11118_v12  ;;  %v11127_v54 = vld [vmem:[%s14558_s3 + $0x1a0] sm:$0xff]  }
  0xc1   : > { %9301 = vmatprep.subr.bf16.mxu1 %v11118_v12  ;;  %9039 = vmatprep.mubr.bf16.mxu0 %v12194_v20 }
  0xc2   : > { %9291 = vmatprep.mubr.bf16.mxu1 %v14793_v29 }
  0xc3   : > { %9050 = vmatpush3.bf16.msra.mxu0 %v11118_v12 }
  0xc4   : > { %9302 = vmatpush3.bf16.msra.mxu1 %v11118_v12  ;;  %9051 = vmatprep.subr.bf16.mxu0 %v11119_v55  ;;  %v14797_v12 = vld [vmem:[#allocation6_spill] sm:$0xff] }
  0xc5   : > { %9303 = vmatprep.subr.bf16.mxu1 %v11119_v55 }
  0xc6   : > { %9040 = vmatmul.mubr.bf16.gmra.mrb[8].mxu0 %v12384_v41 }
  0xc7   : > { %9292 = vmatmul.mubr.bf16.gmra.mrb[8].mxu1 %v12450_v16  ;;  %9052 = vmatpush3.bf16.msra.mxu0 %v11119_v55 }
  0xc8   : > { %9304 = vmatpush3.bf16.msra.mxu1 %v11119_v55  ;;  %9053 = vmatprep.subr.bf16.mxu0 %v11120_v9  ;;  %v11132_v55 = vld [vmem:[%s14558_s3 + $0x1c8] sm:$0xff]  }
  0xc9   : > { %9305 = vmatprep.subr.bf16.mxu1 %v11120_v9  ;;  %9059 = vmatprep.mubr.bf16.mxu0 %v12250_v25 }
  0xca   : > { %9311 = vmatprep.mubr.bf16.mxu1 %v12258_v59 }
  0xcb   : > { %9054 = vmatpush3.bf16.msra.mxu0 %v11120_v9 }
  0xcc   : > { %9306 = vmatpush3.bf16.msra.mxu1 %v11120_v9  ;;  %9055 = vmatprep.subr.bf16.mxu0 %v11121_v35  ;;  %v11134_v9 = vld [vmem:[%s14558_s3 + $0x1d8] sm:$0xff]  }
  0xcd   : > { %9307 = vmatprep.subr.bf16.mxu1 %v11121_v35 }
  0xcf   : > { %9056 = vmatpush3.bf16.msra.mxu0 %v11121_v35 }
  0xd0   : > { %9308 = vmatpush3.bf16.msra.mxu1 %v11121_v35  ;;  %9057 = vmatprep.subr.bf16.mxu0 %v11122_v33 }
  0xd1   : > { %9309 = vmatprep.subr.bf16.mxu1 %v11122_v33 }
  0xd3   : > { %9058 = vmatpush3.bf16.msra.mxu0 %v11122_v33 }
  0xd4   : > { %9310 = vmatpush3.bf16.msra.mxu1 %v11122_v33  ;;  %9071 = vmatprep.subr.bf16.mxu0 %v11123_v1  ;;  %v14803_v33 = vld [vmem:[#allocation21_spill] sm:$0xff] }
  0xd5   : > { %9323 = vmatprep.subr.bf16.mxu1 %v11123_v1 }
  0xd6   : > { %9060 = vmatmul.mubr.bf16.vlgmr.msra.gmra.mrb[28].mxu0 %v12008_v50 }
  0xd7   : > { %9312 = vmatmul.mubr.bf16.vlgmr.msra.gmra.mrb[28].mxu1 %v12263_v58  ;;  %9072 = vmatpush3.bf16.msra.mxu0 %v11123_v1 }
  0xd8   : > { %9324 = vmatpush3.bf16.msra.mxu1 %v11123_v1  ;;  %9073 = vmatprep.subr.bf16.mxu0 %v11124_v11  ;;  %v11135_v1 = vld [vmem:[%s14558_s3 + $0x1e0] sm:$0xff]  }
  0xd9   : > { %9325 = vmatprep.subr.bf16.mxu1 %v11124_v11  ;;  %9063 = vmatprep.mubr.bf16.mxu0 %v12073_v62 }
  0xda   : > { %9315 = vmatprep.mubr.bf16.mxu1 %v12274_v24 }
  0xdb   : > { %9074 = vmatpush3.bf16.msra.mxu0 %v11124_v11 }
  0xdc   : > { %9326 = vmatpush3.bf16.msra.mxu1 %v11124_v11  ;;  %9075 = vmatprep.subr.bf16.mxu0 %v11125_v18 }
  0xdd   : > { %9327 = vmatprep.subr.bf16.mxu1 %v11125_v18 }
  0xde   : > { %9064 = vmatmul.mubr.bf16.gmra.mrb[4].mxu0 %v14790_v10 }
  0xdf   : > { %9316 = vmatmul.mubr.bf16.gmra.mrb[4].mxu1 %v12279_v36  ;;  %9076 = vmatpush3.bf16.msra.mxu0 %v11125_v18 }
  0xe0   : > { %9328 = vmatpush3.bf16.msra.mxu1 %v11125_v18  ;;  %9077 = vmatprep.subr.bf16.mxu0 %v11126_v30  ;;  %v14805_v18 = vld [vmem:[#allocation22_spill] sm:$0xff] }
  0xe1   : > { %9329 = vmatprep.subr.bf16.mxu1 %v11126_v30  ;;  %9067 = vmatprep.mubr.bf16.mxu0 %v14793_v29 }
  0xe2   : > { %9319 = vmatprep.mubr.bf16.mxu1 %v12287_v34 }
  0xe3   : > { %9078 = vmatpush3.bf16.msra.mxu0 %v11126_v30 }
  0xe4   : > { %9330 = vmatpush3.bf16.msra.mxu1 %v11126_v30  ;;  %9079 = vmatprep.subr.bf16.mxu0 %v11127_v54  ;;  %v11136_v30 = vld [vmem:[%s14558_s3 + $0x1e8] sm:$0xff]  }
  0xe5   : > { %9331 = vmatprep.subr.bf16.mxu1 %v11127_v54 }
  0xe6   : > { %9068 = vmatmul.mubr.bf16.gmra.mrb[8].mxu0 %v12450_v16 }
  0xe7   : > { %9320 = vmatmul.mubr.bf16.gmra.mrb[8].mxu1 %v12297_v45  ;;  %9080 = vmatpush3.bf16.msra.mxu0 %v11127_v54 }
  0xe8   : > { %9332 = vmatpush3.bf16.msra.mxu1 %v11127_v54  ;;  %9081 = vmatprep.subr.bf16.mxu0 %v11128_v32  ;;  %v11137_v54 = vld [vmem:[%s14558_s3 + $0x1f0] sm:$0xff]  }
  0xe9   : > { %9333 = vmatprep.subr.bf16.mxu1 %v11128_v32  ;;  %9087 = vmatprep.mubr.msk.bf16.mxu0 %vm11952_vm15, %v11876_v2 }
  0xea   : > { %9339 = vmatprep.mubr.bf16.mxu1 %v14797_v12 }
  0xeb   : > { %9082 = vmatpush3.bf16.msra.mxu0 %v11128_v32 }
  0xec   : > { %9334 = vmatpush3.bf16.msra.mxu1 %v11128_v32  ;;  %9083 = vmatprep.subr.bf16.mxu0 %v11129_v60 }
  0xed   : > { %9335 = vmatprep.subr.bf16.mxu1 %v11129_v60 }
  0xef   : > { %9084 = vmatpush3.bf16.msra.mxu0 %v11129_v60 }
  0xf0   : > { %9336 = vmatpush3.bf16.msra.mxu1 %v11129_v60  ;;  %9085 = vmatprep.subr.bf16.mxu0 %v11130_v4 }
  0xf1   : > { %9337 = vmatprep.subr.bf16.mxu1 %v11130_v4 }
  0xf3   : > { %9086 = vmatpush3.bf16.msra.mxu0 %v11130_v4 }
  0xf4   : > { %9338 = vmatpush3.bf16.msra.mxu1 %v11130_v4  ;;  %9099 = vmatprep.subr.bf16.mxu0 %v11131_v61 }
  0xf5   : > { %9351 = vmatprep.subr.bf16.mxu1 %v11131_v61 }
  0xf6   : > { %9088 = vmatmul.mubr.msk.bf16.vlgmr.msra.gmra.mrb[32].mxu0 %vm11986_vm5, %v11880_v40 }
  0xf7   : > { %9340 = vmatmul.mubr.bf16.vlgmr.msra.gmra.mrb[32].mxu1 %v14799_v63  ;;  %9100 = vmatpush3.bf16.msra.mxu0 %v11131_v61 }
  0xf8   : > { %9352 = vmatpush3.bf16.msra.mxu1 %v11131_v61  ;;  %9101 = vmatprep.subr.bf16.mxu0 %v11132_v55 }
  0xf9   : > { %9353 = vmatprep.subr.bf16.mxu1 %v11132_v55  ;;  %9091 = vmatprep.mubr.msk.bf16.mxu0 %vm12036_vm7, %v11887_v3 }
  0xfa   : > { %9343 = vmatprep.mubr.bf16.mxu1 %v14801_v22 }
  0xfb   : > { %9102 = vmatpush3.bf16.msra.mxu0 %v11132_v55 }
  0xfc   : > { %9354 = vmatpush3.bf16.msra.mxu1 %v11132_v55  ;;  %9103 = vmatprep.subr.bf16.mxu0 %v11133_v37  ;;  %v11359_v55 = vmov 0  }
  0xfd   : > { %9355 = vmatprep.subr.bf16.mxu1 %v11133_v37  ;;  %11073 = vset.pattern.permute.xlu0 %v11359_v55 }
  0xfe   : > { %9092 = vmatmul.mubr.msk.bf16.gmra.mrb[4].mxu0 %vm12069_vm12, %v11917_v21  ;;  %11074 = vset.pattern.permute.xlu1 %v11359_v55  ;;  %v824_v55 = vld [vmem:[%s12552_s22 + $0x18] sm:$0xff] }
  0xff   : > { %9344 = vmatmul.mubr.bf16.gmra.mrb[4].mxu1 %v14803_v33  ;;  %9104 = vmatpush3.bf16.msra.mxu0 %v11133_v37 }
 0x100   : > { %9356 = vmatpush3.bf16.msra.mxu1 %v11133_v37  ;;  %9105 = vmatprep.subr.bf16.mxu0 %v11134_v9  ;;  %v821_v37 = vld [vmem:[%s12552_s22] sm:$0xff] }
 0x101   : > { %9357 = vmatprep.subr.bf16.mxu1 %v11134_v9  ;;  %9095 = vmatprep.mubr.msk.bf16.mxu0 %vm12112_vm11, %v11934_v7 }
 0x102   : > { %9347 = vmatprep.mubr.bf16.mxu1 %v14805_v18  ;;  %2374 = vperm.xlu0 %11073, %v821_v37   ;;  %v828_v37 = vld [vmem:[%s12552_s22 + $0x38] sm:$0xff] }
 0x103   : > { %9106 = vmatpush3.bf16.msra.mxu0 %v11134_v9  ;;  %2384 = vperm.xlu1 %11074, %v823_v0   ;;  %v11140_v0 = vld [vmem:[%s14558_s3 + $0x208] sm:$0xff]  }
 0x104   : > { %9358 = vmatpush3.bf16.msra.mxu1 %v11134_v9  ;;  %9107 = vmatprep.subr.bf16.mxu0 %v11135_v1 }
 0x105   : > { %9359 = vmatprep.subr.bf16.mxu1 %v11135_v1 }
 0x106   : > { %9096 = vmatmul.mubr.msk.bf16.gmra.mrb[8].mxu0 %vm12335_vm13, %v12382_v26 }
 0x107   : > { %9348 = vmatmul.mubr.bf16.gmra.mrb[8].mxu1 %v12327_v44  ;;  %9108 = vmatpush3.bf16.msra.mxu0 %v11135_v1 }
 0x108   : > { %9360 = vmatpush3.bf16.msra.mxu1 %v11135_v1  ;;  %9109 = vmatprep.subr.bf16.mxu0 %v11136_v30 }
 0x109   : > { %9361 = vmatprep.subr.bf16.mxu1 %v11136_v30  ;;  %v12554_v32 = vpop.f32.mrb[0].mxu0  ;;  %v12556_v60 = vpop.f32.mrb[0].mxu1  ;;  %9115 = vmatprep.mubr.bf16.mxu0 %v14797_v12 }
 0x10a   : > { %9367 = vmatprep.mubr.bf16.mxu1 %v14765_v17  ;;  %v988_v4 = vpop.f32.mrb[1].mxu0  ;;  %v2476_v61 = vpop.f32.mrb[1].mxu1  ;;  %2389 = vperm.xlu1 %11074, %v824_v55   ;;  %v829_v55 = vld [vmem:[%s12552_s22 + $0x40] sm:$0xff] }
 0x10b   : > { %v12561_v9 = vpop.f32.mrb[2].mxu0  ;;  %9110 = vmatpush3.bf16.msra.mxu0 %v11136_v30  ;;  %v12563_v1 = vpop.f32.mrb[2].mxu1  ;;  %v11138_v4 = vld [vmem:[%s14558_s3 + $0x1f8] sm:$0xff]   ;;  %v822_v61 = vld [vmem:[%s12552_s22 + $0x8] sm:$0xff] }
 0x10c   : > { %9362 = vmatpush3.bf16.msra.mxu1 %v11136_v30  ;;  %v990_v11 = vpop.f32.mrb[3].mxu0  ;;  %v2478_v35 = vpop.f32.mrb[3].mxu1  ;;  %9111 = vmatprep.subr.bf16.mxu0 %v11137_v54  ;;  %v826_v30 = vld [vmem:[%s12552_s22 + $0x28] sm:$0xff] }
 0x10d   : > { %9363 = vmatprep.subr.bf16.mxu1 %v11137_v54  ;;  %v11139_v11 = vld [vmem:[%s14558_s3 + $0x200] sm:$0xff]   ;;  %2379 = vperm.xlu0 %11073, %v822_v61   ;;  %v11142_v61 = vld [vmem:[%s14558_s3 + $0x218] sm:$0xff]  }
 0x10e   : > { %v825_v35 = vld [vmem:[%s12552_s22 + $0x20] sm:$0xff]  ;;  %2399 = vperm.xlu1 %11074, %v826_v30   ;;  %v11144_v30 = vld [vmem:[%s14558_s3 + $0x228] sm:$0xff]  }
 0x10f   : > { %9112 = vmatpush3.bf16.msra.mxu0 %v11137_v54 }
 0x110   : > { %9364 = vmatpush3.bf16.msra.mxu1 %v11137_v54  ;;  %9113 = vmatprep.subr.bf16.mxu0 %v11138_v4  ;;  %v827_v54 = vld [vmem:[%s12552_s22 + $0x30] sm:$0xff] }
 0x111   : > { %9365 = vmatprep.subr.bf16.mxu1 %v11138_v4  ;;  %2394 = vperm.xlu0 %11073, %v825_v35   ;;  %v11143_v35 = vld [vmem:[%s14558_s3 + $0x220] sm:$0xff]  }
 0x112   : > { %2409 = vperm.xlu1 %11074, %v828_v37   ;;  %v11145_v37 = vld [vmem:[%s14558_s3 + $0x230] sm:$0xff]  }
 0x113   : > { %9114 = vmatpush3.bf16.msra.mxu0 %v11138_v4 }
 0x114   : > { %9366 = vmatpush3.bf16.msra.mxu1 %v11138_v4  ;;  %9127 = vmatprep.subr.bf16.mxu0 %v11139_v11  ;;  %v11141_v4 = vld [vmem:[%s14558_s3 + $0x210] sm:$0xff]  }
 0x115   : > { %9379 = vmatprep.subr.bf16.mxu1 %v11139_v11  ;;  %2404 = vperm.xlu0 %11073, %v827_v54   ;;  %v832_v54 = vld [vmem:[%s12552_s22 + $0x58] sm:$0xff] }
 0x116   : > { %9116 = vmatmul.mubr.bf16.vlgmr.msra.gmra.mrb[36].mxu0 %v14799_v63 }
 0x117   : > { %9368 = vmatmul.mubr.bf16.vlgmr.msra.gmra.mrb[36].mxu1 %v14770_v27  ;;  %9128 = vmatpush3.bf16.msra.mxu0 %v11139_v11 }
 0x118   : > { %9380 = vmatpush3.bf16.msra.mxu1 %v11139_v11  ;;  %9129 = vmatprep.subr.bf16.mxu0 %v11140_v0  ;;  %v830_v11 = vld [vmem:[%s12552_s22 + $0x48] sm:$0xff] }
 0x119   : > { %9381 = vmatprep.subr.bf16.mxu1 %v11140_v0  ;;  %9119 = vmatprep.mubr.bf16.mxu0 %v14801_v22 }
 0x11a   : > { %9371 = vmatprep.mubr.bf16.mxu1 %v14776_v56  ;;  %2414 = vperm.xlu0 %11073, %v829_v55  }
 0x11b   : > { %9130 = vmatpush3.bf16.msra.mxu0 %v11140_v0  ;;  %2419 = vperm.xlu1 %11074, %v830_v11  }
 0x11c   : > { %9382 = vmatpush3.bf16.msra.mxu1 %v11140_v0  ;;  %9131 = vmatprep.subr.bf16.mxu0 %v11141_v4  ;;  %v831_v0 = vld [vmem:[%s12552_s22 + $0x50] sm:$0xff] }
 0x11d   : > { %9383 = vmatprep.subr.bf16.mxu1 %v11141_v4 }
 0x11e   : > { %9120 = vmatmul.mubr.bf16.gmra.mrb[4].mxu0 %v14803_v33  ;;  %2424 = vperm.xlu0 %11073, %v831_v0  }
 0x11f   : > { %9372 = vmatmul.mubr.bf16.gmra.mrb[4].mxu1 %v11802_v48  ;;  %9132 = vmatpush3.bf16.msra.mxu0 %v11141_v4 }
 0x120   : > { %9384 = vmatpush3.bf16.msra.mxu1 %v11141_v4  ;;  %9133 = vmatprep.subr.bf16.mxu0 %v11142_v61 }
 0x121   : > { %9385 = vmatprep.subr.bf16.mxu1 %v11142_v61  ;;  %9123 = vmatprep.mubr.bf16.mxu0 %v14805_v18 }
 0x122   : > { %9375 = vmatprep.mubr.bf16.mxu1 %v11846_v39  ;;  %2429 = vperm.xlu1 %11074, %v832_v54  }
 0x123   : > { %9134 = vmatpush3.bf16.msra.mxu0 %v11142_v61 }
 0x124   : > { %9386 = vmatpush3.bf16.msra.mxu1 %v11142_v61  ;;  %9135 = vmatprep.subr.bf16.mxu0 %v11143_v35 }
 0x125   : > { %9387 = vmatprep.subr.bf16.mxu1 %v11143_v35 }
 0x126   : > { %9124 = vmatmul.mubr.bf16.gmra.mrb[8].mxu0 %v12327_v44 }
 0x127   : > { %9376 = vmatmul.mubr.bf16.gmra.mrb[8].mxu1 %v12416_v23  ;;  %9136 = vmatpush3.bf16.msra.mxu0 %v11143_v35 }
 0x128   : > { %9388 = vmatpush3.bf16.msra.mxu1 %v11143_v35  ;;  %9137 = vmatprep.subr.bf16.mxu0 %v11144_v30 }
 0x129   : > { %9389 = vmatprep.subr.bf16.mxu1 %v11144_v30  ;;  %v8949_v4 = vpop.f32.mrb[12].mxu0  ;;  %v9201_v61 = vpop.f32.mrb[12].mxu1  ;;  %9143 = vmatprep.mubr.bf16.mxu0 %v14765_v17 }
 0x12a   : > { %9395 = vmatprep.mubr.bf16.mxu1 %v11867_v5  ;;  %v12613_v55 = vadd.f32 %v8949_v4, %v12554_v32  ;;  %v12616_v11 = vadd.f32 %v9201_v61, %v12556_v60  ;;  %v1115_v35 = vpop.f32.mrb[13].mxu0  ;;  %v2555_v44 = vpop.f32.mrb[13].mxu1  ;;  %v11224_v60 = vld [vmem:[%s14558_s3 + $0x58] sm:$0xff]  }
 0x12b   : > { %v8950_v18 = vpop.f32.mrb[14].mxu0  ;;  %9138 = vmatpush3.bf16.msra.mxu0 %v11144_v30  ;;  %v9202_v33 = vpop.f32.mrb[14].mxu1  ;;  %v11146_v44 = vld [vmem:[%s14558_s3 + $0x238] sm:$0xff]  }
 0x12c   : > { %9390 = vmatpush3.bf16.msra.mxu1 %v11144_v30  ;;  %v12619_v22 = vadd.f32 %v8950_v18, %v12561_v9  ;;  %v12622_v17 = vadd.f32 %v9202_v33, %v12563_v1  ;;  %v1117_v5 = vpop.f32.mrb[15].mxu0  ;;  %v2557_v32 = vpop.f32.mrb[15].mxu1  ;;  %9139 = vmatprep.subr.bf16.mxu0 %v11145_v37  ;;  %v11221_v18 = vld [vmem:[%s14558_s3 + $0x40] sm:$0xff]   ;;  %v11223_v33 = vld [vmem:[%s14558_s3 + $0x50] sm:$0xff]   ;;  %v11226_v1 = vld [vmem:[%s14558_s3 + $0x68] sm:$0xff]  }
 0x12d   : > { %9391 = vmatprep.subr.bf16.mxu1 %v11145_v37  ;;  %v11222_v5 = vld [vmem:[%s14558_s3 + $0x48] sm:$0xff]   ;;  %v11225_v9 = vld [vmem:[%s14558_s3 + $0x60] sm:$0xff]  }
 0x12f   : > { %9140 = vmatpush3.bf16.msra.mxu0 %v11145_v37 }
 0x130   : > { %9392 = vmatpush3.bf16.msra.mxu1 %v11145_v37  ;;  %9141 = vmatprep.subr.bf16.mxu0 %v11146_v44 }
 0x131   : > { %9393 = vmatprep.subr.bf16.mxu1 %v11146_v44 }
 0x133   : > { %9142 = vmatpush3.bf16.msra.mxu0 %v11146_v44 }
 0x134   : > { %9394 = vmatpush3.bf16.msra.mxu1 %v11146_v44  ;;  %9407 = vmatprep.subr.bf16.mxu0 %v11221_v18 }
 0x135   : > { %9659 = vmatprep.subr.bf16.mxu1 %v11221_v18 }
 0x136   : > { %9144 = vmatmul.mubr.bf16.vlgmr.msra.gmra.mrb[40].mxu0 %v14770_v27 }
 0x137   : > { %9396 = vmatmul.mubr.bf16.vlgmr.msra.gmra.mrb[40].mxu1 %v11892_v47  ;;  %9408 = vmatpush3.bf16.msra.mxu0 %v11221_v18 }
 0x138   : > { %9660 = vmatpush3.bf16.msra.mxu1 %v11221_v18  ;;  %9409 = vmatprep.subr.bf16.mxu0 %v11222_v5 }
 0x139   : > { %9661 = vmatprep.subr.bf16.mxu1 %v11222_v5  ;;  %9147 = vmatprep.mubr.bf16.mxu0 %v14776_v56 }
 0x13a   : > { %9399 = vmatprep.mubr.bf16.mxu1 %v11904_v13 }
 0x13b   : > { %9410 = vmatpush3.bf16.msra.mxu0 %v11222_v5 }
 0x13c   : > { %9662 = vmatpush3.bf16.msra.mxu1 %v11222_v5  ;;  %9411 = vmatprep.subr.bf16.mxu0 %v11223_v33 }
 0x13d   : > { %9663 = vmatprep.subr.bf16.mxu1 %v11223_v33 }
 0x13e   : > { %9148 = vmatmul.mubr.bf16.gmra.mrb[4].mxu0 %v11802_v48 }
 0x13f   : > { %9400 = vmatmul.mubr.bf16.gmra.mrb[4].mxu1 %v11919_v46  ;;  %9412 = vmatpush3.bf16.msra.mxu0 %v11223_v33 }
 0x140   : > { %9664 = vmatpush3.bf16.msra.mxu1 %v11223_v33  ;;  %9413 = vmatprep.subr.bf16.mxu0 %v11224_v60 }
 0x141   : > { %9665 = vmatprep.subr.bf16.mxu1 %v11224_v60  ;;  %9151 = vmatprep.mubr.bf16.mxu0 %v11846_v39 }
 0x142   : > { %9403 = vmatprep.mubr.bf16.mxu1 %v11936_v8 }
 0x143   : > { %9414 = vmatpush3.bf16.msra.mxu0 %v11224_v60 }
 0x144   : > { %9666 = vmatpush3.bf16.msra.mxu1 %v11224_v60  ;;  %9415 = vmatprep.subr.bf16.mxu0 %v11225_v9  ;;  %v11231_v60 = vld [vmem:[%s14558_s3 + $0x10] sm:$0xff]  }
 0x145   : > { %9667 = vmatprep.subr.bf16.mxu1 %v11225_v9 }
 0x146   : > { %9152 = vmatmul.mubr.bf16.gmra.mrb[8].mxu0 %v12416_v23 }
 0x147   : > { %9404 = vmatmul.mubr.bf16.gmra.mrb[8].mxu1 %v12457_v14  ;;  %9416 = vmatpush3.bf16.msra.mxu0 %v11225_v9 }
 0x148   : > { %9668 = vmatpush3.bf16.msra.mxu1 %v11225_v9  ;;  %9417 = vmatprep.subr.bf16.mxu0 %v11226_v1  ;;  %v11232_v9 = vld [vmem:[%s14558_s3 + $0x18] sm:$0xff]  }
 0x149   : > { %9669 = vmatprep.subr.bf16.mxu1 %v11226_v1  ;;  %v8977_v30 = vpop.f32.mrb[16].mxu0  ;;  %9423 = vmatprep.mubr.bf16.mxu0 %v11990_v15 }
 0x14a   : > { %v9229_v0 = vpop.f32.mrb[16].mxu1  ;;  %9675 = vmatprep.mubr.bf16.mxu1 %v12250_v25  ;;  %v12658_v54 = vadd.f32 %v8977_v30, %v12613_v55  ;;  %v1308_v4 = vpop.f32.mrb[17].mxu0  ;;  %v11227_v55 = vld [vmem:[%s14558_s3 + $0x70] sm:$0xff]   ;;  %v11234_v30 = vld [vmem:[%s14558_s3 + $0x28] sm:$0xff]  }
 0x14b   : > { %v12661_v37 = vadd.f32 %v9229_v0, %v12616_v11  ;;  %v2683_v61 = vpop.f32.mrb[17].mxu1  ;;  %v8978_v35 = vpop.f32.mrb[18].mxu0  ;;  %9418 = vmatpush3.bf16.msra.mxu0 %v11226_v1  ;;  %v11228_v11 = vld [vmem:[%s14558_s3 + $0x78] sm:$0xff]  }
 0x14c   : > { %v9230_v32 = vpop.f32.mrb[18].mxu1  ;;  %9670 = vmatpush3.bf16.msra.mxu1 %v11226_v1  ;;  %v12664_v44 = vadd.f32 %v8978_v35, %v12619_v22  ;;  %v1310_v5 = vpop.f32.mrb[19].mxu0  ;;  %9419 = vmatprep.subr.bf16.mxu0 %v11227_v55  ;;  %v11230_v22 = vld [vmem:[%s14558_s3 + $0x8] sm:$0xff]   ;;  %v11233_v1 = vld [vmem:[%s14558_s3 + $0x20] sm:$0xff]  }
 0x14d   : > { %v12667_v18 = vadd.f32 %v9230_v32, %v12622_v17  ;;  %v2685_v33 = vpop.f32.mrb[19].mxu1  ;;  %9671 = vmatprep.subr.bf16.mxu1 %v11227_v55  ;;  %v11229_v17 = vld [vmem:[%s14558_s3] sm:$0xff]  }
 0x14f   : > { %9420 = vmatpush3.bf16.msra.mxu0 %v11227_v55 }
 0x150   : > { %9672 = vmatpush3.bf16.msra.mxu1 %v11227_v55  ;;  %9421 = vmatprep.subr.bf16.mxu0 %v11228_v11 }
 0x151   : > { %9673 = vmatprep.subr.bf16.mxu1 %v11228_v11 }
 0x153   : > { %9422 = vmatpush3.bf16.msra.mxu0 %v11228_v11 }
 0x154   : > { %9674 = vmatpush3.bf16.msra.mxu1 %v11228_v11  ;;  %9435 = vmatprep.subr.bf16.mxu0 %v11229_v17 }
 0x155   : > { %9687 = vmatprep.subr.bf16.mxu1 %v11229_v17 }
 0x156   : > { %9424 = vmatmul.mubr.bf16.vlgmr.msra.gmra.mrb[44].mxu0 %v12040_v6 }
 0x157   : > { %9676 = vmatmul.mubr.bf16.vlgmr.msra.gmra.mrb[44].mxu1 %v12008_v50  ;;  %9436 = vmatpush3.bf16.msra.mxu0 %v11229_v17 }
 0x158   : > { %9688 = vmatpush3.bf16.msra.mxu1 %v11229_v17  ;;  %9437 = vmatprep.subr.bf16.mxu0 %v11230_v22 }
 0x159   : > { %9689 = vmatprep.subr.bf16.mxu1 %v11230_v22  ;;  %9427 = vmatprep.mubr.bf16.mxu0 %v12098_v31 }
 0x15a   : > { %9679 = vmatprep.mubr.bf16.mxu1 %v12073_v62 }
 0x15b   : > { %9438 = vmatpush3.bf16.msra.mxu0 %v11230_v22 }
 0x15c   : > { %9690 = vmatpush3.bf16.msra.mxu1 %v11230_v22  ;;  %9439 = vmatprep.subr.bf16.mxu0 %v11231_v60  ;;  %v11239_v22 = vld [vmem:[%s14558_s3 + $0x90] sm:$0xff]  }
 0x15d   : > { %9691 = vmatprep.subr.bf16.mxu1 %v11231_v60 }
 0x15e   : > { %9428 = vmatmul.mubr.bf16.gmra.mrb[48].mxu0 %v12152_v28 }
 0x15f   : > { %9680 = vmatmul.mubr.bf16.gmra.mrb[48].mxu1 %v14790_v10  ;;  %9440 = vmatpush3.bf16.msra.mxu0 %v11231_v60 }
 0x160   : > { %9692 = vmatpush3.bf16.msra.mxu1 %v11231_v60  ;;  %9441 = vmatprep.subr.bf16.mxu0 %v11232_v9  ;;  %v11240_v60 = vld [vmem:[%s14558_s3 + $0x98] sm:$0xff]  }
 0x161   : > { %9693 = vmatprep.subr.bf16.mxu1 %v11232_v9  ;;  %9431 = vmatprep.mubr.bf16.mxu0 %v12194_v20 }
 0x162   : > { %9683 = vmatprep.mubr.bf16.mxu1 %v14793_v29 }
 0x163   : > { %9442 = vmatpush3.bf16.msra.mxu0 %v11232_v9 }
 0x164   : > { %9694 = vmatpush3.bf16.msra.mxu1 %v11232_v9  ;;  %9443 = vmatprep.subr.bf16.mxu0 %v11233_v1  ;;  %v11241_v9 = vld [vmem:[%s14558_s3 + $0xa0] sm:$0xff]  }
 0x165   : > { %9695 = vmatprep.subr.bf16.mxu1 %v11233_v1 }
 0x166   : > { %9432 = vmatmul.mubr.bf16.gmra.mrb[52].mxu0 %v12384_v41 }
 0x167   : > { %9684 = vmatmul.mubr.bf16.gmra.mrb[52].mxu1 %v12450_v16  ;;  %9444 = vmatpush3.bf16.msra.mxu0 %v11233_v1 }
 0x168   : > { %9696 = vmatpush3.bf16.msra.mxu1 %v11233_v1  ;;  %9445 = vmatprep.subr.bf16.mxu0 %v11234_v30  ;;  %v11242_v1 = vld [vmem:[%s14558_s3 + $0xa8] sm:$0xff]  }
 0x169   : > { %9697 = vmatprep.subr.bf16.mxu1 %v11234_v30  ;;  %v9005_v0 = vpop.f32.mrb[20].mxu0  ;;  %9451 = vmatprep.mubr.msk.bf16.mxu0 %vm11925_vm1, %v11876_v2  ;;  %vm14806_vm1 = vnez %v14786_v53  ;;  %v11280_v53 = vld [vmem:[%s14558_s3 + $0x1d8] sm:$0xff]  }
 0x16a   : > { %v9257_v4 = vpop.f32.mrb[20].mxu1  ;;  %9703 = vmatprep.mubr.bf16.mxu1 %v11990_v15  ;;  %v12708_v61 = vadd.f32 %v9005_v0, %v12658_v54  ;;  %v1451_v32 = vpop.f32.mrb[21].mxu0  ;;  %v11235_v54 = vld [vmem:[%s14558_s3 + $0x30] sm:$0xff]  }
 0x16b   : > { %v12711_v35 = vadd.f32 %v9257_v4, %v12661_v37  ;;  %v2772_v5 = vpop.f32.mrb[21].mxu1  ;;  %v9006_v33 = vpop.f32.mrb[22].mxu0  ;;  %9446 = vmatpush3.bf16.msra.mxu0 %v11234_v30  ;;  %v11236_v37 = vld [vmem:[%s14558_s3 + $0x38] sm:$0xff]  }
 0x16c   : > { %v9258_v55 = vpop.f32.mrb[22].mxu1  ;;  %9698 = vmatpush3.bf16.msra.mxu1 %v11234_v30  ;;  %v12714_v11 = vadd.f32 %v9006_v33, %v12664_v44  ;;  %v1453_v17 = vpop.f32.mrb[23].mxu0  ;;  %9447 = vmatprep.subr.bf16.mxu0 %v11235_v54  ;;  %v11237_v44 = vld [vmem:[%s14558_s3 + $0x80] sm:$0xff]  }
 0x16d   : > { %v12717_v51 = vadd.f32 %v9258_v55, %v12667_v18  ;;  %v2774_v15 = vpop.f32.mrb[23].mxu1  ;;  %9699 = vmatprep.subr.bf16.mxu1 %v11235_v54  ;;  %v11238_v18 = vld [vmem:[%s14558_s3 + $0x88] sm:$0xff]  }
 0x16f   : > { %9448 = vmatpush3.bf16.msra.mxu0 %v11235_v54 }
 0x170   : > { %9700 = vmatpush3.bf16.msra.mxu1 %v11235_v54  ;;  %9449 = vmatprep.subr.bf16.mxu0 %v11236_v37 }
 0x171   : > { %9701 = vmatprep.subr.bf16.mxu1 %v11236_v37 }
 0x173   : > { %9450 = vmatpush3.bf16.msra.mxu0 %v11236_v37 }
 0x174   : > { %9702 = vmatpush3.bf16.msra.mxu1 %v11236_v37  ;;  %9463 = vmatprep.subr.bf16.mxu0 %v11237_v44  ;;  %v11247_v37 = vld [vmem:[%s14558_s3 + $0xd0] sm:$0xff]  }
 0x175   : > { %9715 = vmatprep.subr.bf16.mxu1 %v11237_v44 }
 0x176   : > { %9452 = vmatmul.mubr.msk.bf16.vlgmr.msra.gmra.mrb[44].mxu0 %vm11966_vm10, %v11880_v40 }
 0x177   : > { %9704 = vmatmul.mubr.bf16.vlgmr.msra.gmra.mrb[44].mxu1 %v12040_v6  ;;  %9464 = vmatpush3.bf16.msra.mxu0 %v11237_v44 }
 0x178   : > { %9716 = vmatpush3.bf16.msra.mxu1 %v11237_v44  ;;  %9465 = vmatprep.subr.bf16.mxu0 %v11238_v18  ;;  %v11248_v44 = vld [vmem:[%s14558_s3 + $0xd8] sm:$0xff]  }
 0x179   : > { %9717 = vmatprep.subr.bf16.mxu1 %v11238_v18  ;;  %9455 = vmatprep.mubr.msk.bf16.mxu0 %vm12025_vm4, %v11887_v3 }
 0x17a   : > { %9707 = vmatprep.mubr.bf16.mxu1 %v12098_v31 }
 0x17b   : > { %9466 = vmatpush3.bf16.msra.mxu0 %v11238_v18 }
 0x17c   : > { %9718 = vmatpush3.bf16.msra.mxu1 %v11238_v18  ;;  %9467 = vmatprep.subr.bf16.mxu0 %v11239_v22  ;;  %v11249_v18 = vld [vmem:[%s14558_s3 + $0xe0] sm:$0xff]  }
 0x17d   : > { %9719 = vmatprep.subr.bf16.mxu1 %v11239_v22 }
 0x17e   : > { %9456 = vmatmul.mubr.msk.bf16.gmra.mrb[48].mxu0 %vm12090_vm8, %v11917_v21 }
 0x17f   : > { %9708 = vmatmul.mubr.bf16.gmra.mrb[48].mxu1 %v12152_v28  ;;  %9468 = vmatpush3.bf16.msra.mxu0 %v11239_v22 }
 0x180   : > { %9720 = vmatpush3.bf16.msra.mxu1 %v11239_v22  ;;  %9469 = vmatprep.subr.bf16.mxu0 %v11240_v60  ;;  %v11250_v22 = vld [vmem:[%s14558_s3 + $0xe8] sm:$0xff]  }
 0x181   : > { %9721 = vmatprep.subr.bf16.mxu1 %v11240_v60  ;;  %9459 = vmatprep.mubr.msk.bf16.mxu0 %vm12148_vm2, %v11934_v7 }
 0x182   : > { %9711 = vmatprep.mubr.bf16.mxu1 %v12194_v20 }
 0x183   : > { %9470 = vmatpush3.bf16.msra.mxu0 %v11240_v60 }
 0x184   : > { %9722 = vmatpush3.bf16.msra.mxu1 %v11240_v60  ;;  %9471 = vmatprep.subr.bf16.mxu0 %v11241_v9 }
 0x185   : > { %9723 = vmatprep.subr.bf16.mxu1 %v11241_v9 }
 0x186   : > { %9460 = vmatmul.mubr.msk.bf16.gmra.mrb[56].mxu0 %vm14806_vm1, %v12382_v26 }
 0x187   : > { %9712 = vmatmul.mubr.bf16.gmra.mrb[56].mxu1 %v12384_v41  ;;  %9472 = vmatpush3.bf16.msra.mxu0 %v11241_v9 }
 0x188   : > { %9724 = vmatpush3.bf16.msra.mxu1 %v11241_v9  ;;  %9473 = vmatprep.subr.bf16.mxu0 %v11242_v1 }
 0x189   : > { %9725 = vmatprep.subr.bf16.mxu1 %v11242_v1  ;;  %v9033_v30 = vpop.f32.mrb[24].mxu0  ;;  %9479 = vmatprep.mubr.bf16.mxu0 %v12250_v25 }
 0x18a   : > { %v9285_v0 = vpop.f32.mrb[24].mxu1  ;;  %9731 = vmatprep.mubr.bf16.mxu1 %v12258_v59  ;;  %v12766_v4 = vadd.f32 %v9033_v30, %v12708_v61  ;;  %v1654_v5 = vpop.f32.mrb[25].mxu0  ;;  %v11243_v61 = vld [vmem:[%s14558_s3 + $0xb0] sm:$0xff]  }
 0x18b   : > { %v12769_v32 = vadd.f32 %v9285_v0, %v12711_v35  ;;  %v2861_v33 = vpop.f32.mrb[25].mxu1  ;;  %v9034_v55 = vpop.f32.mrb[26].mxu0  ;;  %9474 = vmatpush3.bf16.msra.mxu0 %v11242_v1  ;;  %v11244_v35 = vld [vmem:[%s14558_s3 + $0xb8] sm:$0xff]  }
 0x18c   : > { %v9286_v17 = vpop.f32.mrb[26].mxu1  ;;  %9726 = vmatpush3.bf16.msra.mxu1 %v11242_v1  ;;  %v12772_v15 = vadd.f32 %v9034_v55, %v12714_v11  ;;  %v1656_v25 = vpop.f32.mrb[27].mxu0  ;;  %9475 = vmatprep.subr.bf16.mxu0 %v11243_v61  ;;  %v11245_v11 = vld [vmem:[%s14558_s3 + $0xc0] sm:$0xff]  }
 0x18d   : > { %v12775_v54 = vadd.f32 %v9286_v17, %v12717_v51  ;;  %v2863_v59 = vpop.f32.mrb[27].mxu1  ;;  %9727 = vmatprep.subr.bf16.mxu1 %v11243_v61  ;;  %v11246_v51 = vld [vmem:[%s14558_s3 + $0xc8] sm:$0xff]  }
 0x18e   : > { %v14807_v59 = vld [vmem:[#allocation16_spill] sm:$0xff] }
 0x18f   : > { %9476 = vmatpush3.bf16.msra.mxu0 %v11243_v61 }
 0x190   : > { %9728 = vmatpush3.bf16.msra.mxu1 %v11243_v61  ;;  %9477 = vmatprep.subr.bf16.mxu0 %v11244_v35  ;;  %v12908_v61 = vld [vmem:[%s11482_s21 + $0xb0] sm:$0xff] }
 0x191   : > { %9729 = vmatprep.subr.bf16.mxu1 %v11244_v35  ;;  %vm422_vm3 = vcmp.eq.s32.totalorder %v12908_v61, 1 }
 0x193   : > { %9478 = vmatpush3.bf16.msra.mxu0 %v11244_v35 }
 0x194   : > { %9730 = vmatpush3.bf16.msra.mxu1 %v11244_v35  ;;  %9491 = vmatprep.subr.bf16.mxu0 %v11245_v11  ;;  %v14809_v35 = vld [vmem:[#allocation21_spill] sm:$0xff] }
 0x195   : > { %9743 = vmatprep.subr.bf16.mxu1 %v11245_v11 }
 0x196   : > { %9480 = vmatmul.mubr.bf16.vlgmr.msra.gmra.mrb[44].mxu0 %v12008_v50 }
 0x197   : > { %9732 = vmatmul.mubr.bf16.vlgmr.msra.gmra.mrb[44].mxu1 %v12263_v58  ;;  %9492 = vmatpush3.bf16.msra.mxu0 %v11245_v11 }
 0x198   : > { %9744 = vmatpush3.bf16.msra.mxu1 %v11245_v11  ;;  %9493 = vmatprep.subr.bf16.mxu0 %v11246_v51  ;;  %v12919_v11 = vld [vmem:[%s11480_s8 + $0xb0] sm:$0xff] }
 0x199   : > { %9745 = vmatprep.subr.bf16.mxu1 %v11246_v51  ;;  %9483 = vmatprep.mubr.bf16.mxu0 %v12073_v62 }
 0x19a   : > { %9735 = vmatprep.mubr.bf16.mxu1 %v12274_v24 }
 0x19b   : > { %9494 = vmatpush3.bf16.msra.mxu0 %v11246_v51 }
 0x19c   : > { %9746 = vmatpush3.bf16.msra.mxu1 %v11246_v51  ;;  %9495 = vmatprep.subr.bf16.mxu0 %v11247_v37  ;;  %v14811_v51 = vld [vmem:[#allocation22_spill] sm:$0xff] }
 0x19d   : > { %9747 = vmatprep.subr.bf16.mxu1 %v11247_v37 }
 0x19e   : > { %9484 = vmatmul.mubr.bf16.gmra.mrb[48].mxu0 %v14790_v10 }
 0x19f   : > { %9736 = vmatmul.mubr.bf16.gmra.mrb[48].mxu1 %v12279_v36  ;;  %9496 = vmatpush3.bf16.msra.mxu0 %v11247_v37 }
 0x1a0   : > { %9748 = vmatpush3.bf16.msra.mxu1 %v11247_v37  ;;  %9497 = vmatprep.subr.bf16.mxu0 %v11248_v44  ;;  %v11257_v37 = vld [vmem:[%s14558_s3 + $0x120] sm:$0xff]  }
 0x1a1   : > { %9749 = vmatprep.subr.bf16.mxu1 %v11248_v44  ;;  %9487 = vmatprep.mubr.bf16.mxu0 %v14793_v29 }
 0x1a2   : > { %9739 = vmatprep.mubr.bf16.mxu1 %v12287_v34 }
 0x1a3   : > { %9498 = vmatpush3.bf16.msra.mxu0 %v11248_v44 }
 0x1a4   : > { %9750 = vmatpush3.bf16.msra.mxu1 %v11248_v44  ;;  %9499 = vmatprep.subr.bf16.mxu0 %v11249_v18 }
 0x1a5   : > { %9751 = vmatprep.subr.bf16.mxu1 %v11249_v18 }
 0x1a6   : > { %9488 = vmatmul.mubr.bf16.gmra.mrb[60].mxu0 %v12450_v16 }
 0x1a7   : > { %9740 = vmatmul.mubr.bf16.gmra.mrb[60].mxu1 %v12297_v45  ;;  %9500 = vmatpush3.bf16.msra.mxu0 %v11249_v18 }
 0x1a8   : > { %9752 = vmatpush3.bf16.msra.mxu1 %v11249_v18  ;;  %9501 = vmatprep.subr.bf16.mxu0 %v11250_v22  ;;  %v14813_v18 = vld [vmem:[#allocation15_spill] sm:$0xff] }
 0x1a9   : > { %9753 = vmatprep.subr.bf16.mxu1 %v11250_v22  ;;  %v9061_v60 = vpop.f32.mrb[28].mxu0  ;;  %9507 = vmatprep.mubr.msk.bf16.mxu0 %vm11952_vm15, %v11876_v2 }
 0x1aa   : > { %v9313_v9 = vpop.f32.mrb[28].mxu1  ;;  %9759 = vmatprep.mubr.bf16.mxu1 %v14797_v12  ;;  %v12816_v1 = vadd.f32 %v9061_v60, %v12766_v4  ;;  %v1857_v0 = vpop.f32.mrb[29].mxu0  ;;  %v11251_v4 = vld [vmem:[%s14558_s3 + $0xf0] sm:$0xff]  }
 0x1ab   : > { %v12819_v30 = vadd.f32 %v9313_v9, %v12769_v32  ;;  %v2998_v5 = vpop.f32.mrb[29].mxu1  ;;  %v9062_v33 = vpop.f32.mrb[30].mxu0  ;;  %9502 = vmatpush3.bf16.msra.mxu0 %v11250_v22  ;;  %v11252_v32 = vld [vmem:[%s14558_s3 + $0xf8] sm:$0xff]   ;;  %v14814_v0 = vld [vmem:[#allocation7_spill] sm:$0xff] }
 0x1ac   : > { %v9314_v55 = vpop.f32.mrb[30].mxu1  ;;  %9754 = vmatpush3.bf16.msra.mxu1 %v11250_v22  ;;  %v12822_v17 = vadd.f32 %v9062_v33, %v12772_v15  ;;  %v1859_v2 = vpop.f32.mrb[31].mxu0  ;;  %9503 = vmatprep.subr.bf16.mxu0 %v11251_v4  ;;  %v11253_v15 = vld [vmem:[%s14558_s3 + $0x100] sm:$0xff]   ;;  %v11258_v22 = vld [vmem:[%s14558_s3 + $0x128] sm:$0xff]  }
 0x1ad   : > { %v12825_v49 = vadd.f32 %v9314_v55, %v12775_v54  ;;  %v3000_v25 = vpop.f32.mrb[31].mxu1  ;;  %9755 = vmatprep.subr.bf16.mxu1 %v11251_v4  ;;  %v11254_v54 = vld [vmem:[%s14558_s3 + $0x108] sm:$0xff]  }
 0x1af   : > { %9504 = vmatpush3.bf16.msra.mxu0 %v11251_v4 }
 0x1b0   : > { %9756 = vmatpush3.bf16.msra.mxu1 %v11251_v4  ;;  %9505 = vmatprep.subr.bf16.mxu0 %v11252_v32 }
 0x1b1   : > { %9757 = vmatprep.subr.bf16.mxu1 %v11252_v32 }
 0x1b3   : > { %9506 = vmatpush3.bf16.msra.mxu0 %v11252_v32 }
 0x1b4   : > { %9758 = vmatpush3.bf16.msra.mxu1 %v11252_v32  ;;  %9519 = vmatprep.subr.bf16.mxu0 %v11253_v15 }
 0x1b5   : > { %9771 = vmatprep.subr.bf16.mxu1 %v11253_v15 }
 0x1b6   : > { %9508 = vmatmul.mubr.msk.bf16.vlgmr.msra.gmra.mrb[44].mxu0 %vm11986_vm5, %v11880_v40  ;;  %vm380_vm5 = vcmp.eq.s32.totalorder %v12908_v61, 0 }
 0x1b7   : > { %9760 = vmatmul.mubr.bf16.vlgmr.msra.gmra.mrb[44].mxu1 %v14799_v63  ;;  %9520 = vmatpush3.bf16.msra.mxu0 %v11253_v15 }
 0x1b8   : > { %9772 = vmatpush3.bf16.msra.mxu1 %v11253_v15  ;;  %9521 = vmatprep.subr.bf16.mxu0 %v11254_v54 }
 0x1b9   : > { %9773 = vmatprep.subr.bf16.mxu1 %v11254_v54  ;;  %9511 = vmatprep.mubr.msk.bf16.mxu0 %vm12036_vm7, %v11887_v3 }
 0x1ba   : > { %9763 = vmatprep.mubr.bf16.mxu1 %v14807_v59 }
 0x1bb   : > { %9522 = vmatpush3.bf16.msra.mxu0 %v11254_v54 }
 0x1bc   : > { %9774 = vmatpush3.bf16.msra.mxu1 %v11254_v54  ;;  %9523 = vmatprep.subr.bf16.mxu0 %v11255_v57 }
 0x1bd   : > { %9775 = vmatprep.subr.bf16.mxu1 %v11255_v57 }
 0x1be   : > { %9512 = vmatmul.mubr.msk.bf16.gmra.mrb[48].mxu0 %vm12069_vm12, %v11917_v21  ;;  %vm14815_vm12 = vmmov %vm14794_vm6 }
 0x1bf   : > { %9764 = vmatmul.mubr.bf16.gmra.mrb[48].mxu1 %v14809_v35  ;;  %9524 = vmatpush3.bf16.msra.mxu0 %v11255_v57 }
 0x1c0   : > { %9776 = vmatpush3.bf16.msra.mxu1 %v11255_v57  ;;  %9525 = vmatprep.subr.bf16.mxu0 %v11256_v38  ;;  %v12905_v57 = vld [vmem:[%s11482_s21 + $0xa8] sm:$0xff] }
 0x1c1   : > { %9777 = vmatprep.subr.bf16.mxu1 %v11256_v38  ;;  %9515 = vmatprep.mubr.msk.bf16.mxu0 %vm12112_vm11, %v11934_v7  ;;  %vm379_vm15 = vcmp.eq.s32.totalorder %v12905_v57, 0  ;;  %vm14816_vm11 = vmmov %vm14794_vm6 }
 0x1c2   : > { %9767 = vmatprep.mubr.bf16.mxu1 %v14811_v51 }
 0x1c3   : > { %9526 = vmatpush3.bf16.msra.mxu0 %v11256_v38 }
 0x1c4   : > { %9778 = vmatpush3.bf16.msra.mxu1 %v11256_v38  ;;  %9527 = vmatprep.subr.bf16.mxu0 %v11257_v37  ;;  %v12916_v38 = vld [vmem:[%s11480_s8 + $0xa8] sm:$0xff] }
 0x1c5   : > { %9779 = vmatprep.subr.bf16.mxu1 %v11257_v37  ;;  %v12933_v44 = vsel %vm379_vm15, %v12916_v38, 0.0  ;;  %vm14842_vm15 = vmmov %vm14791_vm0 }
 0x1c6   : > { %9516 = vmatmul.mubr.msk.bf16.gmra.mrb[64].mxu0 %vm12335_vm13, %v12382_v26  ;;  %vm14824_vm13 = vmmov %vm14791_vm0 }
 0x1c7   : > { %9768 = vmatmul.mubr.bf16.gmra.mrb[64].mxu1 %v14813_v18  ;;  %9528 = vmatpush3.bf16.msra.mxu0 %v11257_v37 }
 0x1c8   : > { %9780 = vmatpush3.bf16.msra.mxu1 %v11257_v37  ;;  %9529 = vmatprep.subr.bf16.mxu0 %v11258_v22  ;;  %v11264_v37 = vld [vmem:[%s14558_s3 + $0x158] sm:$0xff]  }
 0x1c9   : > { %9781 = vmatprep.subr.bf16.mxu1 %v11258_v22  ;;  %v9089_v60 = vpop.f32.mrb[32].mxu0  ;;  %9535 = vmatprep.mubr.bf16.mxu0 %v14797_v12 }
 0x1ca   : > { %v9341_v9 = vpop.f32.mrb[32].mxu1  ;;  %9787 = vmatprep.mubr.bf16.mxu1 %v14814_v0  ;;  %v12874_v5 = vadd.f32 %v9089_v60, %v12816_v1  ;;  %v1995_v55 = vpop.f32.mrb[33].mxu0  ;;  %v11259_v1 = vld [vmem:[%s14558_s3 + $0x130] sm:$0xff]   ;;  %v4884_v60 = vrot.slane %v12933_v44, 2 }
 0x1cb   : > { %v12877_v33 = vadd.f32 %v9341_v9, %v12819_v30  ;;  %v3087_v2 = vpop.f32.mrb[33].mxu1  ;;  %v9090_v25 = vpop.f32.mrb[34].mxu0  ;;  %9530 = vmatpush3.bf16.msra.mxu0 %v11258_v22  ;;  %v11260_v30 = vld [vmem:[%s14558_s3 + $0x138] sm:$0xff]  }
 0x1cc   : > { %v9342_v4 = vpop.f32.mrb[34].mxu1  ;;  %9782 = vmatpush3.bf16.msra.mxu1 %v11258_v22  ;;  %v12880_v32 = vadd.f32 %v9090_v25, %v12822_v17  ;;  %v1997_v12 = vpop.f32.mrb[35].mxu0  ;;  %9531 = vmatprep.subr.bf16.mxu0 %v11259_v1  ;;  %v11261_v17 = vld [vmem:[%s14558_s3 + $0x140] sm:$0xff]   ;;  %v12936_v22 = vsel %vm380_vm5, %v12919_v11, 0.0  ;;  %vm14846_vm5 = vmmov %vm14791_vm0 }
 0x1cd   : > { %v12883_v15 = vadd.f32 %v9342_v4, %v12825_v49  ;;  %v3089_v54 = vpop.f32.mrb[35].mxu1  ;;  %9783 = vmatprep.subr.bf16.mxu1 %v11259_v1  ;;  %v11262_v49 = vld [vmem:[%s14558_s3 + $0x148] sm:$0xff]   ;;  %v4885_v9 = vrot.slane %v12936_v22, 2 }
 0x1ce   : > { %v11266_v12 = vld [vmem:[%s14558_s3 + $0x168] sm:$0xff]  }
 0x1cf   : > { %9532 = vmatpush3.bf16.msra.mxu0 %v11259_v1  ;;  %v12950_v25 = vsel %vm14815_vm12, %v4884_v60, %v4885_v9  ;;  %vm14850_vm12 = vmmov %vm14791_vm0 }
 0x1d0   : > { %9784 = vmatpush3.bf16.msra.mxu1 %v11259_v1  ;;  %9533 = vmatprep.subr.bf16.mxu0 %v11260_v30 }
 0x1d1   : > { %9785 = vmatprep.subr.bf16.mxu1 %v11260_v30 }
 0x1d3   : > { %9534 = vmatpush3.bf16.msra.mxu0 %v11260_v30 }
 0x1d4   : > { %9786 = vmatpush3.bf16.msra.mxu1 %v11260_v30  ;;  %9547 = vmatprep.subr.bf16.mxu0 %v11261_v17  ;;  %v14817_v30 = vld [vmem:[#allocation23_spill] sm:$0xff] }
 0x1d5   : > { %9799 = vmatprep.subr.bf16.mxu1 %v11261_v17 }
 0x1d6   : > { %9536 = vmatmul.mubr.bf16.vlgmr.msra.gmra.mrb[44].mxu0 %v14799_v63  ;;  %v11263_v63 = vld [vmem:[%s14558_s3 + $0x150] sm:$0xff]  }
 0x1d7   : > { %9788 = vmatmul.mubr.bf16.vlgmr.msra.gmra.mrb[44].mxu1 %v14770_v27  ;;  %9548 = vmatpush3.bf16.msra.mxu0 %v11261_v17 }
 0x1d8   : > { %9800 = vmatpush3.bf16.msra.mxu1 %v11261_v17  ;;  %9549 = vmatprep.subr.bf16.mxu0 %v11262_v49 }
 0x1d9   : > { %9801 = vmatprep.subr.bf16.mxu1 %v11262_v49  ;;  %9539 = vmatprep.mubr.bf16.mxu0 %v14807_v59  ;;  %v12913_v59 = vld [vmem:[%s11482_s21 + $0xb8] sm:$0x3] }
 0x1da   : > { %9791 = vmatprep.mubr.bf16.mxu1 %v14776_v56  ;;  %vm381_vm7 = vcmp.eq.s32.totalorder %v12913_v59, 0 }
 0x1db   : > { %9550 = vmatpush3.bf16.msra.mxu0 %v11262_v49 }
 0x1dc   : > { %9802 = vmatpush3.bf16.msra.mxu1 %v11262_v49  ;;  %9551 = vmatprep.subr.bf16.mxu0 %v11263_v63 }
 0x1dd   : > { %9803 = vmatprep.subr.bf16.mxu1 %v11263_v63 }
 0x1de   : > { %9540 = vmatmul.mubr.bf16.gmra.mrb[48].mxu0 %v14809_v35  ;;  %v12929_v35 = vld [vmem:[%s11480_s8 + $0xb8] sm:$0x3]  ;;  %s8033_s8 = sshll.u32 (%p11446_p5), %s11341_s26, 2 }
 0x1df   : > { %9792 = vmatmul.mubr.bf16.gmra.mrb[48].mxu1 %v11802_v48  ;;  %9552 = vmatpush3.bf16.msra.mxu0 %v11263_v63  ;;  %v12944_v55 = vsel %vm381_vm7, %v12929_v35, 0.0  ;;  %vm14847_vm7 = vmmov %vm14791_vm0  ;;  %s7577_s12 = sadd.s32 (%p11446_p5), %s8034_s23, %s8033_s8 }
 0x1e0   : > { %9804 = vmatpush3.bf16.msra.mxu1 %v11263_v63  ;;  %9553 = vmatprep.subr.bf16.mxu0 %v11264_v37  ;;  %v4887_v2 = vrot.slane %v12944_v55, 2  ;;  %s8035_s10 = sshll.u32 (%p11446_p5), %s7577_s12, 3 }
 0x1e1   : > { %9805 = vmatprep.subr.bf16.mxu1 %v11264_v37  ;;  %9543 = vmatprep.mubr.bf16.mxu0 %v14811_v51  ;;  %v11265_v51 = vld [vmem:[%s14558_s3 + $0x160] sm:$0xff]   ;;  %s7579_s14 = scalar_lea.vmem (%p11446_p5), %s14562_s7, %s8035_s10 }
 0x1e2   : > { %9795 = vmatprep.mubr.bf16.mxu1 %v11846_v39  ;;  %v12953_v4 = vsel %vm14816_vm11, %v4885_v9, %v4887_v2  ;;  %vm14852_vm11 = vmmov %vm14791_vm0 }
 0x1e3   : > { %9554 = vmatpush3.bf16.msra.mxu0 %v11264_v37 }
 0x1e4   : > { %9806 = vmatpush3.bf16.msra.mxu1 %v11264_v37  ;;  %9555 = vmatprep.subr.bf16.mxu0 %v11265_v51 }
 0x1e5   : > { %9807 = vmatprep.subr.bf16.mxu1 %v11265_v51 }
 0x1e6   : > { %9544 = vmatmul.mubr.bf16.gmra.mrb[68].mxu0 %v14813_v18 }
 0x1e7   : > { %9796 = vmatmul.mubr.bf16.gmra.mrb[68].mxu1 %v12416_v23  ;;  %9556 = vmatpush3.bf16.msra.mxu0 %v11265_v51 }
 0x1e8   : > { %9808 = vmatpush3.bf16.msra.mxu1 %v11265_v51  ;;  %9557 = vmatprep.subr.bf16.mxu0 %v11266_v12 }
 0x1e9   : > { %9809 = vmatprep.subr.bf16.mxu1 %v11266_v12  ;;  %v9117_v18 = vpop.f32.mrb[36].mxu0  ;;  %9563 = vmatprep.mubr.bf16.mxu0 %v14814_v0 }
 0x1ea   : > { %v9369_v1 = vpop.f32.mrb[36].mxu1  ;;  %9815 = vmatprep.mubr.bf16.mxu1 %v14817_v30  ;;  %v12963_v17 = vadd.f32 %v9117_v18, %v12874_v5  ;;  %v2143_v63 = vpop.f32.mrb[37].mxu0  ;;  %v11267_v5 = vld [vmem:[%s14558_s3 + $0x170] sm:$0xff]  }
 0x1eb   : > { %v12966_v49 = vadd.f32 %v9369_v1, %v12877_v33  ;;  %v3176_v37 = vpop.f32.mrb[37].mxu1  ;;  %v9118_v60 = vpop.f32.mrb[38].mxu0  ;;  %9558 = vmatpush3.bf16.msra.mxu0 %v11266_v12  ;;  %v11268_v33 = vld [vmem:[%s14558_s3 + $0x178] sm:$0xff]   ;;  %v13023_v1 = vld [vmem:[%s14559_s4] ss:$0 sm:$0xff] }
 0x1ec   : > { %v9370_v9 = vpop.f32.mrb[38].mxu1  ;;  %9810 = vmatpush3.bf16.msra.mxu1 %v11266_v12  ;;  %v12969_v51 = vadd.f32 %v9118_v60, %v12880_v32  ;;  %v2145_v0 = vpop.f32.mrb[39].mxu0  ;;  %9559 = vmatprep.subr.bf16.mxu0 %v11267_v5  ;;  %v11269_v32 = vld [vmem:[%s14558_s3 + $0x180] sm:$0xff]  }
 0x1ed   : > { %v12972_v2 = vadd.f32 %v9370_v9, %v12883_v15  ;;  %v3178_v30 = vpop.f32.mrb[39].mxu1  ;;  %9811 = vmatprep.subr.bf16.mxu1 %v11267_v5  ;;  %v11270_v15 = vld [vmem:[%s14558_s3 + $0x188] sm:$0xff]   ;;  %v12995_v12 = vpop.permute.xlu1 %2384 }
 0x1ef   : > { %9560 = vmatpush3.bf16.msra.mxu0 %v11267_v5 }
 0x1f0   : > { %9812 = vmatpush3.bf16.msra.mxu1 %v11267_v5  ;;  %9561 = vmatprep.subr.bf16.mxu0 %v11268_v33  ;;  %v3965_v5 = vrot.slane %v12933_v44, 1 }
 0x1f1   : > { %9813 = vmatprep.subr.bf16.mxu1 %v11268_v33  ;;  %v13006_v18 = vpop.permute.xlu1 %2389 }
 0x1f2   : > { %14820 = vst [vmem:[#allocation5_spill] sm:$0xff] %v13006_v18 }
 0x1f3   : > { %9562 = vmatpush3.bf16.msra.mxu0 %v11268_v33 }
 0x1f4   : > { %9814 = vmatpush3.bf16.msra.mxu1 %v11268_v33  ;;  %9575 = vmatprep.subr.bf16.mxu0 %v11269_v32  ;;  %v3966_v33 = vrot.slane %v12936_v22, 1 }
 0x1f5   : > { %9827 = vmatprep.subr.bf16.mxu1 %v11269_v32 }
 0x1f6   : > { %9564 = vmatmul.mubr.bf16.vlgmr.msra.gmra.mrb[44].mxu0 %v14770_v27  ;;  %v11271_v27 = vld [vmem:[%s14558_s3 + $0x190] sm:$0xff]  }
 0x1f7   : > { %9816 = vmatmul.mubr.bf16.vlgmr.msra.gmra.mrb[44].mxu1 %v11892_v47  ;;  %9576 = vmatpush3.bf16.msra.mxu0 %v11269_v32  ;;  %v12993_v47 = vpop.permute.xlu0 %2374 }
 0x1f8   : > { %9828 = vmatpush3.bf16.msra.mxu1 %v11269_v32  ;;  %9577 = vmatprep.subr.bf16.mxu0 %v11270_v15  ;;  %14818 = vst [vmem:[#allocation20_spill] sm:$0xff] %v12993_v47  ;;  %v3968_v32 = vrot.slane %v12944_v55, 1 }
 0x1f9   : > { %9829 = vmatprep.subr.bf16.mxu1 %v11270_v15  ;;  %9567 = vmatprep.mubr.bf16.mxu0 %v14776_v56 }
 0x1fa   : > { %9819 = vmatprep.mubr.bf16.mxu1 %v11904_v13  ;;  %v11272_v13 = vld [vmem:[%s14558_s3 + $0x198] sm:$0xff]  }
 0x1fb   : > { %9578 = vmatpush3.bf16.msra.mxu0 %v11270_v15  ;;  %v13004_v56 = vpop.permute.xlu0 %2379 }
 0x1fc   : > { %9830 = vmatpush3.bf16.msra.mxu1 %v11270_v15  ;;  %9579 = vmatprep.subr.bf16.mxu0 %v11271_v27  ;;  %14819 = vst [vmem:[#allocation18_spill] sm:$0xff] %v13004_v56 }
 0x1fd   : > { %9831 = vmatprep.subr.bf16.mxu1 %v11271_v27 }
 0x1fe   : > { %9568 = vmatmul.mubr.bf16.gmra.mrb[48].mxu0 %v11802_v48  ;;  %v11273_v48 = vld [vmem:[%s14558_s3 + $0x1a0] sm:$0xff]  }
 0x1ff   : > { %9820 = vmatmul.mubr.bf16.gmra.mrb[48].mxu1 %v11919_v46  ;;  %9580 = vmatpush3.bf16.msra.mxu0 %v11271_v27  ;;  %v13016_v46 = vpop.permute.xlu0 %2394 }
 0x200   : > { %9832 = vmatpush3.bf16.msra.mxu1 %v11271_v27  ;;  %9581 = vmatprep.subr.bf16.mxu0 %v11272_v13  ;;  %14821 = vst [vmem:[#allocation12_spill] sm:$0xff] %v13016_v46 }
 0x201   : > { %9833 = vmatprep.subr.bf16.mxu1 %v11272_v13  ;;  %9571 = vmatprep.mubr.bf16.mxu0 %v11846_v39  ;;  %v11274_v39 = vld [vmem:[%s14558_s3 + $0x1a8] sm:$0xff]  }
 0x202   : > { %9823 = vmatprep.mubr.bf16.mxu1 %v11936_v8  ;;  %v13018_v8 = vpop.permute.xlu1 %2399 }
 0x203   : > { %9582 = vmatpush3.bf16.msra.mxu0 %v11272_v13  ;;  %14822 = vst [vmem:[#allocation19_spill] sm:$0xff] %v13018_v8 }
 0x204   : > { %9834 = vmatpush3.bf16.msra.mxu1 %v11272_v13  ;;  %9583 = vmatprep.subr.bf16.mxu0 %v11273_v48  ;;  %v11275_v13 = vld [vmem:[%s14558_s3 + $0x1b0] sm:$0xff]  }
 0x205   : > { %9835 = vmatprep.subr.bf16.mxu1 %v11273_v48 }
 0x206   : > { %9572 = vmatmul.mubr.bf16.gmra.mrb[72].mxu0 %v12416_v23 }
 0x207   : > { %9824 = vmatmul.mubr.bf16.gmra.mrb[72].mxu1 %v12457_v14  ;;  %9584 = vmatpush3.bf16.msra.mxu0 %v11273_v48 }
 0x208   : > { %9836 = vmatpush3.bf16.msra.mxu1 %v11273_v48  ;;  %9585 = vmatprep.subr.bf16.mxu0 %v11274_v39 }
 0x209   : > { %9837 = vmatprep.subr.bf16.mxu1 %v11274_v39  ;;  %v9145_v23 = vpop.f32.mrb[40].mxu0  ;;  %9591 = vmatprep.mubr.msk.bf16.mxu0 %vm11966_vm10, %v11880_v40  ;;  %vm14823_vm10 = vmmov %vm14791_vm0 }
 0x20a   : > { %v9397_v63 = vpop.f32.mrb[40].mxu1  ;;  %9843 = vmatprep.mubr.bf16.mxu1 %v12040_v6  ;;  %v2336_v14 = vadd.f32 %v9145_v23, %v12963_v17  ;;  %v2291_v60 = vpop.f32.mrb[41].mxu0 }
 0x20b   : > { %v3318_v37 = vadd.f32 %v9397_v63, %v12966_v49  ;;  %v3273_v9 = vpop.f32.mrb[41].mxu1  ;;  %v9146_v0 = vpop.f32.mrb[42].mxu0  ;;  %9586 = vmatpush3.bf16.msra.mxu0 %v11274_v39 }
 0x20c   : > { %v9398_v30 = vpop.f32.mrb[42].mxu1  ;;  %9838 = vmatpush3.bf16.msra.mxu1 %v11274_v39  ;;  %v2352_v40 = vadd.f32 %v13023_v1, %v2336_v14  ;;  %v2337_v17 = vadd.f32 %v9146_v0, %v12969_v51  ;;  %v2293_v15 = vpop.f32.mrb[43].mxu0  ;;  %9587 = vmatprep.subr.bf16.mxu0 %v11275_v13  ;;  %v3967_v51 = vsel %vm14823_vm10, %v3965_v5, %v3966_v33  ;;  %v11276_v14 = vld [vmem:[%s14558_s3 + $0x1b8] sm:$0xff]   ;;  %vm14855_vm10 = vmmov %vm14794_vm6 }
 0x20d   : > { %v3328_v42 = vadd.f32 %v13023_v1, %v3318_v37  ;;  %v3319_v49 = vadd.f32 %v9398_v30, %v12972_v2  ;;  %v3275_v27 = vpop.f32.mrb[43].mxu1  ;;  %9839 = vmatprep.subr.bf16.mxu1 %v11275_v13  ;;  %v3969_v2 = vsel %vm14824_vm13, %v3966_v33, %v3968_v32  ;;  %v13054_v37 = vpop.permute.xlu0 %2404  ;;  %vm14857_vm13 = vmmov %vm14794_vm6 }
 0x20e   : > { %v2362_v44 = vmax.f32 %v2352_v40, 0.0  ;;  %v2353_v55 = vadd.f32 %v13023_v1, %v2337_v17  ;;  %14825 = vst [vmem:[#allocation13_spill] sm:$0xff] %v13054_v37  ;;  %v13056_v60 = vpop.permute.xlu1 %2409 }
 0x20f   : > { %v3338_v22 = vmax.f32 %v3328_v42, 0.0  ;;  %v3329_v48 = vadd.f32 %v13023_v1, %v3319_v49  ;;  %9588 = vmatpush3.bf16.msra.mxu0 %v11275_v13  ;;  %14826 = vst [vmem:[#allocation14_spill] sm:$0xff] %v13056_v60  ;;  %v13061_v42 = vpack.c.bf16 %v3969_v2, %v3967_v51 }
 0x210   : > { %9840 = vmatpush3.bf16.msra.mxu1 %v11275_v13  ;;  %v13046_v39 = vmul.f32 %v12995_v12, %v2362_v44  ;;  %v2363_v63 = vmax.f32 %v2353_v55, 0.0  ;;  %9589 = vmatprep.subr.bf16.mxu0 %v11276_v14 }
 0x211   : > { %v13049_v23 = vmul.f32 %v3338_v22, %v12995_v12  ;;  %9841 = vmatprep.subr.bf16.mxu1 %v11276_v14  ;;  %v3339_v9 = vmax.f32 %v3329_v48, 0.0  ;;  %v9149_v0 = vpop.f32.mrb[4].mxu0 }
 0x212   : > { %v9401_v30 = vpop.f32.mrb[4].mxu1  ;;  %v2305_v33 = vpop.f32.mrb[5].mxu0  ;;  %v2356_v49 = vadd.f32 %v9149_v0, %v13023_v1  ;;  %v13069_v55 = vmul.f32 %v13006_v18, %v2363_v63  ;;  %v11277_v0 = vld [vmem:[%s14558_s3 + $0x1c0] sm:$0xff]  }
 0x213   : > { %v3287_v32 = vpop.f32.mrb[5].mxu1  ;;  %v3332_v15 = vadd.f32 %v9401_v30, %v13023_v1  ;;  %v2354_v27 = vadd.f32 %v13023_v1, %v2305_v33  ;;  %v9150_v13 = vpop.f32.mrb[6].mxu0  ;;  %9590 = vmatpush3.bf16.msra.mxu0 %v11276_v14  ;;  %v13077_v30 = vmul.f32 %v3339_v9, %v13006_v18 }
 0x214   : > { %v9402_v44 = vpop.f32.mrb[6].mxu1  ;;  %v3330_v48 = vadd.f32 %v13023_v1, %v3287_v32  ;;  %v2357_v51 = vadd.f32 %v9150_v13, %v13023_v1  ;;  %9842 = vmatpush3.bf16.msra.mxu1 %v11276_v14  ;;  %v2308_v2 = vpop.f32.mrb[7].mxu0  ;;  %9603 = vmatprep.subr.bf16.mxu0 %v11277_v0  ;;  %v2366_v33 = vmax.f32 %v2356_v49, 0.0 }
 0x215   : > { %v3290_v54 = vpop.f32.mrb[7].mxu1  ;;  %v3342_v22 = vmax.f32 %v3332_v15, 0.0  ;;  %v2364_v17 = vmax.f32 %v2354_v27, 0.0  ;;  %9855 = vmatprep.subr.bf16.mxu1 %v11277_v0  ;;  %v3333_v32 = vadd.f32 %v9402_v44, %v13023_v1  ;;  %v2355_v14 = vadd.f32 %v13023_v1, %v2308_v2  ;;  %v13095_v27 = vpop.permute.xlu0 %2414 }
 0x216   : > { %v3340_v63 = vmax.f32 %v3330_v48, 0.0  ;;  %v2367_v5 = vmax.f32 %v2357_v51, 0.0  ;;  %9592 = vmatmul.mubr.msk.bf16.vlgmr.msra.gmra.mrb[44].mxu0 %vm12025_vm4, %v11887_v3  ;;  %v3331_v9 = vadd.f32 %v13023_v1, %v3290_v54  ;;  %v13089_v49 = vmul.f32 %v13054_v37, %v2366_v33  ;;  %v13103_v54 = vpop.permute.xlu1 %2419 }
 0x217   : > { %v13085_v13 = vmul.f32 %v13016_v46, %v2364_v17  ;;  %v13092_v15 = vmul.f32 %v3342_v22, %v13054_v37  ;;  %9844 = vmatmul.mubr.bf16.vlgmr.msra.gmra.mrb[44].mxu1 %v12098_v31  ;;  %v3343_v19 = vmax.f32 %v3333_v32, 0.0  ;;  %v2365_v3 = vmax.f32 %v2355_v14, 0.0  ;;  %9604 = vmatpush3.bf16.msra.mxu0 %v11277_v0  ;;  %14827 = vst [vmem:[#allocation24_spill] sm:$0xff] %v13103_v54 }
 0x218   : > { %v13098_v44 = vmul.f32 %v3340_v63, %v13016_v46  ;;  %v13101_v17 = vmul.f32 %v13056_v60, %v2367_v5  ;;  %9856 = vmatpush3.bf16.msra.mxu1 %v11277_v0  ;;  %vm421_vm4 = vcmp.eq.s32.totalorder %v12905_v57, 1  ;;  %v3341_v2 = vmax.f32 %v3331_v9, 0.0  ;;  %v11278_v5 = vld [vmem:[%s14558_s3 + $0x1c8] sm:$0xff]   ;;  %9595 = vmatprep.mubr.msk.bf16.mxu0 %vm12090_vm8, %v11917_v21  ;;  %vm14828_vm8 = vmmov %vm14791_vm0 }
 0x219   : > { %v9153_v33 = vpop.f32.mrb[8].mxu0  ;;  %9605 = vmatprep.subr.bf16.mxu0 %v11278_v5  ;;  %9857 = vmatprep.subr.bf16.mxu1 %v11278_v5  ;;  %v13122_v9 = vmul.f32 %v13018_v8, %v2365_v3  ;;  %v13128_v22 = vmul.f32 %v3343_v19, %v13056_v60  ;;  %v2425_v47 = vpop.permute.xlu0 %2424  ;;  %v11279_v19 = vld [vmem:[%s14558_s3 + $0x1d0] sm:$0xff]  }
 0x21a   : > { %v9405_v63 = vpop.f32.mrb[8].mxu1  ;;  %v5601_v14 = vrot.slane %v13098_v44, 1  ;;  %v2321_v48 = vpop.f32.mrb[9].mxu0  ;;  %9847 = vmatprep.mubr.bf16.mxu1 %v12152_v28  ;;  %v3351_v51 = vmul.f32 %v3341_v2, %v13018_v8  ;;  %v2360_v21 = vadd.f32 %v9153_v33, %v13023_v1 }
 0x21b   : > { %v3303_v40 = vpop.f32.mrb[9].mxu1  ;;  %v9154_v46 = vpop.f32.mrb[10].mxu0  ;;  %v3336_v52 = vadd.f32 %v9405_v63, %v13023_v1  ;;  %9606 = vmatpush3.bf16.msra.mxu0 %v11278_v5  ;;  %v2358_v32 = vadd.f32 %v13023_v1, %v2321_v48 }
 0x21c   : > { %v9406_v37 = vpop.f32.mrb[10].mxu1  ;;  %9858 = vmatpush3.bf16.msra.mxu1 %v11278_v5  ;;  %v2324_v3 = vpop.f32.mrb[11].mxu0  ;;  %v5602_v2 = vrot.slane %v3351_v51, 1  ;;  %v3334_v8 = vadd.f32 %v13023_v1, %v3303_v40  ;;  %9607 = vmatprep.subr.bf16.mxu0 %v11279_v19  ;;  %v2370_v33 = vmax.f32 %v2360_v21, 0.0  ;;  %v2361_v5 = vadd.f32 %v9154_v46, %v13023_v1 }
 0x21d   : > { %v3306_v18 = vpop.f32.mrb[11].mxu1  ;;  %9859 = vmatprep.subr.bf16.mxu1 %v11279_v19  ;;  %v3346_v63 = vmax.f32 %v3336_v52, 0.0  ;;  %v3337_v56 = vadd.f32 %v9406_v37, %v13023_v1  ;;  %v2368_v40 = vmax.f32 %v2358_v32, 0.0  ;;  %v2359_v0 = vadd.f32 %v13023_v1, %v2324_v3  ;;  %v2430_v60 = vpop.permute.xlu1 %2429 }
 0x21e   : > { %9596 = vmatmul.mubr.msk.bf16.gmra.mrb[48].mxu0 %vm12148_vm2, %v11934_v7  ;;  %v13145_v48 = vsel %vm14828_vm8, %v5601_v14, %v5602_v2  ;;  %v3344_v51 = vmax.f32 %v3334_v8, 0.0  ;;  %v2371_v46 = vmax.f32 %v2361_v5, 0.0  ;;  %v3335_v21 = vadd.f32 %v13023_v1, %v3306_v18  ;;  %vm13171_vm2 = vmpackc.low %vm422_vm3, %vm421_vm4 }
 0x21f   : > { %9848 = vmatmul.mubr.bf16.gmra.mrb[48].mxu1 %v12194_v20  ;;  %9599 = vmatprep.mubr.msk.bf16.mxu0 %vm14806_vm1, %v12382_v26  ;;  %v3347_v37 = vmax.f32 %v3337_v56, 0.0  ;;  %v2440_v43 = vmul.f32 %v2425_v47, %v2370_v33  ;;  %v5475_v7 = vrot.slane %v13122_v9, 1  ;;  %v2369_v32 = vmax.f32 %v2359_v0, 0.0  ;;  %vm14841_vm1 = vmmov %vm14791_vm0 }
 0x220   : > { %9608 = vmatpush3.bf16.msra.mxu0 %v11279_v19  ;;  %9860 = vmatpush3.bf16.msra.mxu1 %v11279_v19  ;;  %v13155_v8 = vmul.f32 %v3344_v51, %v13095_v27  ;;  %v13157_v14 = vmul.f32 %v3346_v63, %v2425_v47  ;;  %v6335_v26 = vrot.slane %v13122_v9, 2  ;;  %v5605_v56 = vrot.slane %v13128_v22, 1  ;;  %vm14861_vm8 = vmmov %vm14794_vm6 }
 0x221   : > { %9609 = vmatprep.subr.bf16.mxu0 %v11280_v53  ;;  %9861 = vmatprep.subr.bf16.mxu1 %v11280_v53  ;;  %v3345_v18 = vmax.f32 %v3335_v21, 0.0  ;;  %v2441_v52 = vmul.f32 %v2430_v60, %v2371_v46  ;;  %v2438_v3 = vmul.f32 %v13095_v27, %v2368_v40  ;;  %v2439_v0 = vmul.f32 %v13103_v54, %v2369_v32  ;;  %v11281_v21 = vld [vmem:[%s14558_s3 + $0x1e0] sm:$0xff]  }
 0x222   : > { %14829 = vst [vmem:[#allocation6_spill] sm:$0xff] %v13155_v8  ;;  %14830 = vst [vmem:[#allocation25_spill] sm:$0xff] %v13157_v14  ;;  %9851 = vmatprep.mubr.bf16.mxu1 %v12384_v41  ;;  %v6947_v47 = vrot.slane %v2440_v43, 1  ;;  %v7496_v2 = vrot.slane %v2440_v43, 2  ;;  %v5607_v22 = vrot.slane %v13155_v8, 1  ;;  %v3357_v63 = vmul.f32 %v3347_v37, %v2430_v60 }
 0x223   : > { %v3355_v9 = vmul.f32 %v3345_v18, %v13103_v54  ;;  %v5481_v5 = vrot.slane %v2439_v0, 1  ;;  %v7008_v40 = vrot.slane %v13157_v14, 1  ;;  %v6948_v51 = vrot.slane %v2441_v52, 1 }
 0x224   : > { %9610 = vmatpush3.bf16.msra.mxu0 %v11280_v53  ;;  %9862 = vmatpush3.bf16.msra.mxu1 %v11280_v53  ;;  %v7497_v46 = vrot.slane %v2441_v52, 2  ;;  %v7009_v32 = vrot.slane %v3357_v63, 1  ;;  %v14833_v18 = vpack.c.bf16 %v12919_v11, %v12916_v38  ;;  %v13190_v60 = vpack.c.bf16 %v13098_v44, %v13049_v23 }
 0x225   : > { %9611 = vmatprep.subr.bf16.mxu0 %v11281_v21  ;;  %9863 = vmatprep.subr.bf16.mxu1 %v11281_v21  ;;  %v5608_v43 = vrot.slane %v3355_v9, 1  ;;  %v14835_v37 = vrot.slane %v13069_v55, 1  ;;  %v14836_v53 = vrot.slane %v13046_v39, 1  ;;  %v5480_v33 = vrot.slane %v2438_v3, 1 }
 0x226   : > { %9600 = vmatmul.mubr.msk.bf16.gmra.mrb[76].mxu0 %vm13171_vm2, %v14833_v18  ;;  %14834 = vst [vmem:[#allocation10_spill] sm:$0xff] %v13190_v60  ;;  %v6949_v9 = vsel %vm14837_vm14, %v6947_v47, %v6948_v51  ;;  %v13199_v63 = vsel %vm14794_vm6, %v7496_v2, %v7497_v46  ;;  %v14839_v19 = vrot.slane %v13085_v13, 1  ;;  %v6341_v14 = vrot.slane %v2439_v0, 2  ;;  %vm14863_vm2 = vmmov %vm14794_vm6 }
 0x227   : > { %v5473_v52 = vsel %vm14791_vm0, %v14836_v53, %v14835_v37  ;;  %14838 = vst [vmem:[#allocation8_spill] sm:$0xff] %v13199_v63  ;;  %9852 = vmatmul.mubr.bf16.gmra.mrb[76].mxu1 %v13061_v42  ;;  %9619 = vmatprep.mubr.bf16.mxu0 %v12040_v6  ;;  %v5609_v60 = vsel %vm14841_vm1, %v5607_v22, %v5608_v43  ;;  %v6340_v47 = vrot.slane %v2438_v3, 2  ;;  %v11282_v6 = vld [vmem:[%s14558_s3 + $0x1e8] sm:$0xff]   ;;  %v14844_v0 = vrot.slane %v13101_v17, 1  ;;  %vm14877_vm14 = vmmov %vm14841_vm1 }
 0x228   : > { %v5476_v18 = vsel %vm14840_vm9, %v14839_v19, %v5475_v7  ;;  %v7010_v54 = vsel %vm14842_vm15, %v7008_v40, %v7009_v32  ;;  %9612 = vmatpush3.bf16.msra.mxu0 %v11281_v21  ;;  %9864 = vmatpush3.bf16.msra.mxu1 %v11281_v21  ;;  %v13217_v7 = vpack.c.bf16 %v13155_v8, %v13092_v15  ;;  %v14845_v22 = vrot.slane %v13089_v49, 1  ;;  %vm14878_vm6 = vmmov %vm14841_vm1  ;;  %v13967_v8 = vld [vmem:[%s14560_s5 + $0x1a8] sm:$0xff]  }
 0x229   : > { %v13208_v37 = vpack.c.bf16 %v5476_v18, %v5473_v52  ;;  %v13210_v2 = vpack.c.bf16 %v7010_v54, %v5609_v60  ;;  %9613 = vmatprep.subr.bf16.mxu0 %v11282_v6  ;;  %9865 = vmatprep.subr.bf16.mxu1 %v11282_v6  ;;  %v5482_v54 = vsel %vm14847_vm7, %v5480_v33, %v5481_v5  ;;  %v14848_v3 = vrot.slane %v13077_v30, 1  ;;  %vm14879_vm9 = vmmov %vm14841_vm1 }
 0x22a   : > { %v5479_v40 = vsel %vm14846_vm5, %v14845_v22, %v14844_v0  ;;  %9871 = vmatprep.mubr.bf16.mxu1 %v12008_v50  ;;  %v14849_v51 = vrot.slane %v13049_v23, 1  ;;  %v14851_v21 = vrot.slane %v13092_v15, 1  ;;  %v14853_v32 = vrot.slane %v13069_v55, 2  ;;  %vm14880_vm15 = vmmov %vm14841_vm1 }
 0x22b   : > { %14843 = vst [vmem:[#allocation16_spill] sm:$0xff] %v13210_v2  ;;  %v14854_v53 = vrot.slane %v13046_v39, 2  ;;  %v13239_v19 = vpack.c.bf16 %v5482_v54, %v5479_v40  ;;  %v14856_v23 = vrot.slane %v13085_v13, 2  ;;  %v14859_v39 = vrot.slane %v13101_v17, 2  ;;  %v11283_v13 = vld [vmem:[%s14558_s3 + $0x1f0] sm:$0xff]   ;;  %vm14882_vm5 = vmmov %vm14841_vm1 }
 0x22c   : > { %v5600_v46 = vsel %vm14850_vm12, %v14849_v51, %v14848_v3  ;;  %v5606_v43 = vsel %vm14852_vm11, %v14851_v21, %v5605_v56  ;;  %9614 = vmatpush3.bf16.msra.mxu0 %v11282_v6  ;;  %9866 = vmatpush3.bf16.msra.mxu1 %v11282_v6  ;;  %v14860_v56 = vrot.slane %v13089_v49, 2  ;;  %v13273_v49 = vpack.c.bf16 %v5479_v40, %v5476_v18  ;;  %v11284_v3 = vld [vmem:[%s14558_s3 + $0x1f8] sm:$0xff]   ;;  %v11286_v40 = vld [vmem:[%s14558_s3 + $0x208] sm:$0xff]   ;;  %vm14883_vm7 = vmmov %vm14841_vm1 }
 0x22d   : > { %v6333_v52 = vsel %vm14855_vm10, %v14854_v53, %v14853_v32  ;;  %v13242_v33 = vpack.c.bf16 %v13145_v48, %v5600_v46  ;;  %v13244_v30 = vpack.c.bf16 %v5609_v60, %v5606_v43  ;;  %v13249_v5 = vsel %vm14857_vm13, %v14856_v23, %v6335_v26  ;;  %9615 = vmatprep.subr.bf16.mxu0 %v11283_v13  ;;  %v11287_v53 = vld [vmem:[%s14558_s3 + $0x210] sm:$0xff]   ;;  %vm14884_vm12 = vmmov %vm14841_vm1 }
 0x22e   : > { %14858 = vst [vmem:[#allocation9_spill] sm:$0xff] %v13249_v5  ;;  %v13252_v55 = vpack.c.bf16 %v13249_v5, %v6333_v52  ;;  %v13259_v0 = vsel %vm14861_vm8, %v14860_v56, %v14859_v39  ;;  %v13262_v60 = vsel %vm14863_vm2, %v6340_v47, %v6341_v14  ;;  %9867 = vmatprep.subr.bf16.mxu1 %v11283_v13  ;;  %vm423_vm0 = vcmp.eq.s32.totalorder %v12913_v59, 1  ;;  %v11288_v52 = vld [vmem:[%s14558_s3 + $0x218] sm:$0xff]   ;;  %v11291_v39 = vld [vmem:[%s14558_s3 + $0x230] sm:$0xff]   ;;  %vm14887_vm11 = vmmov %vm14863_vm2 }
 0x22f   : > { %14862 = vst [vmem:[#allocation21_spill] sm:$0xff] %v13259_v0  ;;  %14864 = vst [vmem:[#allocation11_spill] sm:$0xff] %v13262_v60  ;;  %v13269_v26 = vpack.c.bf16 %v13262_v60, %v13259_v0  ;;  %v13275_v6 = vpack.c.bf16 %v6949_v9, %v5482_v54  ;;  %v13278_v14 = vpack.c.bf16 %v5606_v43, %v13145_v48  ;;  %v11285_v48 = vld [vmem:[%s14558_s3 + $0x200] sm:$0xff]   ;;  %v442_v9 = vsel %vm421_vm4, %v12916_v38, 0.0  ;;  %v13938_v2 = vld [vmem:[%s14560_s5 + $0x190] sm:$0xff]  }
 0x230   : > { %9616 = vmatpush3.bf16.msra.mxu0 %v11283_v13  ;;  %9868 = vmatpush3.bf16.msra.mxu1 %v11283_v13  ;;  %v443_v18 = vsel %vm422_vm3, %v12919_v11, 0.0  ;;  %v444_v54 = vsel %vm423_vm0, %v12929_v35, 0.0  ;;  %v4065_v61 = vrot.slane %v442_v9, 1  ;;  %vm14867_vm4 = vmmov %vm14841_vm1  ;;  %14899 = vst [vmem:[#allocation15_spill] sm:$0xff] %v13938_v2 }
 0x231   : > { %14865 = vst [vmem:[#allocation22_spill] sm:$0xff] %v13275_v6  ;;  %14866 = vst [vmem:[#allocation17_spill] sm:$0xff] %v13278_v14  ;;  %9617 = vmatprep.subr.bf16.mxu0 %v11284_v3  ;;  %9869 = vmatprep.subr.bf16.mxu1 %v11284_v3  ;;  %v4066_v11 = vrot.slane %v443_v18, 1  ;;  %v4068_v32 = vrot.slane %v444_v54, 1  ;;  %v13949_v14 = vld [vmem:[%s14560_s5 + $0x198] sm:$0xff]   ;;  %v13958_v6 = vld [vmem:[%s14560_s5 + $0x1a0] sm:$0xff]  }
 0x232   : > { %vm14868_vm3 = vmmov %vm14841_vm1  ;;  %14900 = vst [vmem:[#allocation7_spill] sm:$0xff] %v13949_v14 }
 0x233   : > { %v4069_v35 = vsel %vm14868_vm3, %v4066_v11, %v4068_v32  ;;  %vm14890_vm10 = vmmov %vm14863_vm2  ;;  %14901 = vst [vmem:[#allocation23_spill] sm:$0xff] %v13958_v6 }
 0x234   : > { %9618 = vmatpush3.bf16.msra.mxu0 %v11284_v3  ;;  %9870 = vmatpush3.bf16.msra.mxu1 %v11284_v3  ;;  %vm14891_vm13 = vmmov %vm14863_vm2 }
 0x235   : > { %9631 = vmatprep.subr.bf16.mxu0 %v11285_v48  ;;  %9883 = vmatprep.subr.bf16.mxu1 %v11285_v48  ;;  %vm14893_vm8 = vmmov %vm14863_vm2 }
 0x236   : > { %vm14895_vm2 = vmmov %vm14841_vm1 }
 0x237   : > { %9620 = vmatmul.mubr.bf16.vlgmr.msra.gmra.mrb[44].mxu0 %v12098_v31  ;;  %9872 = vmatmul.mubr.bf16.vlgmr.msra.gmra.mrb[44].mxu1 %v12073_v62  ;;  %vm14896_vm0 = vmmov %vm14841_vm1 }
 0x238   : > { %9632 = vmatpush3.bf16.msra.mxu0 %v11285_v48  ;;  %9884 = vmatpush3.bf16.msra.mxu1 %v11285_v48 }
 0x239   : > { %9633 = vmatprep.subr.bf16.mxu0 %v11286_v40  ;;  %9885 = vmatprep.subr.bf16.mxu1 %v11286_v40  ;;  %v9433_v59 = vpop.f32.mrb[52].mxu0 }
 0x23a   : > { %v9685_v31 = vpop.f32.mrb[52].mxu1  ;;  %9623 = vmatprep.mubr.bf16.mxu0 %v12152_v28  ;;  %9875 = vmatprep.mubr.bf16.mxu1 %v14790_v10  ;;  %v3424_v57 = vpop.f32.mrb[53].mxu0  ;;  %v4067_v28 = vsel %vm14867_vm4, %v4065_v61, %v4066_v11  ;;  %vm14897_vm4 = vmmov %vm14893_vm8 }
 0x23b   : > { %v4258_v38 = vpop.f32.mrb[53].mxu1  ;;  %v9434_v51 = vpop.f32.mrb[54].mxu0  ;;  %v4072_v23 = vpack.c.bf16 %v4069_v35, %v4067_v28 }
 0x23c   : > { %v9686_v46 = vpop.f32.mrb[54].mxu1  ;;  %9634 = vmatpush3.bf16.msra.mxu0 %v11286_v40  ;;  %9886 = vmatpush3.bf16.msra.mxu1 %v11286_v40  ;;  %v3427_v21 = vpop.f32.mrb[55].mxu0 }
 0x23d   : > { %v4261_v43 = vpop.f32.mrb[55].mxu1  ;;  %9635 = vmatprep.subr.bf16.mxu0 %v11287_v53  ;;  %9887 = vmatprep.subr.bf16.mxu1 %v11287_v53 }
 0x23f   : > { %9624 = vmatmul.mubr.bf16.gmra.mrb[48].mxu0 %v12194_v20  ;;  %9876 = vmatmul.mubr.bf16.gmra.mrb[48].mxu1 %v14793_v29  ;;  %v11289_v20 = vld [vmem:[%s14558_s3 + $0x220] sm:$0xff]  }
 0x240   : > { %9636 = vmatpush3.bf16.msra.mxu0 %v11287_v53  ;;  %9888 = vmatpush3.bf16.msra.mxu1 %v11287_v53 }
 0x241   : > { %9637 = vmatprep.subr.bf16.mxu0 %v11288_v52  ;;  %9889 = vmatprep.subr.bf16.mxu1 %v11288_v52 }
 0x242   : > { %9627 = vmatprep.mubr.bf16.mxu0 %v12384_v41  ;;  %9879 = vmatprep.mubr.bf16.mxu1 %v12450_v16  ;;  %v11290_v41 = vld [vmem:[%s14558_s3 + $0x228] sm:$0xff]  }
 0x244   : > { %9638 = vmatpush3.bf16.msra.mxu0 %v11288_v52  ;;  %9890 = vmatpush3.bf16.msra.mxu1 %v11288_v52 }
 0x245   : > { %9639 = vmatprep.subr.bf16.mxu0 %v11289_v20  ;;  %9891 = vmatprep.subr.bf16.mxu1 %v11289_v20 }
 0x247   : > { %9628 = vmatmul.mubr.bf16.gmra.mrb[80].mxu0 %v13061_v42  ;;  %9880 = vmatmul.mubr.bf16.gmra.mrb[80].mxu1 %v4072_v23  ;;  %v11292_v42 = vld [vmem:[%s14558_s3 + $0x238] sm:$0xff]  }
 0x248   : > { %9640 = vmatpush3.bf16.msra.mxu0 %v11289_v20  ;;  %9892 = vmatpush3.bf16.msra.mxu1 %v11289_v20 }
 0x249   : > { %9641 = vmatprep.subr.bf16.mxu0 %v11290_v41  ;;  %9893 = vmatprep.subr.bf16.mxu1 %v11290_v41 }
 0x24a   : > { %9647 = vmatprep.mubr.bf16.mxu0 %v12008_v50  ;;  %9899 = vmatprep.mubr.bf16.mxu1 %v12263_v58 }
 0x24c   : > { %9642 = vmatpush3.bf16.msra.mxu0 %v11290_v41  ;;  %9894 = vmatpush3.bf16.msra.mxu1 %v11290_v41  ;;  %v11147_v41 = vld [vmem:[%s14560_s5 + $0x40] sm:$0xff]  }
 0x24d   : > { %9643 = vmatprep.subr.bf16.mxu0 %v11291_v39  ;;  %9895 = vmatprep.subr.bf16.mxu1 %v11291_v39 }
 0x250   : > { %9644 = vmatpush3.bf16.msra.mxu0 %v11291_v39  ;;  %9896 = vmatpush3.bf16.msra.mxu1 %v11291_v39  ;;  %v11148_v39 = vld [vmem:[%s14560_s5 + $0x48] sm:$0xff]  }
 0x251   : > { %9645 = vmatprep.subr.bf16.mxu0 %v11292_v42  ;;  %9897 = vmatprep.subr.bf16.mxu1 %v11292_v42 }
 0x254   : > { %9646 = vmatpush3.bf16.msra.mxu0 %v11292_v42  ;;  %9898 = vmatpush3.bf16.msra.mxu1 %v11292_v42  ;;  %v11149_v42 = vld [vmem:[%s14560_s5 + $0x50] sm:$0xff]  }
 0x255   : > { %9911 = vmatprep.subr.bf16.mxu0 %v11147_v41  ;;  %10091 = vmatprep.subr.bf16.mxu1 %v11147_v41 }
 0x257   : > { %9648 = vmatmul.mubr.bf16.vlgmr.msra.gmra.mrb[44].mxu0 %v12073_v62  ;;  %9900 = vmatmul.mubr.bf16.vlgmr.msra.gmra.mrb[44].mxu1 %v12274_v24  ;;  %v14869_v62 = vpack.c.bf16 %v12953_v4, %v12950_v25 }
 0x258   : > { %9651 = vmatprep.mubr.bf16.mxu0 %v14790_v10  ;;  %9903 = vmatprep.mubr.bf16.mxu1 %v12279_v36 }
 0x259   : > { %v9461_v50 = vpop.f32.mrb[56].mxu0  ;;  %9912 = vmatpush3.bf16.msra.mxu0 %v11147_v41  ;;  %10092 = vmatpush3.bf16.msra.mxu1 %v11147_v41 }
 0x25a   : > { %v9713_v58 = vpop.f32.mrb[56].mxu1  ;;  %v3503_v56 = vpop.f32.mrb[57].mxu0  ;;  %9913 = vmatprep.subr.bf16.mxu0 %v11148_v39  ;;  %10093 = vmatprep.subr.bf16.mxu1 %v11148_v39  ;;  %v11150_v50 = vld [vmem:[%s14560_s5 + $0x58] sm:$0xff]  }
 0x25b   : > { %v4337_v13 = vpop.f32.mrb[57].mxu1  ;;  %v3504_v3 = vadd.f32 %v3503_v56, %v3424_v57  ;;  %v9462_v9 = vpop.f32.mrb[58].mxu0  ;;  %v11151_v58 = vld [vmem:[%s14560_s5 + $0x60] sm:$0xff]   ;;  %v11152_v56 = vld [vmem:[%s14560_s5 + $0x68] sm:$0xff]  }
 0x25c   : > { %v4338_v48 = vadd.f32 %v4337_v13, %v4258_v38  ;;  %v9714_v18 = vpop.f32.mrb[58].mxu1  ;;  %v3506_v40 = vpop.f32.mrb[59].mxu0 }
 0x25d   : > { %v4340_v59 = vpop.f32.mrb[59].mxu1  ;;  %v3507_v31 = vadd.f32 %v3506_v40, %v3427_v21  ;;  %9914 = vmatpush3.bf16.msra.mxu0 %v11148_v39  ;;  %10094 = vmatpush3.bf16.msra.mxu1 %v11148_v39 }
 0x25e   : > { %v4341_v54 = vadd.f32 %v4340_v59, %v4261_v43  ;;  %9915 = vmatprep.subr.bf16.mxu0 %v11149_v42  ;;  %10095 = vmatprep.subr.bf16.mxu1 %v11149_v42 }
 0x25f   : > { %9652 = vmatmul.mubr.bf16.gmra.mrb[48].mxu0 %v14793_v29  ;;  %9904 = vmatmul.mubr.bf16.gmra.mrb[48].mxu1 %v12287_v34 }
 0x260   : > { %9655 = vmatprep.mubr.bf16.mxu0 %v12450_v16  ;;  %9907 = vmatprep.mubr.bf16.mxu1 %v12297_v45 }
 0x261   : > { %9916 = vmatpush3.bf16.msra.mxu0 %v11149_v42  ;;  %10096 = vmatpush3.bf16.msra.mxu1 %v11149_v42 }
 0x262   : > { %9917 = vmatprep.subr.bf16.mxu0 %v11150_v50  ;;  %10097 = vmatprep.subr.bf16.mxu1 %v11150_v50 }
 0x265   : > { %9918 = vmatpush3.bf16.msra.mxu0 %v11150_v50  ;;  %10098 = vmatpush3.bf16.msra.mxu1 %v11150_v50 }
 0x266   : > { %9919 = vmatprep.subr.bf16.mxu0 %v11151_v58  ;;  %10099 = vmatprep.subr.bf16.mxu1 %v11151_v58 }
 0x267   : > { %9656 = vmatmul.mubr.bf16.gmra.mrb[84].mxu0 %v4072_v23  ;;  %9908 = vmatmul.mubr.bf16.gmra.mrb[84].mxu1 %v14869_v62 }
 0x269   : > { %9920 = vmatpush3.bf16.msra.mxu0 %v11151_v58  ;;  %10100 = vmatpush3.bf16.msra.mxu1 %v11151_v58 }
 0x26a   : > { %9921 = vmatprep.subr.bf16.mxu0 %v11152_v56  ;;  %10101 = vmatprep.subr.bf16.mxu1 %v11152_v56 }
 0x26d   : > { %9922 = vmatpush3.bf16.msra.mxu0 %v11152_v56  ;;  %10102 = vmatpush3.bf16.msra.mxu1 %v11152_v56 }
 0x279   : > { %v9489_v24 = vpop.f32.mrb[60].mxu0 }
 0x27a   : > { %v9741_v36 = vpop.f32.mrb[60].mxu1  ;;  %v3582_v10 = vpop.f32.mrb[61].mxu0 }
 0x27b   : > { %v4416_v57 = vpop.f32.mrb[61].mxu1  ;;  %v3603_v38 = vadd.f32 %v3582_v10, %v3504_v3  ;;  %v9490_v46 = vpop.f32.mrb[62].mxu0 }
 0x27c   : > { %v4437_v51 = vadd.f32 %v4416_v57, %v4338_v48  ;;  %v9742_v61 = vpop.f32.mrb[62].mxu1  ;;  %v3585_v29 = vpop.f32.mrb[63].mxu0  ;;  %v11153_v48 = vld [vmem:[%s14560_s5 + $0x70] sm:$0xff]   ;;  %v11154_v57 = vld [vmem:[%s14560_s5 + $0x78] sm:$0xff]  }
 0x27d   : > { %v4419_v11 = vpop.f32.mrb[63].mxu1  ;;  %v3604_v34 = vadd.f32 %v3585_v29, %v3507_v31  ;;  %9923 = vmatprep.subr.bf16.mxu0 %v11153_v48  ;;  %10103 = vmatprep.subr.bf16.mxu1 %v11153_v48 }
 0x27e   : > { %v4438_v21 = vadd.f32 %v4419_v11, %v4341_v54  ;;  %9924 = vmatpush3.bf16.msra.mxu0 %v11153_v48  ;;  %10104 = vmatpush3.bf16.msra.mxu1 %v11153_v48 }
 0x27f   : > { %9925 = vmatprep.subr.bf16.mxu0 %v11154_v57  ;;  %10105 = vmatprep.subr.bf16.mxu1 %v11154_v57 }
 0x282   : > { %9926 = vmatpush3.bf16.msra.mxu0 %v11154_v57  ;;  %10106 = vmatpush3.bf16.msra.mxu1 %v11154_v57 }
 0x299   : > { %v9517_v16 = vpop.f32.mrb[64].mxu0 }
 0x29a   : > { %v9769_v43 = vpop.f32.mrb[64].mxu1  ;;  %v3671_v45 = vpop.f32.mrb[65].mxu0 }
 0x29b   : > { %v4505_v32 = vpop.f32.mrb[65].mxu1  ;;  %v3692_v53 = vadd.f32 %v3671_v45, %v3603_v38  ;;  %v9518_v25 = vpop.f32.mrb[66].mxu0  ;;  %v13370_v38 = vld [vmem:[%s14560_s5] sm:$0xff]  }
 0x29c   : > { %v4526_v28 = vadd.f32 %v4505_v32, %v4437_v51  ;;  %v9770_v4 = vpop.f32.mrb[66].mxu1  ;;  %v3674_v35 = vpop.f32.mrb[67].mxu0  ;;  %9931 = vmatprep.subr.bf16.mxu0 %v13370_v38  ;;  %10111 = vmatprep.subr.bf16.mxu1 %v13370_v38 }
 0x29d   : > { %v4508_v52 = vpop.f32.mrb[67].mxu1  ;;  %v3693_v23 = vadd.f32 %v3674_v35, %v3604_v34 }
 0x29e   : > { %v4527_v20 = vadd.f32 %v4508_v52, %v4438_v21 }
 0x2b9   : > { %v9545_v13 = vpop.f32.mrb[68].mxu0 }
 0x2ba   : > { %v9797_v3 = vpop.f32.mrb[68].mxu1  ;;  %v3760_v9 = vpop.f32.mrb[69].mxu0 }
 0x2bb   : > { %v4594_v18 = vpop.f32.mrb[69].mxu1  ;;  %v3781_v40 = vadd.f32 %v3760_v9, %v3692_v53  ;;  %v9546_v31 = vpop.f32.mrb[70].mxu0 }
 0x2bc   : > { %v4615_v59 = vadd.f32 %v4594_v18, %v4526_v28  ;;  %v9798_v54 = vpop.f32.mrb[70].mxu1  ;;  %v3763_v62 = vpop.f32.mrb[71].mxu0 }
 0x2bd   : > { %v4597_v24 = vpop.f32.mrb[71].mxu1  ;;  %v3782_v36 = vadd.f32 %v3763_v62, %v3693_v23 }
 0x2be   : > { %v4616_v10 = vadd.f32 %v4597_v24, %v4527_v20 }
 0x2d9   : > { %v9573_v51 = vpop.f32.mrb[72].mxu0 }
 0x2da   : > { %v9825_v46 = vpop.f32.mrb[72].mxu1  ;;  %v3849_v61 = vpop.f32.mrb[73].mxu0 }
 0x2db   : > { %v4683_v29 = vpop.f32.mrb[73].mxu1  ;;  %v3870_v11 = vadd.f32 %v3849_v61, %v3781_v40  ;;  %v9574_v21 = vpop.f32.mrb[74].mxu0 }
 0x2dc   : > { %v4704_v34 = vadd.f32 %v4683_v29, %v4615_v59  ;;  %v9826_v16 = vpop.f32.mrb[74].mxu1  ;;  %v3852_v43 = vpop.f32.mrb[75].mxu0 }
 0x2dd   : > { %v4686_v45 = vpop.f32.mrb[75].mxu1  ;;  %v3871_v32 = vadd.f32 %v3852_v43, %v3782_v36 }
 0x2de   : > { %v4705_v53 = vadd.f32 %v4686_v45, %v4616_v10 }
 0x2f9   : > { %v9601_v28 = vpop.f32.mrb[76].mxu0 }
 0x2fa   : > { %v9853_v25 = vpop.f32.mrb[76].mxu1  ;;  %v3939_v4 = vpop.f32.mrb[77].mxu0 }
 0x2fb   : > { %v3960_v35 = vadd.f32 %v3939_v4, %v3870_v11  ;;  %v4772_v52 = vpop.f32.mrb[77].mxu1  ;;  %v9602_v23 = vpop.f32.mrb[78].mxu0 }
 0x2fc   : > { %v4793_v20 = vadd.f32 %v4772_v52, %v4704_v34  ;;  %v9854_v41 = vpop.f32.mrb[78].mxu1  ;;  %v3942_v39 = vpop.f32.mrb[79].mxu0 }
 0x2fd   : > { %v3961_v42 = vadd.f32 %v3942_v39, %v3871_v32  ;;  %v4775_v50 = vpop.f32.mrb[79].mxu1 }
 0x2fe   : > { %v4794_v58 = vadd.f32 %v4775_v50, %v4705_v53 }
 0x31a   : > { %v9629_v56 = vpop.f32.mrb[80].mxu0  ;;  %v9881_v13 = vpop.f32.mrb[80].mxu1 }
 0x31b   : > { %v4039_v3 = vpop.f32.mrb[81].mxu0  ;;  %v4861_v48 = vpop.f32.mrb[81].mxu1 }
 0x31c   : > { %v13374_v9 = vadd.f32 %v4039_v3, %v3960_v35  ;;  %v13376_v18 = vadd.f32 %v4861_v48, %v4793_v20  ;;  %v9630_v40 = vpop.f32.mrb[82].mxu0  ;;  %v9882_v59 = vpop.f32.mrb[82].mxu1 }
 0x31d   : > { %v4042_v31 = vpop.f32.mrb[83].mxu0  ;;  %v4864_v54 = vpop.f32.mrb[83].mxu1  ;;  %v14871_v40 = vld [vmem:[#allocation5_spill] sm:$0xff] }
 0x31e   : > { %v13378_v62 = vadd.f32 %v4042_v31, %v3961_v42  ;;  %v13380_v24 = vadd.f32 %v4864_v54, %v4794_v58  ;;  %v14870_v42 = vld [vmem:[#allocation20_spill] sm:$0xff] }
 0x31f   : > { %14902 = vst [vmem:[#allocation20_spill] sm:$0xff] %v13967_v8 }
 0x32a   : > { %v9649_v36 = vpop.f32.mrb[44].mxu0  ;;  %v9901_v10 = vpop.f32.mrb[44].mxu1 }
 0x32b   : > { %v4164_v57 = vadd.f32 %v9649_v36, %v13023_v1  ;;  %v4983_v51 = vadd.f32 %v9901_v10, %v13023_v1  ;;  %v4107_v46 = vpop.f32.mrb[45].mxu0  ;;  %v4926_v61 = vpop.f32.mrb[45].mxu1 }
 0x32c   : > { %v4162_v29 = vadd.f32 %v13023_v1, %v4107_v46  ;;  %v4981_v11 = vadd.f32 %v13023_v1, %v4926_v61  ;;  %v9650_v34 = vpop.f32.mrb[46].mxu0  ;;  %v9902_v21 = vpop.f32.mrb[46].mxu1 }
 0x32d   : > { %v4174_v16 = vmax.f32 %v4164_v57, 0.0  ;;  %v4993_v43 = vmax.f32 %v4983_v51, 0.0  ;;  %v4165_v45 = vadd.f32 %v9650_v34, %v13023_v1  ;;  %v4984_v32 = vadd.f32 %v9902_v21, %v13023_v1  ;;  %v4110_v53 = vpop.f32.mrb[47].mxu0  ;;  %v4929_v28 = vpop.f32.mrb[47].mxu1 }
 0x32e   : > { %v4172_v25 = vmax.f32 %v4162_v29, 0.0  ;;  %v4991_v4 = vmax.f32 %v4981_v11, 0.0  ;;  %v4163_v35 = vadd.f32 %v13023_v1, %v4110_v53  ;;  %v4982_v52 = vadd.f32 %v13023_v1, %v4929_v28  ;;  %v14872_v29 = vld [vmem:[#allocation18_spill] sm:$0xff] }
 0x32f   : > { %v13391_v23 = vmul.f32 %v4174_v16, %v12995_v12  ;;  %v13394_v20 = vmul.f32 %v4993_v43, %v12995_v12  ;;  %v4175_v41 = vmax.f32 %v4165_v45, 0.0  ;;  %v4994_v39 = vmax.f32 %v4984_v32, 0.0 }
 0x330   : > { %v13397_v50 = vmul.f32 %v4172_v25, %v14870_v42  ;;  %v13400_v58 = vmul.f32 %v4991_v4, %v14870_v42  ;;  %v4173_v56 = vmax.f32 %v4163_v35, 0.0  ;;  %v4992_v13 = vmax.f32 %v4982_v52, 0.0 }
 0x331   : > { %v5024_v3 = vrot.slane %v13391_v23, 1  ;;  %v13405_v59 = vmul.f32 %v4175_v41, %v14871_v40  ;;  %v13411_v36 = vmul.f32 %v4994_v39, %v14871_v40 }
 0x332   : > { %v5021_v31 = vrot.slane %v13397_v50, 1  ;;  %v9653_v10 = vpop.f32.mrb[48].mxu0  ;;  %v9905_v57 = vpop.f32.mrb[48].mxu1  ;;  %v5241_v51 = vrot.slane %v13400_v58, 1  ;;  %v13417_v11 = vmul.f32 %v4173_v56, %v14872_v29  ;;  %v5002_v16 = vmul.f32 %v4992_v13, %v14872_v29 }
 0x333   : > { %v5025_v46 = vrot.slane %v13405_v59, 1  ;;  %v4123_v34 = vpop.f32.mrb[49].mxu0  ;;  %v4942_v21 = vpop.f32.mrb[49].mxu1  ;;  %v4168_v43 = vadd.f32 %v9653_v10, %v13023_v1  ;;  %v4987_v45 = vadd.f32 %v9905_v57, %v13023_v1  ;;  %v5245_v25 = vrot.slane %v13411_v36, 1 }
 0x334   : > { %v4166_v32 = vadd.f32 %v13023_v1, %v4123_v34  ;;  %v9654_v53 = vpop.f32.mrb[50].mxu0  ;;  %v9906_v28 = vpop.f32.mrb[50].mxu1  ;;  %v5022_v4 = vrot.slane %v13417_v11, 1  ;;  %v4985_v52 = vadd.f32 %v13023_v1, %v4942_v21  ;;  %v14873_v34 = vld [vmem:[#allocation13_spill] sm:$0xff]  ;;  %v14874_v21 = vld [vmem:[#allocation12_spill] sm:$0xff] }
 0x335   : > { %v4126_v41 = vpop.f32.mrb[51].mxu0  ;;  %v4945_v39 = vpop.f32.mrb[51].mxu1  ;;  %v4178_v42 = vmax.f32 %v4168_v43, 0.0  ;;  %v4997_v56 = vmax.f32 %v4987_v45, 0.0  ;;  %v4169_v40 = vadd.f32 %v9654_v53, %v13023_v1  ;;  %v4988_v57 = vadd.f32 %v9906_v28, %v13023_v1 }
 0x336   : > { %v4176_v13 = vmax.f32 %v4166_v32, 0.0  ;;  %v4995_v10 = vmax.f32 %v4985_v52, 0.0  ;;  %v4167_v29 = vadd.f32 %v13023_v1, %v4126_v41  ;;  %v4986_v36 = vadd.f32 %v13023_v1, %v4945_v39 }
 0x337   : > { %v13432_v22 = vmul.f32 %v4178_v42, %v14873_v34  ;;  %v13435_v47 = vmul.f32 %v4997_v56, %v14873_v34  ;;  %v4179_v43 = vmax.f32 %v4169_v40, 0.0  ;;  %v4998_v32 = vmax.f32 %v4988_v57, 0.0  ;;  %v14875_v40 = vld [vmem:[#allocation14_spill] sm:$0xff] }
 0x338   : > { %v13438_v17 = vmul.f32 %v4176_v13, %v14874_v21  ;;  %v13441_v45 = vmul.f32 %v4995_v10, %v14874_v21  ;;  %v4177_v53 = vmax.f32 %v4167_v29, 0.0  ;;  %v4996_v28 = vmax.f32 %v4986_v36, 0.0  ;;  %v14876_v36 = vld [vmem:[#allocation19_spill] sm:$0xff] }
 0x339   : > { %v5242_v52 = vrot.slane %v5002_v16, 1  ;;  %v5030_v41 = vrot.slane %v13432_v22, 1  ;;  %v5250_v39 = vrot.slane %v13435_v47, 1  ;;  %v4189_v48 = vmul.f32 %v4179_v43, %v14875_v40 }
 0x33a   : > { %v9657_v42 = vpop.f32.mrb[84].mxu0  ;;  %v9909_v56 = vpop.f32.mrb[84].mxu1  ;;  %v5027_v34 = vrot.slane %v13438_v17, 1  ;;  %v5247_v13 = vrot.slane %v13441_v45, 1  ;;  %v5008_v10 = vmul.f32 %v4998_v32, %v14875_v40  ;;  %v4187_v16 = vmul.f32 %v4177_v53, %v14876_v36 }
 0x33b   : > { %v4139_v57 = vpop.f32.mrb[85].mxu0  ;;  %v4958_v29 = vpop.f32.mrb[85].mxu1  ;;  %v5006_v21 = vmul.f32 %v4996_v28, %v14876_v36  ;;  %v5023_v1 = vsel %vm14877_vm14, %v5021_v31, %v5022_v4  ;;  %v5026_v61 = vsel %vm14878_vm6, %v5024_v3, %v5025_v46  ;;  %v5031_v54 = vrot.slane %v4189_v48, 1 }
 0x33c   : > { %v9658_v42 = vpop.f32.mrb[86].mxu0  ;;  %v9910_v56 = vpop.f32.mrb[86].mxu1  ;;  %v6164_v35 = vrot.slane %v4189_v48, 2  ;;  %v5251_v12 = vrot.slane %v5008_v10, 1  ;;  %v5037_v60 = vpack.c.bf16 %v5026_v61, %v5023_v1  ;;  %v5028_v5 = vrot.slane %v4187_v16, 1 }
 0x33d   : > { %v4142_v63 = vpop.f32.mrb[87].mxu0  ;;  %v4961_v43 = vpop.f32.mrb[87].mxu1  ;;  %v6161_v32 = vrot.slane %v4187_v16, 2  ;;  %v5248_v40 = vrot.slane %v5006_v21, 1  ;;  %v5243_v0 = vsel %vm14879_vm9, %v5241_v51, %v5242_v52  ;;  %v13459_v31 = vsel %vm14880_vm15, %v5030_v41, %v5031_v54 }
 0x33e   : > { %v13456_v53 = vsel %vm14841_vm1, %v5250_v39, %v5251_v12  ;;  %9927 = vmatprep.mubr.bf16.mxu0 %v5037_v60  ;;  %v14881_v3 = vrot.slane %v13394_v20, 1  ;;  %v4160_v46 = vadd.f32 %v4139_v57, %v13374_v9  ;;  %v5029_v4 = vsel %vm14883_vm7, %v5027_v34, %v5028_v5  ;;  %v11293_v5 = vld [vmem:[%s14559_s4] ss:$0 sm:$0xff] }
 0x33f   : > { %v5249_v28 = vsel %vm14884_vm12, %v5247_v13, %v5248_v40  ;;  %v4979_v51 = vadd.f32 %v4958_v29, %v13376_v18  ;;  %v13471_v12 = vpack.c.bf16 %v13459_v31, %v5029_v4  ;;  %v13473_v54 = vpack.c.bf16 %v5029_v4, %v5026_v61  ;;  %v13489_v61 = vld [vmem:[%s14560_s5 + $0x8] sm:$0xff]  }
 0x340   : > { %v5246_v48 = vsel %vm14882_vm5, %v14881_v3, %v5245_v25  ;;  %v13476_v52 = vpack.c.bf16 %v13456_v53, %v5249_v28  ;;  %v4161_v18 = vadd.f32 %v4142_v63, %v13378_v62  ;;  %v4980_v25 = vadd.f32 %v4961_v43, %v13380_v24 }
 0x341   : > { %v13467_v1 = vpack.c.bf16 %v5246_v48, %v5243_v0  ;;  %v13478_v41 = vpack.c.bf16 %v5249_v28, %v5246_v48  ;;  %v4170_v0 = vadd.f32 %v11293_v5, %v4160_v46  ;;  %v4989_v9 = vadd.f32 %v11293_v5, %v4979_v51  ;;  %9928 = vmatmul.mubr.bf16.vlgmr.msra.gmra.mrb[88].mxu0 %v13471_v12 }
 0x342   : > { %v6160_v39 = vrot.slane %v13438_v17, 2  ;;  %v5011_v34 = vpack.c.bf16 %v13394_v20, %v13400_v58  ;;  %v5012_v13 = vpack.c.bf16 %v13435_v47, %v13441_v45  ;;  %v14885_v63 = vrot.slane %v13417_v11, 2  ;;  %9932 = vmatpush3.bf16.msra.mxu0 %v13370_v38  ;;  %v13510_v58 = vld [vmem:[%s14560_s5 + $0x10] sm:$0xff]  }
 0x343   : > { %10107 = vmatprep.mubr.bf16.mxu1 %v13467_v1  ;;  %v14886_v62 = vrot.slane %v13397_v50, 2  ;;  %v4180_v10 = vmax.f32 %v4170_v0, 0.0  ;;  %v4999_v57 = vmax.f32 %v4989_v9, 0.0  ;;  %v4171_v17 = vadd.f32 %v11293_v5, %v4161_v18  ;;  %9933 = vmatprep.subr.bf16.mxu0 %v13489_v61  ;;  %v13564_v0 = vld [vmem:[%s14560_s5 + $0x20] sm:$0xff]  }
 0x344   : > { %10108 = vmatmul.mubr.bf16.vlgmr.msra.gmra.mrb[88].mxu1 %v13476_v52  ;;  %v4990_v29 = vadd.f32 %v11293_v5, %v4980_v25  ;;  %9947 = vmatprep.mubr.bf16.mxu0 %v5011_v34  ;;  %v14888_v50 = vrot.slane %v13405_v59, 2  ;;  %v14889_v11 = vrot.slane %v13391_v23, 2  ;;  %v13520_v16 = vsel %vm14891_vm13, %v6160_v39, %v6161_v32  ;;  %v14894_v32 = vld [vmem:[#allocation24_spill] sm:$0xff] }
 0x345   : > { %v13503_v24 = vsel %vm14887_vm11, %v14886_v62, %v14885_v63  ;;  %10112 = vmatpush3.bf16.msra.mxu1 %v13370_v38  ;;  %10127 = vmatprep.mubr.bf16.mxu1 %v5037_v60  ;;  %v14892_v21 = vrot.slane %v13432_v22, 2  ;;  %v4190_v60 = vmul.f32 %v4180_v10, %v13095_v27  ;;  %v5009_v42 = vmul.f32 %v4999_v57, %v13095_v27  ;;  %v13585_v62 = vld [vmem:[%s14560_s5 + $0x28] sm:$0xff]   ;;  %v13633_v57 = vld [vmem:[%s14560_s5 + $0x90] sm:$0xff]  }
 0x346   : > { %v13517_v36 = vsel %vm14890_vm10, %v14889_v11, %v14888_v50  ;;  %v4181_v56 = vmax.f32 %v4171_v17, 0.0  ;;  %v5000_v43 = vmax.f32 %v4990_v29, 0.0  ;;  %10113 = vmatprep.subr.bf16.mxu1 %v13489_v61  ;;  %v13537_v22 = vpack.c.bf16 %v13441_v45, %v13394_v20  ;;  %9934 = vmatpush3.bf16.msra.mxu0 %v13489_v61  ;;  %v13555_v20 = vld [vmem:[%s14560_s5 + $0x18] sm:$0xff]   ;;  %v13621_v10 = vld [vmem:[%s14560_s5 + $0x88] sm:$0xff]   ;;  %v13652_v45 = vld [vmem:[%s14560_s5 + $0xa0] sm:$0xff]  }
 0x347   : > { %v13525_v38 = vsel %vm14893_vm8, %v14892_v21, %v6164_v35  ;;  %v6170_v23 = vpack.c.bf16 %v13517_v36, %v13503_v24  ;;  %v13541_v35 = vpack.c.bf16 %v13520_v16, %v13517_v36  ;;  %v13544_v27 = vpack.c.bf16 %v5009_v42, %v13435_v47  ;;  %9935 = vmatprep.subr.bf16.mxu0 %v13510_v58  ;;  %v13612_v24 = vld [vmem:[%s14560_s5 + $0x80] sm:$0xff]   ;;  %v13643_v47 = vld [vmem:[%s14560_s5 + $0x98] sm:$0xff]   ;;  %v13698_v29 = vld [vmem:[%s14560_s5 + $0xc8] sm:$0xff]  }
 0x348   : > { %v6171_v59 = vpack.c.bf16 %v13525_v38, %v13520_v16  ;;  %v4191_v40 = vmul.f32 %v4181_v56, %v14894_v32  ;;  %v5010_v3 = vmul.f32 %v5000_v43, %v14894_v32  ;;  %v5822_v48 = vrot.slane %v4190_v60, 1  ;;  %v13688_v17 = vld [vmem:[%s14560_s5 + $0xc0] sm:$0xff]   ;;  %v14898_v50 = vld [vmem:[#allocation10_spill] sm:$0xff]  ;;  %v13710_v11 = vld [vmem:[%s14560_s5 + $0xd0] sm:$0xff]  }
 0x349   : > { %10114 = vmatpush3.bf16.msra.mxu1 %v13489_v61  ;;  %v6508_v46 = vrot.slane %v4190_v60, 2  ;;  %v5931_v4 = vrot.slane %v5009_v42, 1  ;;  %v13730_v36 = vld [vmem:[%s14560_s5 + $0xe0] sm:$0xff]   ;;  %v13739_v16 = vld [vmem:[%s14560_s5 + $0xe8] sm:$0xff]   ;;  %v13748_v21 = vld [vmem:[%s14560_s5 + $0xf0] sm:$0xff]  }
 0x34a   : > { %10115 = vmatprep.subr.bf16.mxu1 %v13510_v58  ;;  %v5823_v28 = vrot.slane %v4191_v40, 1  ;;  %v6509_v51 = vrot.slane %v4191_v40, 2  ;;  %v5932_v5 = vrot.slane %v5010_v3, 1  ;;  %9936 = vmatpush3.bf16.msra.mxu0 %v13510_v58  ;;  %v13766_v60 = vld [vmem:[%s14560_s5 + $0x100] sm:$0xff]   ;;  %v13776_v42 = vld [vmem:[%s14560_s5 + $0x108] sm:$0xff]   ;;  %v13786_v56 = vld [vmem:[%s14560_s5 + $0x110] sm:$0xff]  }
 0x34b   : > { %9937 = vmatprep.subr.bf16.mxu0 %v13555_v20  ;;  %v13797_v43 = vld [vmem:[%s14560_s5 + $0x118] sm:$0xff]   ;;  %v13824_v32 = vld [vmem:[%s14560_s5 + $0x130] sm:$0xff]   ;;  %v13842_v3 = vld [vmem:[%s14560_s5 + $0x140] sm:$0xff]  }
 0x34c   : > { %v5824_v9 = vsel %vm14895_vm2, %v5822_v48, %v5823_v28  ;;  %v5933_v18 = vsel %vm14896_vm0, %v5931_v4, %v5932_v5  ;;  %v6510_v25 = vsel %vm14897_vm4, %v6508_v46, %v6509_v51  ;;  %v13833_v40 = vld [vmem:[%s14560_s5 + $0x138] sm:$0xff]   ;;  %v13852_v48 = vld [vmem:[%s14560_s5 + $0x148] sm:$0xff]   ;;  %v13862_v46 = vld [vmem:[%s14560_s5 + $0x150] sm:$0xff]  }
 0x34d   : > { %10116 = vmatpush3.bf16.msra.mxu1 %v13510_v58  ;;  %v13570_v39 = vpack.c.bf16 %v5824_v9, %v13459_v31  ;;  %v13573_v34 = vpack.c.bf16 %v5933_v18, %v13456_v53  ;;  %v13576_v63 = vpack.c.bf16 %v6510_v25, %v13525_v38  ;;  %v13594_v53 = vld [vmem:[%s14560_s5 + $0x30] sm:$0xff]   ;;  %v13603_v31 = vld [vmem:[%s14560_s5 + $0x38] sm:$0xff]   ;;  %v13882_v28 = vld [vmem:[%s14560_s5 + $0x160] sm:$0xff]  }
 0x34e   : > { %10117 = vmatprep.subr.bf16.mxu1 %v13555_v20  ;;  %9938 = vmatpush3.bf16.msra.mxu0 %v13555_v20  ;;  %v13757_v38 = vld [vmem:[%s14560_s5 + $0xf8] sm:$0xff]   ;;  %v13891_v51 = vld [vmem:[%s14560_s5 + $0x168] sm:$0xff]   ;;  %v13900_v5 = vld [vmem:[%s14560_s5 + $0x170] sm:$0xff]  }
 0x34f   : > { %9939 = vmatprep.subr.bf16.mxu0 %v13564_v0  ;;  %v13873_v4 = vld [vmem:[%s14560_s5 + $0x158] sm:$0xff]   ;;  %v13918_v18 = vld [vmem:[%s14560_s5 + $0x180] sm:$0xff]   ;;  %v13928_v25 = vld [vmem:[%s14560_s5 + $0x188] sm:$0xff]  }
 0x350   : > { %v13909_v9 = vld [vmem:[%s14560_s5 + $0x178] sm:$0xff]  }
 0x351   : > { %10118 = vmatpush3.bf16.msra.mxu1 %v13555_v20 }
 0x352   : > { %10119 = vmatprep.subr.bf16.mxu1 %v13564_v0  ;;  %9940 = vmatpush3.bf16.msra.mxu0 %v13564_v0 }
 0x353   : > { %9941 = vmatprep.subr.bf16.mxu0 %v13585_v62 }
 0x355   : > { %10120 = vmatpush3.bf16.msra.mxu1 %v13564_v0 }
 0x356   : > { %10121 = vmatprep.subr.bf16.mxu1 %v13585_v62  ;;  %9942 = vmatpush3.bf16.msra.mxu0 %v13585_v62 }
 0x357   : > { %9943 = vmatprep.subr.bf16.mxu0 %v13594_v53 }
 0x359   : > { %10122 = vmatpush3.bf16.msra.mxu1 %v13585_v62 }
 0x35a   : > { %10123 = vmatprep.subr.bf16.mxu1 %v13594_v53  ;;  %9944 = vmatpush3.bf16.msra.mxu0 %v13594_v53 }
 0x35b   : > { %9945 = vmatprep.subr.bf16.mxu0 %v13603_v31 }
 0x35d   : > { %10124 = vmatpush3.bf16.msra.mxu1 %v13594_v53 }
 0x35e   : > { %10125 = vmatprep.subr.bf16.mxu1 %v13603_v31  ;;  %9946 = vmatpush3.bf16.msra.mxu0 %v13603_v31 }
 0x35f   : > { %9951 = vmatprep.subr.bf16.mxu0 %v13612_v24 }
 0x361   : > { %10126 = vmatpush3.bf16.msra.mxu1 %v13603_v31  ;;  %9948 = vmatmul.mubr.bf16.vlgmr.msra.gmra.mrb[88].mxu0 %v5012_v13  ;;  %v13679_v13 = vld [vmem:[%s14560_s5 + $0xb8] sm:$0xff]  }
 0x362   : > { %10131 = vmatprep.subr.bf16.mxu1 %v13612_v24  ;;  %9952 = vmatpush3.bf16.msra.mxu0 %v13612_v24 }
 0x363   : > { %9967 = vmatprep.mubr.bf16.mxu0 %v13467_v1  ;;  %9953 = vmatprep.subr.bf16.mxu0 %v13621_v10  ;;  %v13661_v1 = vld [vmem:[%s14560_s5 + $0xa8] sm:$0xff]  }
 0x364   : > { %10128 = vmatmul.mubr.bf16.vlgmr.msra.gmra.mrb[88].mxu1 %v13471_v12  ;;  %v13670_v12 = vld [vmem:[%s14560_s5 + $0xb0] sm:$0xff]  }
 0x365   : > { %10132 = vmatpush3.bf16.msra.mxu1 %v13612_v24  ;;  %10147 = vmatprep.mubr.bf16.mxu1 %v6170_v23  ;;  %v13806_v23 = vld [vmem:[%s14560_s5 + $0x120] sm:$0xff]  }
 0x366   : > { %10133 = vmatprep.subr.bf16.mxu1 %v13621_v10  ;;  %9954 = vmatpush3.bf16.msra.mxu0 %v13621_v10 }
 0x367   : > { %9955 = vmatprep.subr.bf16.mxu0 %v13633_v57 }
 0x369   : > { %10134 = vmatpush3.bf16.msra.mxu1 %v13621_v10 }
 0x36a   : > { %10135 = vmatprep.subr.bf16.mxu1 %v13633_v57  ;;  %9956 = vmatpush3.bf16.msra.mxu0 %v13633_v57 }
 0x36b   : > { %9957 = vmatprep.subr.bf16.mxu0 %v13643_v47 }
 0x36d   : > { %10136 = vmatpush3.bf16.msra.mxu1 %v13633_v57 }
 0x36e   : > { %10137 = vmatprep.subr.bf16.mxu1 %v13643_v47  ;;  %9958 = vmatpush3.bf16.msra.mxu0 %v13643_v47 }
 0x36f   : > { %9959 = vmatprep.subr.bf16.mxu0 %v13652_v45 }
 0x371   : > { %10138 = vmatpush3.bf16.msra.mxu1 %v13643_v47 }
 0x372   : > { %10139 = vmatprep.subr.bf16.mxu1 %v13652_v45  ;;  %9960 = vmatpush3.bf16.msra.mxu0 %v13652_v45 }
 0x373   : > { %9961 = vmatprep.subr.bf16.mxu0 %v13661_v1 }
 0x375   : > { %10140 = vmatpush3.bf16.msra.mxu1 %v13652_v45 }
 0x376   : > { %10141 = vmatprep.subr.bf16.mxu1 %v13661_v1  ;;  %9962 = vmatpush3.bf16.msra.mxu0 %v13661_v1 }
 0x377   : > { %9963 = vmatprep.subr.bf16.mxu0 %v13670_v12 }
 0x379   : > { %10142 = vmatpush3.bf16.msra.mxu1 %v13661_v1 }
 0x37a   : > { %10143 = vmatprep.subr.bf16.mxu1 %v13670_v12  ;;  %9964 = vmatpush3.bf16.msra.mxu0 %v13670_v12 }
 0x37b   : > { %9965 = vmatprep.subr.bf16.mxu0 %v13679_v13 }
 0x37d   : > { %10144 = vmatpush3.bf16.msra.mxu1 %v13670_v12 }
 0x37e   : > { %10145 = vmatprep.subr.bf16.mxu1 %v13679_v13  ;;  %9966 = vmatpush3.bf16.msra.mxu0 %v13679_v13 }
 0x37f   : > { %9971 = vmatprep.subr.bf16.mxu0 %v13688_v17 }
 0x381   : > { %10146 = vmatpush3.bf16.msra.mxu1 %v13679_v13  ;;  %9968 = vmatmul.mubr.bf16.vlgmr.msra.gmra.mrb[88].mxu0 %v13476_v52  ;;  %v13721_v52 = vld [vmem:[%s14560_s5 + $0xd8] sm:$0xff]  }
 0x382   : > { %10151 = vmatprep.subr.bf16.mxu1 %v13688_v17  ;;  %9972 = vmatpush3.bf16.msra.mxu0 %v13688_v17 }
 0x383   : > { %9987 = vmatprep.mubr.bf16.mxu0 %v14898_v50  ;;  %9973 = vmatprep.subr.bf16.mxu0 %v13698_v29 }
 0x384   : > { %10148 = vmatmul.mubr.bf16.vlgmr.msra.gmra.mrb[88].mxu1 %v6171_v59  ;;  %v13815_v59 = vld [vmem:[%s14560_s5 + $0x128] sm:$0xff]  }
 0x385   : > { %10152 = vmatpush3.bf16.msra.mxu1 %v13688_v17  ;;  %10167 = vmatprep.mubr.bf16.mxu1 %v13208_v37 }
 0x386   : > { %10153 = vmatprep.subr.bf16.mxu1 %v13698_v29  ;;  %9974 = vmatpush3.bf16.msra.mxu0 %v13698_v29 }
 0x387   : > { %9975 = vmatprep.subr.bf16.mxu0 %v13710_v11 }
 0x389   : > { %10154 = vmatpush3.bf16.msra.mxu1 %v13698_v29 }
 0x38a   : > { %10155 = vmatprep.subr.bf16.mxu1 %v13710_v11  ;;  %9976 = vmatpush3.bf16.msra.mxu0 %v13710_v11 }
 0x38b   : > { %9977 = vmatprep.subr.bf16.mxu0 %v13721_v52 }
 0x38d   : > { %10156 = vmatpush3.bf16.msra.mxu1 %v13710_v11 }
 0x38e   : > { %10157 = vmatprep.subr.bf16.mxu1 %v13721_v52  ;;  %9978 = vmatpush3.bf16.msra.mxu0 %v13721_v52 }
 0x38f   : > { %9979 = vmatprep.subr.bf16.mxu0 %v13730_v36 }
 0x391   : > { %10158 = vmatpush3.bf16.msra.mxu1 %v13721_v52 }
 0x392   : > { %10159 = vmatprep.subr.bf16.mxu1 %v13730_v36  ;;  %9980 = vmatpush3.bf16.msra.mxu0 %v13730_v36 }
 0x393   : > { %9981 = vmatprep.subr.bf16.mxu0 %v13739_v16 }
 0x395   : > { %10160 = vmatpush3.bf16.msra.mxu1 %v13730_v36 }
 0x396   : > { %10161 = vmatprep.subr.bf16.mxu1 %v13739_v16  ;;  %9982 = vmatpush3.bf16.msra.mxu0 %v13739_v16 }
 0x397   : > { %9983 = vmatprep.subr.bf16.mxu0 %v13748_v21 }
 0x399   : > { %10162 = vmatpush3.bf16.msra.mxu1 %v13739_v16 }
 0x39a   : > { %10163 = vmatprep.subr.bf16.mxu1 %v13748_v21  ;;  %9984 = vmatpush3.bf16.msra.mxu0 %v13748_v21 }
 0x39b   : > { %9985 = vmatprep.subr.bf16.mxu0 %v13757_v38 }
 0x39d   : > { %10164 = vmatpush3.bf16.msra.mxu1 %v13748_v21 }
 0x39e   : > { %10165 = vmatprep.subr.bf16.mxu1 %v13757_v38  ;;  %9986 = vmatpush3.bf16.msra.mxu0 %v13757_v38 }
 0x39f   : > { %9991 = vmatprep.subr.bf16.mxu0 %v13766_v60 }
 0x3a1   : > { %10166 = vmatpush3.bf16.msra.mxu1 %v13757_v38  ;;  %9988 = vmatmul.mubr.bf16.vlgmr.msra.gmra.mrb[88].mxu0 %v13217_v7 }
 0x3a2   : > { %10171 = vmatprep.subr.bf16.mxu1 %v13766_v60  ;;  %9992 = vmatpush3.bf16.msra.mxu0 %v13766_v60 }
 0x3a3   : > { %10007 = vmatprep.mubr.bf16.mxu0 %v13208_v37  ;;  %9993 = vmatprep.subr.bf16.mxu0 %v13776_v42 }
 0x3a4   : > { %10168 = vmatmul.mubr.bf16.vlgmr.msra.gmra.mrb[88].mxu1 %v13239_v19 }
 0x3a5   : > { %10172 = vmatpush3.bf16.msra.mxu1 %v13766_v60  ;;  %10187 = vmatprep.mubr.bf16.mxu1 %v13242_v33 }
 0x3a6   : > { %10173 = vmatprep.subr.bf16.mxu1 %v13776_v42  ;;  %9994 = vmatpush3.bf16.msra.mxu0 %v13776_v42 }
 0x3a7   : > { %9995 = vmatprep.subr.bf16.mxu0 %v13786_v56 }
 0x3a9   : > { %10174 = vmatpush3.bf16.msra.mxu1 %v13776_v42 }
 0x3aa   : > { %10175 = vmatprep.subr.bf16.mxu1 %v13786_v56  ;;  %9996 = vmatpush3.bf16.msra.mxu0 %v13786_v56 }
 0x3ab   : > { %9997 = vmatprep.subr.bf16.mxu0 %v13797_v43 }
 0x3ad   : > { %10176 = vmatpush3.bf16.msra.mxu1 %v13786_v56 }
 0x3ae   : > { %10177 = vmatprep.subr.bf16.mxu1 %v13797_v43  ;;  %9998 = vmatpush3.bf16.msra.mxu0 %v13797_v43 }
 0x3af   : > { %9999 = vmatprep.subr.bf16.mxu0 %v13806_v23 }
 0x3b1   : > { %10178 = vmatpush3.bf16.msra.mxu1 %v13797_v43 }
 0x3b2   : > { %10179 = vmatprep.subr.bf16.mxu1 %v13806_v23  ;;  %10000 = vmatpush3.bf16.msra.mxu0 %v13806_v23 }
 0x3b3   : > { %10001 = vmatprep.subr.bf16.mxu0 %v13815_v59 }
 0x3b5   : > { %10180 = vmatpush3.bf16.msra.mxu1 %v13806_v23 }
 0x3b6   : > { %10181 = vmatprep.subr.bf16.mxu1 %v13815_v59  ;;  %10002 = vmatpush3.bf16.msra.mxu0 %v13815_v59 }
 0x3b7   : > { %10003 = vmatprep.subr.bf16.mxu0 %v13824_v32 }
 0x3b9   : > { %10182 = vmatpush3.bf16.msra.mxu1 %v13815_v59 }
 0x3ba   : > { %10183 = vmatprep.subr.bf16.mxu1 %v13824_v32  ;;  %10004 = vmatpush3.bf16.msra.mxu0 %v13824_v32 }
 0x3bb   : > { %10005 = vmatprep.subr.bf16.mxu0 %v13833_v40 }
 0x3bd   : > { %10184 = vmatpush3.bf16.msra.mxu1 %v13824_v32 }
 0x3be   : > { %10185 = vmatprep.subr.bf16.mxu1 %v13833_v40  ;;  %10006 = vmatpush3.bf16.msra.mxu0 %v13833_v40 }
 0x3bf   : > { %10011 = vmatprep.subr.bf16.mxu0 %v13842_v3 }
 0x3c1   : > { %10186 = vmatpush3.bf16.msra.mxu1 %v13833_v40  ;;  %10008 = vmatmul.mubr.bf16.vlgmr.msra.gmra.mrb[88].mxu0 %v13239_v19 }
 0x3c2   : > { %10191 = vmatprep.subr.bf16.mxu1 %v13842_v3  ;;  %10012 = vmatpush3.bf16.msra.mxu0 %v13842_v3 }
 0x3c3   : > { %10027 = vmatprep.mubr.bf16.mxu0 %v13242_v33  ;;  %10013 = vmatprep.subr.bf16.mxu0 %v13852_v48 }
 0x3c4   : > { %10188 = vmatmul.mubr.bf16.vlgmr.msra.gmra.mrb[88].mxu1 %v13244_v30 }
 0x3c5   : > { %10192 = vmatpush3.bf16.msra.mxu1 %v13842_v3  ;;  %10207 = vmatprep.mubr.bf16.mxu1 %v13252_v55 }
 0x3c6   : > { %10193 = vmatprep.subr.bf16.mxu1 %v13852_v48  ;;  %10014 = vmatpush3.bf16.msra.mxu0 %v13852_v48 }
 0x3c7   : > { %10015 = vmatprep.subr.bf16.mxu0 %v13862_v46 }
 0x3c9   : > { %10194 = vmatpush3.bf16.msra.mxu1 %v13852_v48 }
 0x3ca   : > { %10195 = vmatprep.subr.bf16.mxu1 %v13862_v46  ;;  %10016 = vmatpush3.bf16.msra.mxu0 %v13862_v46 }
 0x3cb   : > { %10017 = vmatprep.subr.bf16.mxu0 %v13873_v4 }
 0x3cd   : > { %10196 = vmatpush3.bf16.msra.mxu1 %v13862_v46 }
 0x3ce   : > { %10197 = vmatprep.subr.bf16.mxu1 %v13873_v4  ;;  %10018 = vmatpush3.bf16.msra.mxu0 %v13873_v4 }
 0x3cf   : > { %10019 = vmatprep.subr.bf16.mxu0 %v13882_v28 }
 0x3d1   : > { %10198 = vmatpush3.bf16.msra.mxu1 %v13873_v4 }
 0x3d2   : > { %10199 = vmatprep.subr.bf16.mxu1 %v13882_v28  ;;  %10020 = vmatpush3.bf16.msra.mxu0 %v13882_v28 }
 0x3d3   : > { %10021 = vmatprep.subr.bf16.mxu0 %v13891_v51 }
 0x3d5   : > { %10200 = vmatpush3.bf16.msra.mxu1 %v13882_v28 }
 0x3d6   : > { %10201 = vmatprep.subr.bf16.mxu1 %v13891_v51  ;;  %10022 = vmatpush3.bf16.msra.mxu0 %v13891_v51 }
 0x3d7   : > { %10023 = vmatprep.subr.bf16.mxu0 %v13900_v5 }
 0x3d9   : > { %10202 = vmatpush3.bf16.msra.mxu1 %v13891_v51 }
 0x3da   : > { %10203 = vmatprep.subr.bf16.mxu1 %v13900_v5  ;;  %10024 = vmatpush3.bf16.msra.mxu0 %v13900_v5 }
 0x3db   : > { %10025 = vmatprep.subr.bf16.mxu0 %v13909_v9 }
 0x3dd   : > { %10204 = vmatpush3.bf16.msra.mxu1 %v13900_v5 }
 0x3de   : > { %10205 = vmatprep.subr.bf16.mxu1 %v13909_v9  ;;  %10026 = vmatpush3.bf16.msra.mxu0 %v13909_v9 }
 0x3df   : > { %10031 = vmatprep.subr.bf16.mxu0 %v13918_v18 }
 0x3e1   : > { %10206 = vmatpush3.bf16.msra.mxu1 %v13909_v9  ;;  %10028 = vmatmul.mubr.bf16.vlgmr.msra.gmra.mrb[88].mxu0 %v13244_v30 }
 0x3e2   : > { %10211 = vmatprep.subr.bf16.mxu1 %v13918_v18  ;;  %10032 = vmatpush3.bf16.msra.mxu0 %v13918_v18 }
 0x3e3   : > { %10047 = vmatprep.mubr.bf16.mxu0 %v13537_v22  ;;  %10033 = vmatprep.subr.bf16.mxu0 %v13928_v25 }
 0x3e4   : > { %10208 = vmatmul.mubr.bf16.vlgmr.msra.gmra.mrb[88].mxu1 %v13269_v26 }
 0x3e5   : > { %10212 = vmatpush3.bf16.msra.mxu1 %v13918_v18  ;;  %10227 = vmatprep.mubr.bf16.mxu1 %v13473_v54 }
 0x3e6   : > { %10213 = vmatprep.subr.bf16.mxu1 %v13928_v25  ;;  %10034 = vmatpush3.bf16.msra.mxu0 %v13928_v25 }
 0x3e7   : > { %10035 = vmatprep.subr.bf16.mxu0 %v13938_v2 }
 0x3e9   : > { %10214 = vmatpush3.bf16.msra.mxu1 %v13928_v25 }
 0x3ea   : > { %10215 = vmatprep.subr.bf16.mxu1 %v13938_v2  ;;  %10036 = vmatpush3.bf16.msra.mxu0 %v13938_v2 }
 0x3eb   : > { %10037 = vmatprep.subr.bf16.mxu0 %v13949_v14 }
 0x3ed   : > { %10216 = vmatpush3.bf16.msra.mxu1 %v13938_v2  ;;  %v13976_v2 = vld [vmem:[%s14560_s5 + $0x1b0] sm:$0xff]  }
 0x3ee   : > { %10217 = vmatprep.subr.bf16.mxu1 %v13949_v14  ;;  %10038 = vmatpush3.bf16.msra.mxu0 %v13949_v14  ;;  %14903 = vst [vmem:[#allocation5_spill] sm:$0xff] %v13976_v2 }
 0x3ef   : > { %10039 = vmatprep.subr.bf16.mxu0 %v13958_v6 }
 0x3f1   : > { %10218 = vmatpush3.bf16.msra.mxu1 %v13949_v14  ;;  %v13985_v14 = vld [vmem:[%s14560_s5 + $0x1b8] sm:$0xff]  }
 0x3f2   : > { %10219 = vmatprep.subr.bf16.mxu1 %v13958_v6  ;;  %10040 = vmatpush3.bf16.msra.mxu0 %v13958_v6  ;;  %14904 = vst [vmem:[#allocation18_spill] sm:$0xff] %v13985_v14 }
 0x3f3   : > { %10041 = vmatprep.subr.bf16.mxu0 %v13967_v8 }
 0x3f5   : > { %10220 = vmatpush3.bf16.msra.mxu1 %v13958_v6  ;;  %v13994_v6 = vld [vmem:[%s14560_s5 + $0x1c0] sm:$0xff]  }
 0x3f6   : > { %10221 = vmatprep.subr.bf16.mxu1 %v13967_v8  ;;  %10042 = vmatpush3.bf16.msra.mxu0 %v13967_v8  ;;  %14905 = vst [vmem:[#allocation13_spill] sm:$0xff] %v13994_v6 }
 0x3f7   : > { %10043 = vmatprep.subr.bf16.mxu0 %v13976_v2 }
 0x3f9   : > { %10222 = vmatpush3.bf16.msra.mxu1 %v13967_v8  ;;  %v14034_v8 = vld [vmem:[%s14560_s5 + $0x1e0] sm:$0xff]  }
 0x3fa   : > { %10223 = vmatprep.subr.bf16.mxu1 %v13976_v2  ;;  %10044 = vmatpush3.bf16.msra.mxu0 %v13976_v2  ;;  %14909 = vst [vmem:[#allocation24_spill] sm:$0xff] %v14034_v8 }
 0x3fb   : > { %10045 = vmatprep.subr.bf16.mxu0 %v13985_v14 }
 0x3fd   : > { %10224 = vmatpush3.bf16.msra.mxu1 %v13976_v2  ;;  %v14004_v2 = vld [vmem:[%s14560_s5 + $0x1c8] sm:$0xff]  }
 0x3fe   : > { %10225 = vmatprep.subr.bf16.mxu1 %v13985_v14  ;;  %10046 = vmatpush3.bf16.msra.mxu0 %v13985_v14  ;;  %14906 = vst [vmem:[#allocation12_spill] sm:$0xff] %v14004_v2 }
 0x3ff   : > { %10051 = vmatprep.subr.bf16.mxu0 %v13994_v6 }
 0x401   : > { %10226 = vmatpush3.bf16.msra.mxu1 %v13985_v14  ;;  %10048 = vmatmul.mubr.bf16.vlgmr.msra.gmra.mrb[88].mxu0 %v13544_v27  ;;  %v14014_v14 = vld [vmem:[%s14560_s5 + $0x1d0] sm:$0xff]  }
 0x402   : > { %10231 = vmatprep.subr.bf16.mxu1 %v13994_v6  ;;  %10052 = vmatpush3.bf16.msra.mxu0 %v13994_v6  ;;  %14907 = vst [vmem:[#allocation14_spill] sm:$0xff] %v14014_v14 }
 0x403   : > { %10067 = vmatprep.mubr.bf16.mxu0 %v13473_v54  ;;  %10053 = vmatprep.subr.bf16.mxu0 %v14004_v2 }
 0x404   : > { %10228 = vmatmul.mubr.bf16.vlgmr.msra.gmra.mrb[88].mxu1 %v13570_v39 }
 0x405   : > { %10232 = vmatpush3.bf16.msra.mxu1 %v13994_v6  ;;  %10247 = vmatprep.mubr.bf16.mxu1 %v13478_v41  ;;  %v14025_v6 = vld [vmem:[%s14560_s5 + $0x1d8] sm:$0xff]  }
 0x406   : > { %10233 = vmatprep.subr.bf16.mxu1 %v14004_v2  ;;  %10054 = vmatpush3.bf16.msra.mxu0 %v14004_v2  ;;  %14908 = vst [vmem:[#allocation19_spill] sm:$0xff] %v14025_v6 }
 0x407   : > { %10055 = vmatprep.subr.bf16.mxu0 %v14014_v14 }
 0x409   : > { %10234 = vmatpush3.bf16.msra.mxu1 %v14004_v2  ;;  %v14043_v2 = vld [vmem:[%s14560_s5 + $0x1e8] sm:$0xff]  }
 0x40a   : > { %10235 = vmatprep.subr.bf16.mxu1 %v14014_v14  ;;  %10056 = vmatpush3.bf16.msra.mxu0 %v14014_v14  ;;  %14910 = vst [vmem:[#allocation10_spill] sm:$0xff] %v14043_v2 }
 0x40b   : > { %10057 = vmatprep.subr.bf16.mxu0 %v14025_v6 }
 0x40d   : > { %10236 = vmatpush3.bf16.msra.mxu1 %v14014_v14  ;;  %v14052_v14 = vld [vmem:[%s14560_s5 + $0x1f0] sm:$0xff]  }
 0x40e   : > { %10237 = vmatprep.subr.bf16.mxu1 %v14025_v6  ;;  %10058 = vmatpush3.bf16.msra.mxu0 %v14025_v6  ;;  %14911 = vst [vmem:[#allocation26_spill] sm:$0xff] %v14052_v14 }
 0x40f   : > { %10059 = vmatprep.subr.bf16.mxu0 %v14034_v8 }
 0x411   : > { %10238 = vmatpush3.bf16.msra.mxu1 %v14025_v6  ;;  %v14061_v6 = vld [vmem:[%s14560_s5 + $0x1f8] sm:$0xff]  }
 0x412   : > { %10239 = vmatprep.subr.bf16.mxu1 %v14034_v8  ;;  %10060 = vmatpush3.bf16.msra.mxu0 %v14034_v8  ;;  %14912 = vst [vmem:[#allocation27_spill] sm:$0xff] %v14061_v6 }
 0x413   : > { %10061 = vmatprep.subr.bf16.mxu0 %v14043_v2 }
 0x415   : > { %10240 = vmatpush3.bf16.msra.mxu1 %v14034_v8  ;;  %v14070_v8 = vld [vmem:[%s14560_s5 + $0x200] sm:$0xff]  }
 0x416   : > { %10241 = vmatprep.subr.bf16.mxu1 %v14043_v2  ;;  %10062 = vmatpush3.bf16.msra.mxu0 %v14043_v2  ;;  %14913 = vst [vmem:[#allocation28_spill] sm:$0xff] %v14070_v8 }
 0x417   : > { %10063 = vmatprep.subr.bf16.mxu0 %v14052_v14 }
 0x419   : > { %10242 = vmatpush3.bf16.msra.mxu1 %v14043_v2  ;;  %v14110_v2 = vld [vmem:[%s14560_s5 + $0x220] sm:$0xff]  }
 0x41a   : > { %10243 = vmatprep.subr.bf16.mxu1 %v14052_v14  ;;  %10064 = vmatpush3.bf16.msra.mxu0 %v14052_v14 }
 0x41b   : > { %10065 = vmatprep.subr.bf16.mxu0 %v14061_v6 }
 0x41d   : > { %10244 = vmatpush3.bf16.msra.mxu1 %v14052_v14  ;;  %v14080_v14 = vld [vmem:[%s14560_s5 + $0x208] sm:$0xff]  }
 0x41e   : > { %10245 = vmatprep.subr.bf16.mxu1 %v14061_v6  ;;  %10066 = vmatpush3.bf16.msra.mxu0 %v14061_v6  ;;  %14914 = vst [vmem:[#allocation29_spill] sm:$0xff] %v14080_v14 }
 0x41f   : > { %10071 = vmatprep.subr.bf16.mxu0 %v14070_v8 }
 0x421   : > { %10246 = vmatpush3.bf16.msra.mxu1 %v14061_v6  ;;  %10068 = vmatmul.mubr.bf16.vlgmr.msra.gmra.mrb[88].mxu0 %v13570_v39  ;;  %v14090_v6 = vld [vmem:[%s14560_s5 + $0x210] sm:$0xff]  }
 0x422   : > { %10251 = vmatprep.subr.bf16.mxu1 %v14070_v8  ;;  %10072 = vmatpush3.bf16.msra.mxu0 %v14070_v8  ;;  %14915 = vst [vmem:[#allocation30_spill] sm:$0xff] %v14090_v6 }
 0x423   : > { %10087 = vmatprep.mubr.bf16.mxu0 %v13478_v41  ;;  %10073 = vmatprep.subr.bf16.mxu0 %v14080_v14 }
 0x424   : > { %10248 = vmatmul.mubr.bf16.vlgmr.msra.gmra.mrb[88].mxu1 %v13573_v34 }
 0x425   : > { %10252 = vmatpush3.bf16.msra.mxu1 %v14070_v8  ;;  %10267 = vmatprep.mubr.bf16.mxu1 %v13541_v35  ;;  %v14101_v8 = vld [vmem:[%s14560_s5 + $0x218] sm:$0xff]  }
 0x426   : > { %10253 = vmatprep.subr.bf16.mxu1 %v14080_v14  ;;  %10074 = vmatpush3.bf16.msra.mxu0 %v14080_v14  ;;  %14916 = vst [vmem:[#allocation31_spill] sm:$0xff] %v14101_v8 }
 0x427   : > { %10075 = vmatprep.subr.bf16.mxu0 %v14090_v6 }
 0x429   : > { %10254 = vmatpush3.bf16.msra.mxu1 %v14080_v14  ;;  %v14119_v14 = vld [vmem:[%s14560_s5 + $0x228] sm:$0xff]  }
 0x42a   : > { %10255 = vmatprep.subr.bf16.mxu1 %v14090_v6  ;;  %10076 = vmatpush3.bf16.msra.mxu0 %v14090_v6  ;;  %14917 = vst [vmem:[#allocation32_spill] sm:$0xff] %v14119_v14 }
 0x42b   : > { %10077 = vmatprep.subr.bf16.mxu0 %v14101_v8 }
 0x42d   : > { %10256 = vmatpush3.bf16.msra.mxu1 %v14090_v6  ;;  %v14128_v6 = vld [vmem:[%s14560_s5 + $0x230] sm:$0xff]  }
 0x42e   : > { %10257 = vmatprep.subr.bf16.mxu1 %v14101_v8  ;;  %10078 = vmatpush3.bf16.msra.mxu0 %v14101_v8  ;;  %14918 = vst [vmem:[#allocation33_spill] sm:$0xff] %v14128_v6 }
 0x42f   : > { %10079 = vmatprep.subr.bf16.mxu0 %v14110_v2 }
 0x431   : > { %10258 = vmatpush3.bf16.msra.mxu1 %v14101_v8  ;;  %v14137_v8 = vld [vmem:[%s14560_s5 + $0x238] sm:$0xff]  }
 0x432   : > { %10259 = vmatprep.subr.bf16.mxu1 %v14110_v2  ;;  %10080 = vmatpush3.bf16.msra.mxu0 %v14110_v2  ;;  %14919 = vst [vmem:[#allocation34_spill] sm:$0xff] %v14137_v8 }
 0x433   : > { %10081 = vmatprep.subr.bf16.mxu0 %v14119_v14 }
 0x435   : > { %10260 = vmatpush3.bf16.msra.mxu1 %v14110_v2 }
 0x436   : > { %10261 = vmatprep.subr.bf16.mxu1 %v14119_v14  ;;  %10082 = vmatpush3.bf16.msra.mxu0 %v14119_v14 }
 0x437   : > { %10083 = vmatprep.subr.bf16.mxu0 %v14128_v6 }
 0x439   : > { %10262 = vmatpush3.bf16.msra.mxu1 %v14119_v14  ;;  %v11294_v14 = vld [vmem:[%s14560_s5 + $0x40] sm:$0xff]  }
 0x43a   : > { %10263 = vmatprep.subr.bf16.mxu1 %v14128_v6  ;;  %10084 = vmatpush3.bf16.msra.mxu0 %v14128_v6 }
 0x43b   : > { %10085 = vmatprep.subr.bf16.mxu0 %v14137_v8 }
 0x43d   : > { %10264 = vmatpush3.bf16.msra.mxu1 %v14128_v6  ;;  %v11296_v6 = vld [vmem:[%s14560_s5 + $0x50] sm:$0xff]  }
 0x43e   : > { %10265 = vmatprep.subr.bf16.mxu1 %v14137_v8  ;;  %10086 = vmatpush3.bf16.msra.mxu0 %v14137_v8 }
 0x43f   : > { %10271 = vmatprep.subr.bf16.mxu0 %v11294_v14 }
 0x441   : > { %10266 = vmatpush3.bf16.msra.mxu1 %v14137_v8  ;;  %10088 = vmatmul.mubr.bf16.vlgmr.msra.gmra.mrb[88].mxu0 %v13573_v34  ;;  %v11295_v8 = vld [vmem:[%s14560_s5 + $0x48] sm:$0xff]  }
 0x442   : > { %10451 = vmatprep.subr.bf16.mxu1 %v11294_v14  ;;  %10272 = vmatpush3.bf16.msra.mxu0 %v11294_v14 }
 0x443   : > { %10287 = vmatprep.mubr.bf16.mxu0 %v13208_v37  ;;  %10273 = vmatprep.subr.bf16.mxu0 %v11295_v8 }
 0x444   : > { %10268 = vmatmul.mubr.bf16.vlgmr.msra.gmra.mrb[88].mxu1 %v13576_v63 }
 0x445   : > { %10452 = vmatpush3.bf16.msra.mxu1 %v11294_v14  ;;  %10467 = vmatprep.mubr.bf16.mxu1 %v13242_v33  ;;  %v11297_v14 = vld [vmem:[%s14560_s5 + $0x58] sm:$0xff]  }
 0x446   : > { %10453 = vmatprep.subr.bf16.mxu1 %v11295_v8  ;;  %10274 = vmatpush3.bf16.msra.mxu0 %v11295_v8 }
 0x447   : > { %10275 = vmatprep.subr.bf16.mxu0 %v11296_v6 }
 0x449   : > { %10454 = vmatpush3.bf16.msra.mxu1 %v11295_v8  ;;  %v11298_v8 = vld [vmem:[%s14560_s5 + $0x60] sm:$0xff]  }
 0x44a   : > { %10455 = vmatprep.subr.bf16.mxu1 %v11296_v6  ;;  %10276 = vmatpush3.bf16.msra.mxu0 %v11296_v6 }
 0x44b   : > { %10277 = vmatprep.subr.bf16.mxu0 %v11297_v14 }
 0x44d   : > { %10456 = vmatpush3.bf16.msra.mxu1 %v11296_v6  ;;  %v11299_v6 = vld [vmem:[%s14560_s5 + $0x68] sm:$0xff]  }
 0x44e   : > { %10457 = vmatprep.subr.bf16.mxu1 %v11297_v14  ;;  %10278 = vmatpush3.bf16.msra.mxu0 %v11297_v14 }
 0x44f   : > { %10279 = vmatprep.subr.bf16.mxu0 %v11298_v8 }
 0x451   : > { %10458 = vmatpush3.bf16.msra.mxu1 %v11297_v14  ;;  %v11300_v14 = vld [vmem:[%s14560_s5 + $0x70] sm:$0xff]  }
 0x452   : > { %10459 = vmatprep.subr.bf16.mxu1 %v11298_v8  ;;  %10280 = vmatpush3.bf16.msra.mxu0 %v11298_v8 }
 0x453   : > { %10281 = vmatprep.subr.bf16.mxu0 %v11299_v6 }
 0x455   : > { %10460 = vmatpush3.bf16.msra.mxu1 %v11298_v8  ;;  %v11301_v8 = vld [vmem:[%s14560_s5 + $0x78] sm:$0xff]  }
 0x456   : > { %10461 = vmatprep.subr.bf16.mxu1 %v11299_v6  ;;  %10282 = vmatpush3.bf16.msra.mxu0 %v11299_v6 }
 0x457   : > { %10283 = vmatprep.subr.bf16.mxu0 %v11300_v14 }
 0x459   : > { %10462 = vmatpush3.bf16.msra.mxu1 %v11299_v6  ;;  %v11302_v6 = vld [vmem:[%s14560_s5] sm:$0xff]  }
 0x45a   : > { %10463 = vmatprep.subr.bf16.mxu1 %v11300_v14  ;;  %10284 = vmatpush3.bf16.msra.mxu0 %v11300_v14 }
 0x45b   : > { %10285 = vmatprep.subr.bf16.mxu0 %v11301_v8 }
 0x45d   : > { %10464 = vmatpush3.bf16.msra.mxu1 %v11300_v14 }
 0x45e   : > { %10465 = vmatprep.subr.bf16.mxu1 %v11301_v8  ;;  %10286 = vmatpush3.bf16.msra.mxu0 %v11301_v8 }
 0x45f   : > { %10291 = vmatprep.subr.bf16.mxu0 %v11302_v6 }
 0x461   : > { %10466 = vmatpush3.bf16.msra.mxu1 %v11301_v8  ;;  %10288 = vmatmul.mubr.bf16.vlgmr.msra.gmra.mrb[92].mxu0 %v13239_v19 }
 0x462   : > { %10471 = vmatprep.subr.bf16.mxu1 %v11302_v6  ;;  %10292 = vmatpush3.bf16.msra.mxu0 %v11302_v6 }
 0x463   : > { %10307 = vmatprep.mubr.bf16.mxu0 %v14898_v50  ;;  %10293 = vmatprep.subr.bf16.mxu0 %v13489_v61  ;;  %v14929_v50 = vld [vmem:[#allocation6_spill] sm:$0xff] }
 0x464   : > { %10468 = vmatmul.mubr.bf16.vlgmr.msra.gmra.mrb[92].mxu1 %v13244_v30 }
 0x465   : > { %10472 = vmatpush3.bf16.msra.mxu1 %v11302_v6  ;;  %10487 = vmatprep.mubr.bf16.mxu1 %v13208_v37  ;;  %v14920_v37 = vpack.c.bf16 %v13092_v15, %v13098_v44  ;;  %v14922_v15 = vld [vmem:[#allocation7_spill] sm:$0xff] }
 0x466   : > { %10473 = vmatprep.subr.bf16.mxu1 %v13489_v61  ;;  %10294 = vmatpush3.bf16.msra.mxu0 %v13489_v61  ;;  %v14923_v44 = vld [vmem:[#allocation23_spill] sm:$0xff] }
 0x467   : > { %10295 = vmatprep.subr.bf16.mxu0 %v13510_v58 }
 0x469   : > { %10474 = vmatpush3.bf16.msra.mxu1 %v13489_v61 }
 0x46a   : > { %10475 = vmatprep.subr.bf16.mxu1 %v13510_v58  ;;  %10296 = vmatpush3.bf16.msra.mxu0 %v13510_v58 }
 0x46b   : > { %10297 = vmatprep.subr.bf16.mxu0 %v13555_v20 }
 0x46d   : > { %10476 = vmatpush3.bf16.msra.mxu1 %v13510_v58 }
 0x46e   : > { %10477 = vmatprep.subr.bf16.mxu1 %v13555_v20  ;;  %10298 = vmatpush3.bf16.msra.mxu0 %v13555_v20 }
 0x46f   : > { %10299 = vmatprep.subr.bf16.mxu0 %v13564_v0 }
 0x471   : > { %10478 = vmatpush3.bf16.msra.mxu1 %v13555_v20 }
 0x472   : > { %10479 = vmatprep.subr.bf16.mxu1 %v13564_v0  ;;  %10300 = vmatpush3.bf16.msra.mxu0 %v13564_v0 }
 0x473   : > { %10301 = vmatprep.subr.bf16.mxu0 %v13585_v62 }
 0x475   : > { %10480 = vmatpush3.bf16.msra.mxu1 %v13564_v0 }
 0x476   : > { %10481 = vmatprep.subr.bf16.mxu1 %v13585_v62  ;;  %10302 = vmatpush3.bf16.msra.mxu0 %v13585_v62 }
 0x477   : > { %10303 = vmatprep.subr.bf16.mxu0 %v13594_v53 }
 0x479   : > { %10482 = vmatpush3.bf16.msra.mxu1 %v13585_v62 }
 0x47a   : > { %10483 = vmatprep.subr.bf16.mxu1 %v13594_v53  ;;  %10304 = vmatpush3.bf16.msra.mxu0 %v13594_v53 }
 0x47b   : > { %10305 = vmatprep.subr.bf16.mxu0 %v13603_v31 }
 0x47d   : > { %10484 = vmatpush3.bf16.msra.mxu1 %v13594_v53 }
 0x47e   : > { %10485 = vmatprep.subr.bf16.mxu1 %v13603_v31  ;;  %10306 = vmatpush3.bf16.msra.mxu0 %v13603_v31 }
 0x47f   : > { %10311 = vmatprep.subr.bf16.mxu0 %v13612_v24 }
 0x481   : > { %10486 = vmatpush3.bf16.msra.mxu1 %v13603_v31  ;;  %10308 = vmatmul.mubr.bf16.vlgmr.msra.gmra.mrb[92].mxu0 %v13217_v7  ;;  %v14921_v7 = vld [vmem:[#allocation15_spill] sm:$0xff] }
 0x482   : > { %10491 = vmatprep.subr.bf16.mxu1 %v13612_v24  ;;  %10312 = vmatpush3.bf16.msra.mxu0 %v13612_v24 }
 0x483   : > { %10327 = vmatprep.mubr.bf16.mxu0 %v13242_v33  ;;  %10313 = vmatprep.subr.bf16.mxu0 %v13621_v10  ;;  %v14924_v33 = vld [vmem:[#allocation20_spill] sm:$0xff] }
 0x484   : > { %10488 = vmatmul.mubr.bf16.vlgmr.msra.gmra.mrb[92].mxu1 %v13239_v19  ;;  %v14382_v19 = vld [vmem:[%s14561_s6] ss:$0 sm:$0xff] }
 0x485   : > { %10492 = vmatpush3.bf16.msra.mxu1 %v13612_v24  ;;  %10507 = vmatprep.mubr.bf16.mxu1 %v13252_v55 }
 0x486   : > { %10493 = vmatprep.subr.bf16.mxu1 %v13621_v10  ;;  %10314 = vmatpush3.bf16.msra.mxu0 %v13621_v10 }
 0x487   : > { %10315 = vmatprep.subr.bf16.mxu0 %v13633_v57 }
 0x489   : > { %10494 = vmatpush3.bf16.msra.mxu1 %v13621_v10 }
 0x48a   : > { %10495 = vmatprep.subr.bf16.mxu1 %v13633_v57  ;;  %10316 = vmatpush3.bf16.msra.mxu0 %v13633_v57 }
 0x48b   : > { %10317 = vmatprep.subr.bf16.mxu0 %v13643_v47 }
 0x48d   : > { %10496 = vmatpush3.bf16.msra.mxu1 %v13633_v57 }
 0x48e   : > { %10497 = vmatprep.subr.bf16.mxu1 %v13643_v47  ;;  %10318 = vmatpush3.bf16.msra.mxu0 %v13643_v47 }
 0x48f   : > { %10319 = vmatprep.subr.bf16.mxu0 %v13652_v45 }
 0x491   : > { %10498 = vmatpush3.bf16.msra.mxu1 %v13643_v47 }
 0x492   : > { %10499 = vmatprep.subr.bf16.mxu1 %v13652_v45  ;;  %10320 = vmatpush3.bf16.msra.mxu0 %v13652_v45 }
 0x493   : > { %10321 = vmatprep.subr.bf16.mxu0 %v13661_v1 }
 0x495   : > { %10500 = vmatpush3.bf16.msra.mxu1 %v13652_v45 }
 0x496   : > { %10501 = vmatprep.subr.bf16.mxu1 %v13661_v1  ;;  %10322 = vmatpush3.bf16.msra.mxu0 %v13661_v1 }
 0x497   : > { %10323 = vmatprep.subr.bf16.mxu0 %v13670_v12 }
 0x499   : > { %10502 = vmatpush3.bf16.msra.mxu1 %v13661_v1 }
 0x49a   : > { %10503 = vmatprep.subr.bf16.mxu1 %v13670_v12  ;;  %10324 = vmatpush3.bf16.msra.mxu0 %v13670_v12 }
 0x49b   : > { %10325 = vmatprep.subr.bf16.mxu0 %v13679_v13 }
 0x49d   : > { %10504 = vmatpush3.bf16.msra.mxu1 %v13670_v12 }
 0x49e   : > { %10505 = vmatprep.subr.bf16.mxu1 %v13679_v13  ;;  %10326 = vmatpush3.bf16.msra.mxu0 %v13679_v13 }
 0x49f   : > { %10331 = vmatprep.subr.bf16.mxu0 %v13688_v17 }
 0x4a1   : > { %10506 = vmatpush3.bf16.msra.mxu1 %v13679_v13  ;;  %10328 = vmatmul.mubr.bf16.vlgmr.msra.gmra.mrb[92].mxu0 %v13244_v30  ;;  %v14926_v13 = vld [vmem:[#allocation18_spill] sm:$0xff] }
 0x4a2   : > { %10511 = vmatprep.subr.bf16.mxu1 %v13688_v17  ;;  %10332 = vmatpush3.bf16.msra.mxu0 %v13688_v17 }
 0x4a3   : > { %10347 = vmatprep.mubr.bf16.mxu0 %v13537_v22  ;;  %10333 = vmatprep.subr.bf16.mxu0 %v13698_v29 }
 0x4a4   : > { %10508 = vmatmul.mubr.bf16.vlgmr.msra.gmra.mrb[92].mxu1 %v13269_v26 }
 0x4a5   : > { %10512 = vmatpush3.bf16.msra.mxu1 %v13688_v17  ;;  %10527 = vmatprep.mubr.bf16.mxu1 %v13473_v54  ;;  %v14927_v17 = vld [vmem:[#allocation13_spill] sm:$0xff] }
 0x4a6   : > { %10513 = vmatprep.subr.bf16.mxu1 %v13698_v29  ;;  %10334 = vmatpush3.bf16.msra.mxu0 %v13698_v29 }
 0x4a7   : > { %10335 = vmatprep.subr.bf16.mxu0 %v13710_v11 }
 0x4a9   : > { %10514 = vmatpush3.bf16.msra.mxu1 %v13698_v29  ;;  %v14928_v29 = vld [vmem:[#allocation25_spill] sm:$0xff] }
 0x4aa   : > { %10515 = vmatprep.subr.bf16.mxu1 %v13710_v11  ;;  %10336 = vmatpush3.bf16.msra.mxu0 %v13710_v11 }
 0x4ab   : > { %10337 = vmatprep.subr.bf16.mxu0 %v13721_v52 }
 0x4ad   : > { %10516 = vmatpush3.bf16.msra.mxu1 %v13710_v11  ;;  %v14930_v11 = vpack.c.bf16 %v14928_v29, %v14929_v50 }
 0x4ae   : > { %10517 = vmatprep.subr.bf16.mxu1 %v13721_v52  ;;  %10338 = vmatpush3.bf16.msra.mxu0 %v13721_v52 }
 0x4af   : > { %10339 = vmatprep.subr.bf16.mxu0 %v13730_v36 }
 0x4b1   : > { %10518 = vmatpush3.bf16.msra.mxu1 %v13721_v52  ;;  %v14931_v52 = vld [vmem:[#allocation22_spill] sm:$0xff] }
 0x4b2   : > { %10519 = vmatprep.subr.bf16.mxu1 %v13730_v36  ;;  %10340 = vmatpush3.bf16.msra.mxu0 %v13730_v36 }
 0x4b3   : > { %10341 = vmatprep.subr.bf16.mxu0 %v13739_v16 }
 0x4b5   : > { %10520 = vmatpush3.bf16.msra.mxu1 %v13730_v36  ;;  %v14932_v36 = vld [vmem:[#allocation17_spill] sm:$0xff] }
 0x4b6   : > { %10521 = vmatprep.subr.bf16.mxu1 %v13739_v16  ;;  %10342 = vmatpush3.bf16.msra.mxu0 %v13739_v16 }
 0x4b7   : > { %10343 = vmatprep.subr.bf16.mxu0 %v13748_v21 }
 0x4b9   : > { %10522 = vmatpush3.bf16.msra.mxu1 %v13739_v16  ;;  %v14933_v16 = vld [vmem:[#allocation12_spill] sm:$0xff] }
 0x4ba   : > { %10523 = vmatprep.subr.bf16.mxu1 %v13748_v21  ;;  %10344 = vmatpush3.bf16.msra.mxu0 %v13748_v21 }
 0x4bb   : > { %10345 = vmatprep.subr.bf16.mxu0 %v13757_v38 }
 0x4bd   : > { %10524 = vmatpush3.bf16.msra.mxu1 %v13748_v21  ;;  %v14934_v21 = vld [vmem:[#allocation14_spill] sm:$0xff] }
 0x4be   : > { %10525 = vmatprep.subr.bf16.mxu1 %v13757_v38  ;;  %10346 = vmatpush3.bf16.msra.mxu0 %v13757_v38 }
 0x4bf   : > { %10351 = vmatprep.subr.bf16.mxu0 %v13766_v60 }
 0x4c1   : > { %10526 = vmatpush3.bf16.msra.mxu1 %v13757_v38  ;;  %10348 = vmatmul.mubr.bf16.vlgmr.msra.gmra.mrb[92].mxu0 %v13544_v27  ;;  %v14936_v38 = vld [vmem:[#allocation24_spill] sm:$0xff] }
 0x4c2   : > { %10531 = vmatprep.subr.bf16.mxu1 %v13766_v60  ;;  %10352 = vmatpush3.bf16.msra.mxu0 %v13766_v60 }
 0x4c3   : > { %10367 = vmatprep.mubr.bf16.mxu0 %v13473_v54  ;;  %10353 = vmatprep.subr.bf16.mxu0 %v13776_v42 }
 0x4c4   : > { %10528 = vmatmul.mubr.bf16.vlgmr.msra.gmra.mrb[92].mxu1 %v13570_v39 }
 0x4c5   : > { %10532 = vmatpush3.bf16.msra.mxu1 %v13766_v60  ;;  %10547 = vmatprep.mubr.bf16.mxu1 %v13478_v41  ;;  %v14937_v60 = vld [vmem:[#allocation10_spill] sm:$0xff] }
 0x4c6   : > { %10533 = vmatprep.subr.bf16.mxu1 %v13776_v42  ;;  %10354 = vmatpush3.bf16.msra.mxu0 %v13776_v42 }
 0x4c7   : > { %10355 = vmatprep.subr.bf16.mxu0 %v13786_v56 }
 0x4c9   : > { %10534 = vmatpush3.bf16.msra.mxu1 %v13776_v42  ;;  %v14938_v42 = vld [vmem:[#allocation26_spill] sm:$0xff] }
 0x4ca   : > { %10535 = vmatprep.subr.bf16.mxu1 %v13786_v56  ;;  %10356 = vmatpush3.bf16.msra.mxu0 %v13786_v56 }
 0x4cb   : > { %10357 = vmatprep.subr.bf16.mxu0 %v13797_v43 }
 0x4cd   : > { %10536 = vmatpush3.bf16.msra.mxu1 %v13786_v56  ;;  %v14939_v56 = vld [vmem:[#allocation27_spill] sm:$0xff] }
 0x4ce   : > { %10537 = vmatprep.subr.bf16.mxu1 %v13797_v43  ;;  %10358 = vmatpush3.bf16.msra.mxu0 %v13797_v43 }
 0x4cf   : > { %10359 = vmatprep.subr.bf16.mxu0 %v13806_v23 }
 0x4d1   : > { %10538 = vmatpush3.bf16.msra.mxu1 %v13797_v43  ;;  %v14940_v43 = vld [vmem:[#allocation28_spill] sm:$0xff] }
 0x4d2   : > { %10539 = vmatprep.subr.bf16.mxu1 %v13806_v23  ;;  %10360 = vmatpush3.bf16.msra.mxu0 %v13806_v23 }
 0x4d3   : > { %10361 = vmatprep.subr.bf16.mxu0 %v13815_v59 }
 0x4d5   : > { %10540 = vmatpush3.bf16.msra.mxu1 %v13806_v23  ;;  %v14941_v23 = vld [vmem:[#allocation16_spill] sm:$0xff] }
 0x4d6   : > { %10541 = vmatprep.subr.bf16.mxu1 %v13815_v59  ;;  %10362 = vmatpush3.bf16.msra.mxu0 %v13815_v59 }
 0x4d7   : > { %10363 = vmatprep.subr.bf16.mxu0 %v13824_v32 }
 0x4d9   : > { %10542 = vmatpush3.bf16.msra.mxu1 %v13815_v59  ;;  %v14942_v59 = vld [vmem:[#allocation21_spill] sm:$0xff] }
 0x4da   : > { %10543 = vmatprep.subr.bf16.mxu1 %v13824_v32  ;;  %10364 = vmatpush3.bf16.msra.mxu0 %v13824_v32 }
 0x4db   : > { %10365 = vmatprep.subr.bf16.mxu0 %v13833_v40 }
 0x4dd   : > { %10544 = vmatpush3.bf16.msra.mxu1 %v13824_v32  ;;  %v14943_v32 = vld [vmem:[#allocation9_spill] sm:$0xff] }
 0x4de   : > { %10545 = vmatprep.subr.bf16.mxu1 %v13833_v40  ;;  %10366 = vmatpush3.bf16.msra.mxu0 %v13833_v40 }
 0x4df   : > { %10371 = vmatprep.subr.bf16.mxu0 %v13842_v3 }
 0x4e1   : > { %10546 = vmatpush3.bf16.msra.mxu1 %v13833_v40  ;;  %10368 = vmatmul.mubr.bf16.vlgmr.msra.gmra.mrb[92].mxu0 %v13570_v39  ;;  %v14944_v40 = vpack.c.bf16 %v14942_v59, %v14943_v32 }
 0x4e2   : > { %10551 = vmatprep.subr.bf16.mxu1 %v13842_v3  ;;  %10372 = vmatpush3.bf16.msra.mxu0 %v13842_v3 }
 0x4e3   : > { %10387 = vmatprep.mubr.bf16.mxu0 %v13478_v41  ;;  %10373 = vmatprep.subr.bf16.mxu0 %v13852_v48 }
 0x4e4   : > { %10548 = vmatmul.mubr.bf16.vlgmr.msra.gmra.mrb[92].mxu1 %v13573_v34 }
 0x4e5   : > { %10552 = vmatpush3.bf16.msra.mxu1 %v13842_v3  ;;  %10567 = vmatprep.mubr.bf16.mxu1 %v13541_v35  ;;  %v14945_v3 = vld [vmem:[#allocation29_spill] sm:$0xff] }
 0x4e6   : > { %10553 = vmatprep.subr.bf16.mxu1 %v13852_v48  ;;  %10374 = vmatpush3.bf16.msra.mxu0 %v13852_v48 }
 0x4e7   : > { %10375 = vmatprep.subr.bf16.mxu0 %v13862_v46 }
 0x4e9   : > { %10554 = vmatpush3.bf16.msra.mxu1 %v13852_v48  ;;  %v14946_v48 = vld [vmem:[#allocation30_spill] sm:$0xff] }
 0x4ea   : > { %10555 = vmatprep.subr.bf16.mxu1 %v13862_v46  ;;  %10376 = vmatpush3.bf16.msra.mxu0 %v13862_v46 }
 0x4eb   : > { %10377 = vmatprep.subr.bf16.mxu0 %v13873_v4 }
 0x4ed   : > { %10556 = vmatpush3.bf16.msra.mxu1 %v13862_v46  ;;  %v14947_v46 = vld [vmem:[#allocation31_spill] sm:$0xff] }
 0x4ee   : > { %10557 = vmatprep.subr.bf16.mxu1 %v13873_v4  ;;  %10378 = vmatpush3.bf16.msra.mxu0 %v13873_v4 }
 0x4ef   : > { %10379 = vmatprep.subr.bf16.mxu0 %v13882_v28 }
 0x4f1   : > { %10558 = vmatpush3.bf16.msra.mxu1 %v13873_v4  ;;  %v14948_v4 = vld [vmem:[#allocation32_spill] sm:$0xff] }
 0x4f2   : > { %10559 = vmatprep.subr.bf16.mxu1 %v13882_v28  ;;  %10380 = vmatpush3.bf16.msra.mxu0 %v13882_v28 }
 0x4f3   : > { %10381 = vmatprep.subr.bf16.mxu0 %v13891_v51 }
 0x4f5   : > { %10560 = vmatpush3.bf16.msra.mxu1 %v13882_v28  ;;  %v14949_v28 = vld [vmem:[#allocation33_spill] sm:$0xff] }
 0x4f6   : > { %10561 = vmatprep.subr.bf16.mxu1 %v13891_v51  ;;  %10382 = vmatpush3.bf16.msra.mxu0 %v13891_v51 }
 0x4f7   : > { %10383 = vmatprep.subr.bf16.mxu0 %v13900_v5 }
 0x4f9   : > { %10562 = vmatpush3.bf16.msra.mxu1 %v13891_v51  ;;  %v14950_v51 = vld [vmem:[#allocation34_spill] sm:$0xff] }
 0x4fa   : > { %10563 = vmatprep.subr.bf16.mxu1 %v13900_v5  ;;  %10384 = vmatpush3.bf16.msra.mxu0 %v13900_v5 }
 0x4fb   : > { %10385 = vmatprep.subr.bf16.mxu0 %v13909_v9 }
 0x4fd   : > { %10564 = vmatpush3.bf16.msra.mxu1 %v13900_v5  ;;  %v14952_v5 = vld [vmem:[#allocation11_spill] sm:$0xff] }
 0x4fe   : > { %10565 = vmatprep.subr.bf16.mxu1 %v13909_v9  ;;  %10386 = vmatpush3.bf16.msra.mxu0 %v13909_v9 }
 0x4ff   : > { %10391 = vmatprep.subr.bf16.mxu0 %v13918_v18 }
 0x501   : > { %10566 = vmatpush3.bf16.msra.mxu1 %v13909_v9  ;;  %10388 = vmatmul.mubr.bf16.vlgmr.msra.gmra.mrb[92].mxu0 %v13573_v34  ;;  %v14925_v34 = vld [vmem:[#allocation5_spill] sm:$0xff] }
 0x502   : > { %10571 = vmatprep.subr.bf16.mxu1 %v13918_v18  ;;  %10392 = vmatpush3.bf16.msra.mxu0 %v13918_v18 }
 0x503   : > { %10407 = vmatprep.mubr.bf16.mxu0 %v14920_v37  ;;  %10393 = vmatprep.subr.bf16.mxu0 %v13928_v25 }
 0x504   : > { %10568 = vmatmul.mubr.bf16.vlgmr.msra.gmra.mrb[92].mxu1 %v13576_v63 }
 0x505   : > { %10572 = vmatpush3.bf16.msra.mxu1 %v13918_v18  ;;  %10587 = vmatprep.mubr.bf16.mxu1 %v13273_v49 }
 0x506   : > { %10573 = vmatprep.subr.bf16.mxu1 %v13928_v25  ;;  %10394 = vmatpush3.bf16.msra.mxu0 %v13928_v25 }
 0x507   : > { %10395 = vmatprep.subr.bf16.mxu0 %v14921_v7 }
 0x509   : > { %10574 = vmatpush3.bf16.msra.mxu1 %v13928_v25 }
 0x50a   : > { %10575 = vmatprep.subr.bf16.mxu1 %v14921_v7  ;;  %10396 = vmatpush3.bf16.msra.mxu0 %v14921_v7 }
 0x50b   : > { %10397 = vmatprep.subr.bf16.mxu0 %v14922_v15 }
 0x50d   : > { %10576 = vmatpush3.bf16.msra.mxu1 %v14921_v7 }
 0x50e   : > { %10577 = vmatprep.subr.bf16.mxu1 %v14922_v15  ;;  %10398 = vmatpush3.bf16.msra.mxu0 %v14922_v15 }
 0x50f   : > { %10399 = vmatprep.subr.bf16.mxu0 %v14923_v44 }
 0x511   : > { %10578 = vmatpush3.bf16.msra.mxu1 %v14922_v15 }
 0x512   : > { %10579 = vmatprep.subr.bf16.mxu1 %v14923_v44  ;;  %10400 = vmatpush3.bf16.msra.mxu0 %v14923_v44 }
 0x513   : > { %10401 = vmatprep.subr.bf16.mxu0 %v14924_v33 }
 0x514   : > { %v10089_v30 = vpop.f32.mrb[88].mxu0 }
 0x515   : > { %10580 = vmatpush3.bf16.msra.mxu1 %v14923_v44  ;;  %v6046_v55 = vadd.f32 %v10089_v30, %v14382_v19  ;;  %v6019_v54 = vpop.f32.mrb[89].mxu0 }
 0x516   : > { %10581 = vmatprep.subr.bf16.mxu1 %v14924_v33  ;;  %v6044_v61 = vadd.f32 %v14382_v19, %v6019_v54  ;;  %v10090_v22 = vpop.f32.mrb[90].mxu0  ;;  %10402 = vmatpush3.bf16.msra.mxu0 %v14924_v33 }
 0x517   : > { %v10269_v26 = vpop.f32.mrb[88].mxu1  ;;  %v6050_v35 = vmax.f32 %v6046_v55, 0.0  ;;  %v6047_v20 = vadd.f32 %v10090_v22, %v14382_v19  ;;  %v6022_v39 = vpop.f32.mrb[91].mxu0  ;;  %10403 = vmatprep.subr.bf16.mxu0 %v14925_v34 }
 0x518   : > { %v6569_v41 = vadd.f32 %v10269_v26, %v14382_v19  ;;  %v6548_v58 = vpop.f32.mrb[89].mxu1  ;;  %v6048_v62 = vmax.f32 %v6044_v61, 0.0  ;;  %v6045_v31 = vadd.f32 %v14382_v19, %v6022_v39 }
 0x519   : > { %v6567_v27 = vadd.f32 %v14382_v19, %v6548_v58  ;;  %v10270_v0 = vpop.f32.mrb[90].mxu1  ;;  %10582 = vmatpush3.bf16.msra.mxu1 %v14924_v33  ;;  %6054 = vst [vmem:[%s14398_s24 + $0x10] sm:$0xff] %v6050_v35  ;;  %v6051_v57 = vmax.f32 %v6047_v20, 0.0 }
 0x51a   : > { %v6573_v63 = vmax.f32 %v6569_v41, 0.0  ;;  %v6570_v53 = vadd.f32 %v10270_v0, %v14382_v19  ;;  %v6551_v24 = vpop.f32.mrb[91].mxu1  ;;  %10583 = vmatprep.subr.bf16.mxu1 %v14925_v34  ;;  %6052 = vst [vmem:[%s14398_s24] sm:$0xff] %v6048_v62  ;;  %v6049_v1 = vmax.f32 %v6045_v31, 0.0  ;;  %10404 = vmatpush3.bf16.msra.mxu0 %v14925_v34 }
 0x51b   : > { %v6571_v10 = vmax.f32 %v6567_v27, 0.0  ;;  %v6568_v47 = vadd.f32 %v14382_v19, %v6551_v24  ;;  %6055 = vst [vmem:[%s14398_s24 + $0x18] sm:$0xff] %v6051_v57  ;;  %10405 = vmatprep.subr.bf16.mxu0 %v14926_v13 }
 0x51c   : > { %8022 = vst [vmem:[%s14398_s24 + $0x30] sm:$0xff] %v6573_v63  ;;  %v6574_v45 = vmax.f32 %v6570_v53, 0.0  ;;  %6053 = vst [vmem:[%s14398_s24 + $0x8] sm:$0xff] %v6049_v1 }
 0x51d   : > { %8020 = vst [vmem:[%s14398_s24 + $0x20] sm:$0xff] %v6571_v10  ;;  %v6572_v12 = vmax.f32 %v6568_v47, 0.0  ;;  %10584 = vmatpush3.bf16.msra.mxu1 %v14925_v34 }
 0x51e   : > { %8023 = vst [vmem:[%s14398_s24 + $0x38] sm:$0xff] %v6574_v45  ;;  %10585 = vmatprep.subr.bf16.mxu1 %v14926_v13  ;;  %10406 = vmatpush3.bf16.msra.mxu0 %v14926_v13 }
 0x51f   : > { %8021 = vst [vmem:[%s14398_s24 + $0x28] sm:$0xff] %v6572_v12  ;;  %10411 = vmatprep.subr.bf16.mxu0 %v14927_v17 }
 0x520   : > { %v7641_v62 = vld [vmem:[%s14398_s24 + $0x10] sm:$0xff] (%p11446_p5) }
 0x521   : > { %10586 = vmatpush3.bf16.msra.mxu1 %v14926_v13  ;;  %10408 = vmatmul.mubr.bf16.vlgmr.msra.gmra.mrb[92].mxu0 %v14930_v11  ;;  %7642 = vst [vmem:[%s7579_s14 + $0x10] sm:$0xff] (%p11446_p5), %v7641_v62 }
 0x522   : > { %10591 = vmatprep.subr.bf16.mxu1 %v14927_v17  ;;  %10412 = vmatpush3.bf16.msra.mxu0 %v14927_v17  ;;  %v7643_v53 = vld [vmem:[%s14398_s24 + $0x18] sm:$0xff] (%p11446_p5) }
 0x523   : > { %10427 = vmatprep.mubr.bf16.mxu0 %v13273_v49  ;;  %10413 = vmatprep.subr.bf16.mxu0 %v14933_v16  ;;  %v14935_v49 = vld [vmem:[#allocation19_spill] sm:$0xff]  ;;  %v7639_v63 = vld [vmem:[%s14398_s24 + $0x8] sm:$0xff] (%p11446_p5)  ;;  %7644 = vst [vmem:[%s7579_s14 + $0x18] sm:$0xff] (%p11446_p5), %v7643_v53 }
 0x524   : > { %10588 = vmatmul.mubr.bf16.vlgmr.msra.gmra.mrb[92].mxu1 %v14931_v52  ;;  %v7645_v31 = vld [vmem:[%s14398_s24 + $0x20] sm:$0xff] (%p11446_p5)  ;;  %v7649_v10 = vld [vmem:[%s14398_s24 + $0x30] sm:$0xff] (%p11446_p5)  ;;  %7640 = vst [vmem:[%s7579_s14 + $0x8] sm:$0xff] (%p11446_p5), %v7639_v63 }
 0x525   : > { %10592 = vmatpush3.bf16.msra.mxu1 %v14927_v17  ;;  %10607 = vmatprep.mubr.bf16.mxu1 %v14932_v36  ;;  %v7651_v57 = vld [vmem:[%s14398_s24 + $0x38] sm:$0xff] (%p11446_p5)  ;;  %7646 = vst [vmem:[%s7579_s14 + $0x40] sm:$0xff] (%p11446_p5), %v7645_v31  ;;  %7650 = vst [vmem:[%s7579_s14 + $0x50] sm:$0xff] (%p11446_p5), %v7649_v10 }
 0x526   : > { %10593 = vmatprep.subr.bf16.mxu1 %v14933_v16  ;;  %10414 = vmatpush3.bf16.msra.mxu0 %v14933_v16  ;;  %v7647_v24 = vld [vmem:[%s14398_s24 + $0x28] sm:$0xff] (%p11446_p5)  ;;  %7652 = vst [vmem:[%s7579_s14 + $0x58] sm:$0xff] (%p11446_p5), %v7651_v57 }
 0x527   : > { %10415 = vmatprep.subr.bf16.mxu0 %v14934_v21  ;;  %7648 = vst [vmem:[%s7579_s14 + $0x48] sm:$0xff] (%p11446_p5), %v7647_v24 }
 0x529   : > { %10594 = vmatpush3.bf16.msra.mxu1 %v14933_v16 }
 0x52a   : > { %10595 = vmatprep.subr.bf16.mxu1 %v14934_v21  ;;  %10416 = vmatpush3.bf16.msra.mxu0 %v14934_v21 }
 0x52b   : > { %10417 = vmatprep.subr.bf16.mxu0 %v14935_v49 }
 0x52d   : > { %10596 = vmatpush3.bf16.msra.mxu1 %v14934_v21 }
 0x52e   : > { %10597 = vmatprep.subr.bf16.mxu1 %v14935_v49  ;;  %10418 = vmatpush3.bf16.msra.mxu0 %v14935_v49 }
 0x52f   : > { %10419 = vmatprep.subr.bf16.mxu0 %v14936_v38 }
 0x531   : > { %10598 = vmatpush3.bf16.msra.mxu1 %v14935_v49 }
 0x532   : > { %10599 = vmatprep.subr.bf16.mxu1 %v14936_v38  ;;  %10420 = vmatpush3.bf16.msra.mxu0 %v14936_v38 }
 0x533   : > { %10421 = vmatprep.subr.bf16.mxu0 %v14937_v60 }
 0x535   : > { %10600 = vmatpush3.bf16.msra.mxu1 %v14936_v38 }
 0x536   : > { %10601 = vmatprep.subr.bf16.mxu1 %v14937_v60  ;;  %10422 = vmatpush3.bf16.msra.mxu0 %v14937_v60 }
 0x537   : > { %10423 = vmatprep.subr.bf16.mxu0 %v14938_v42 }
 0x539   : > { %10602 = vmatpush3.bf16.msra.mxu1 %v14937_v60 }
 0x53a   : > { %10603 = vmatprep.subr.bf16.mxu1 %v14938_v42  ;;  %10424 = vmatpush3.bf16.msra.mxu0 %v14938_v42 }
 0x53b   : > { %10425 = vmatprep.subr.bf16.mxu0 %v14939_v56 }
 0x53d   : > { %10604 = vmatpush3.bf16.msra.mxu1 %v14938_v42 }
 0x53e   : > { %10605 = vmatprep.subr.bf16.mxu1 %v14939_v56  ;;  %10426 = vmatpush3.bf16.msra.mxu0 %v14939_v56 }
 0x53f   : > { %10431 = vmatprep.subr.bf16.mxu0 %v14940_v43 }
 0x541   : > { %10606 = vmatpush3.bf16.msra.mxu1 %v14939_v56  ;;  %10428 = vmatmul.mubr.bf16.vlgmr.msra.gmra.mrb[92].mxu0 %v14931_v52 }
 0x542   : > { %10611 = vmatprep.subr.bf16.mxu1 %v14940_v43  ;;  %10432 = vmatpush3.bf16.msra.mxu0 %v14940_v43 }
 0x543   : > { %10447 = vmatprep.mubr.bf16.mxu0 %v14932_v36  ;;  %10433 = vmatprep.subr.bf16.mxu0 %v14945_v3 }
 0x544   : > { %10608 = vmatmul.mubr.bf16.vlgmr.msra.gmra.mrb[92].mxu1 %v14941_v23 }
 0x545   : > { %10612 = vmatpush3.bf16.msra.mxu1 %v14940_v43  ;;  %10627 = vmatprep.mubr.bf16.mxu1 %v14944_v40 }
 0x546   : > { %10613 = vmatprep.subr.bf16.mxu1 %v14945_v3  ;;  %10434 = vmatpush3.bf16.msra.mxu0 %v14945_v3 }
 0x547   : > { %10435 = vmatprep.subr.bf16.mxu0 %v14946_v48 }
 0x549   : > { %10614 = vmatpush3.bf16.msra.mxu1 %v14945_v3 }
 0x54a   : > { %10615 = vmatprep.subr.bf16.mxu1 %v14946_v48  ;;  %10436 = vmatpush3.bf16.msra.mxu0 %v14946_v48 }
 0x54b   : > { %10437 = vmatprep.subr.bf16.mxu0 %v14947_v46 }
 0x54d   : > { %10616 = vmatpush3.bf16.msra.mxu1 %v14946_v48 }
 0x54e   : > { %10617 = vmatprep.subr.bf16.mxu1 %v14947_v46  ;;  %10438 = vmatpush3.bf16.msra.mxu0 %v14947_v46 }
 0x54f   : > { %10439 = vmatprep.subr.bf16.mxu0 %v14110_v2 }
 0x551   : > { %10618 = vmatpush3.bf16.msra.mxu1 %v14947_v46 }
 0x552   : > { %10619 = vmatprep.subr.bf16.mxu1 %v14110_v2  ;;  %10440 = vmatpush3.bf16.msra.mxu0 %v14110_v2 }
 0x553   : > { %10441 = vmatprep.subr.bf16.mxu0 %v14948_v4 }
 0x555   : > { %10620 = vmatpush3.bf16.msra.mxu1 %v14110_v2  ;;  %v14951_v2 = vld [vmem:[#allocation8_spill] sm:$0xff] }
 0x556   : > { %10621 = vmatprep.subr.bf16.mxu1 %v14948_v4  ;;  %10442 = vmatpush3.bf16.msra.mxu0 %v14948_v4  ;;  %v14953_v9 = vpack.c.bf16 %v14951_v2, %v14952_v5 }
 0x557   : > { %10443 = vmatprep.subr.bf16.mxu0 %v14949_v28 }
 0x559   : > { %10622 = vmatpush3.bf16.msra.mxu1 %v14948_v4 }
 0x55a   : > { %10623 = vmatprep.subr.bf16.mxu1 %v14949_v28  ;;  %10444 = vmatpush3.bf16.msra.mxu0 %v14949_v28 }
 0x55b   : > { %10445 = vmatprep.subr.bf16.mxu0 %v14950_v51 }
 0x55d   : > { %10624 = vmatpush3.bf16.msra.mxu1 %v14949_v28 }
 0x55e   : > { %10625 = vmatprep.subr.bf16.mxu1 %v14950_v51  ;;  %10446 = vmatpush3.bf16.msra.mxu0 %v14950_v51 }
 0x561   : > { %10626 = vmatpush3.bf16.msra.mxu1 %v14950_v51  ;;  %10448 = vmatmul.mubr.bf16.vlgmr.msra.gmra.mrb[92].mxu0 %v14941_v23 }
 0x564   : > { %10628 = vmatmul.mubr.bf16.vlgmr.msra.gmra.mrb[92].mxu1 %v14953_v9 }
 0x634   : > { %v10449_v18 = vpop.f32.mrb[92].mxu0 }
 0x635   : > { %v7069_v25 = vadd.f32 %v10449_v18, %v14382_v19  ;;  %v7048_v8 = vpop.f32.mrb[93].mxu0 }
 0x636   : > { %v7067_v37 = vadd.f32 %v14382_v19, %v7048_v8  ;;  %v10450_v15 = vpop.f32.mrb[94].mxu0 }
 0x637   : > { %v10629_v14 = vpop.f32.mrb[92].mxu1  ;;  %v7073_v44 = vmax.f32 %v7069_v25, 0.0  ;;  %v7070_v30 = vadd.f32 %v10450_v15, %v14382_v19  ;;  %v7051_v26 = vpop.f32.mrb[95].mxu0 }
 0x638   : > { %v7557_v6 = vadd.f32 %v10629_v14, %v14382_v19  ;;  %v7536_v7 = vpop.f32.mrb[93].mxu1  ;;  %v7071_v41 = vmax.f32 %v7067_v37, 0.0  ;;  %v7068_v58 = vadd.f32 %v14382_v19, %v7051_v26 }
 0x639   : > { %v7555_v33 = vadd.f32 %v14382_v19, %v7536_v7  ;;  %v10630_v55 = vpop.f32.mrb[94].mxu1  ;;  %8026 = vst [vmem:[%s14398_s24 + $0x50] sm:$0xff] %v7073_v44  ;;  %v7074_v27 = vmax.f32 %v7070_v30, 0.0  ;;  %7574 = sbr.rel (!%p11446_p5) target bundleno = 1608 (0x648), region = 52 }
 0x63a   : > { %v7561_v54 = vmax.f32 %v7557_v6, 0.0  ;;  %v7558_v61 = vadd.f32 %v10630_v55, %v14382_v19  ;;  %v7539_v22 = vpop.f32.mrb[95].mxu1  ;;  %8024 = vst [vmem:[%s14398_s24 + $0x40] sm:$0xff] %v7071_v41  ;;  %v7072_v39 = vmax.f32 %v7068_v58, 0.0 }
 0x63b   : > { %v7559_v35 = vmax.f32 %v7555_v33, 0.0  ;;  %v7556_v20 = vadd.f32 %v14382_v19, %v7539_v22  ;;  %8027 = vst [vmem:[%s14398_s24 + $0x58] sm:$0xff] %v7074_v27  ;;  %v7637_v19 = vld [vmem:[%s14398_s24] sm:$0xff] (%p11446_p5) }
 0x63c   : > { %8030 = vst [vmem:[%s14398_s24 + $0x70] sm:$0xff] %v7561_v54  ;;  %v7562_v0 = vmax.f32 %v7558_v61, 0.0  ;;  %8025 = vst [vmem:[%s14398_s24 + $0x48] sm:$0xff] %v7072_v39 }
 0x63d   : > { %8028 = vst [vmem:[%s14398_s24 + $0x60] sm:$0xff] %v7559_v35  ;;  %v7560_v34 = vmax.f32 %v7556_v20, 0.0  ;;  %7638 = vst [vmem:[%s7579_s14] sm:$0xff] (%p11446_p5), %v7637_v19 }
 0x63e   : > { %8031 = vst [vmem:[%s14398_s24 + $0x78] sm:$0xff] %v7562_v0 }
 0x63f   : > { %8029 = vst [vmem:[%s14398_s24 + $0x68] sm:$0xff] %v7560_v34 }
 0x640   : > { %v7657_v1 = vld [vmem:[%s14398_s24 + $0x50] sm:$0xff] }
 0x641   : > { %v7653_v47 = vld [vmem:[%s14398_s24 + $0x40] sm:$0xff]  ;;  %7658 = vst [vmem:[%s7579_s14 + $0x90] sm:$0xff] %v7657_v1 }
 0x642   : > { %v7659_v12 = vld [vmem:[%s14398_s24 + $0x58] sm:$0xff]  ;;  %7654 = vst [vmem:[%s7579_s14 + $0x80] sm:$0xff] %v7653_v47 }
 0x643   : > { %v7655_v45 = vld [vmem:[%s14398_s24 + $0x48] sm:$0xff]  ;;  %7660 = vst [vmem:[%s7579_s14 + $0x98] sm:$0xff] %v7659_v12  ;;  %v7665_v29 = vld [vmem:[%s14398_s24 + $0x70] sm:$0xff] }
 0x644   : > { %7656 = vst [vmem:[%s7579_s14 + $0x88] sm:$0xff] %v7655_v45  ;;  %v7661_v13 = vld [vmem:[%s14398_s24 + $0x60] sm:$0xff]  ;;  %7666 = vst [vmem:[%s7579_s14 + $0xd0] sm:$0xff] %v7665_v29 }
 0x645   : > { %7662 = vst [vmem:[%s7579_s14 + $0xc0] sm:$0xff] %v7661_v13  ;;  %v7667_v50 = vld [vmem:[%s14398_s24 + $0x78] sm:$0xff] }
 0x646   : > { %v7663_v17 = vld [vmem:[%s14398_s24 + $0x68] sm:$0xff]  ;;  %7668 = vst [vmem:[%s7579_s14 + $0xd8] sm:$0xff] %v7667_v50 }
 0x647   : > { %7664 = vst [vmem:[%s7579_s14 + $0xc8] sm:$0xff] %v7663_v17 }
 0x648 PF: > { %s17_s30 = sadd.s32 1, %s11357_s30   ;;  %s14954_s22 = sld [smem:[#allocation3_spill]] }
 0x649   : > { %p14_p10 = scmp.ge.s32.totalorder %s17_s30, 6   ;;  %s14955_s15 = sld [smem:[#allocation4_spill]] }
 0x64a   : > { %s14956_s24 = smov %s11337_s25  ;;  %s14957_s25 = smov %s11457_s16 }
 0x64b   : > { %s14958_s26 = smov %s11349_s28  ;;  %s14959_s27 = smov %s11353_s29 }
 0x64c   :  { %16 = sbr.rel (!%p14_p10) target bundleno = 4 (0x4), region = 125 }
 0x64e   : > { %s14960_s28 = smov %s14954_s22 }
 0x64f   : > { %s14961_s29 = smov %s14955_s15 }

</bundles_post_ra>
